<compile_context>
chip_gen: v7x
topology: tpu7x:2x2x1
jax: 0.10.0
libtpu: 0.0.40
codegen_flags: <defaults>
</compile_context>

<pallas_src>
import functools

import jax
import jax.numpy as jnp
from jax import lax
from jax.experimental import pallas as pl
from jax.experimental.pallas import tpu as pltpu

NEG_SLOPE = 0.01   # nn.LeakyReLU default negative_slope
BN_EPS = 1e-5      # nn.BatchNorm2d default eps
MID_PAD = 8        # aligned zero-row prologue of the mid scratch


def _conv_block_kernel(x_ref, mask_ref, w1_ref, w2_ref, aff_ref, o_ref,
                       xf32_ref, mid_ref, *, W, TH):
    """Fused (3x3 conv + BN + LReLU) x2 for one (batch, row-tile) grid step.

    x_ref:    (1, (H+4)*Wp + 2, Cin)    bf16, flattened sample padded by 2 rows /
                                        1 col (+1 extra zero flat row each end)
    mask_ref: ((H+2)*Wp, 1)             f32, 1.0 on true image pixels of the
                                        conv-1-padded frame, 0.0 on the ring
    w1_ref:   (9, Cin, Coutp)           bf16, tap-major (dy*3+dx) conv-1 weight
    w2_ref:   (9, Coutp, Coutp)         bf16, conv-2 weight
    aff_ref:  (4, Coutp)                f32, rows = [scale1, shift1, scale2, shift2]
    o_ref:    (1, TH*Wp, Coutp)         output slab (padded-width layout)
    xf32_ref: ((H+4)*Wp + 2, Cin)       f32 staging scratch for activations
    mid_ref:  ((TH+2)*Wp + 16, Coutp)   f32 scratch holding the masked layer-1 output
    """
    Wp = W + 2
    slab1 = (TH + 2) * Wp          # layer-1 rows (tile + 1-row halo each side)
    slab2 = TH * Wp                # layer-2 / output rows
    cdim = w1_ref.shape[-1]

    t = pl.program_id(1)
    base = t * slab2               # flat offset of this tile in the padded frame

    # Stage the bf16 sample as f32 once per step (aligned full-block load);
    # later unaligned row slices then stay on the well-supported 32-bit path.
    xf32_ref[...] = x_ref[0].astype(jnp.float32)

    # ---- conv1 (3x3, SAME) as 9 shifted-slab matmuls + folded BN + LeakyReLU
    acc = jnp.zeros((slab1, cdim), jnp.float32)
    for dy in range(3):
        for dx in range(3):
            xs = xf32_ref[pl.ds(base + dy * Wp + dx, slab1), :].astype(jnp.bfloat16)
            acc = acc + jnp.dot(xs, w1_ref[dy * 3 + dx],
                                preferred_element_type=jnp.float32)
    h = acc * aff_ref[0:1, :] + aff_ref[1:2, :]
    h = jnp.maximum(h, NEG_SLOPE * h)                  # LeakyReLU
    h = h * mask_ref[pl.ds(base, slab1), :]            # zero conv-2 padding ring
    # TODO(synk): Dropout between the convs is identity in eval mode; training-mode
    # dropout RNG and BatchNorm batch statistics are not reproduced here.

    # ---- stage masked layer-1 output in VMEM (zero rows around the slab) ----
    mid_rows = mid_ref.shape[0]
    mid_ref[0:MID_PAD, :] = jnp.zeros((MID_PAD, cdim), mid_ref.dtype)
    mid_ref[MID_PAD + slab1:, :] = jnp.zeros(
        (mid_rows - MID_PAD - slab1, cdim), mid_ref.dtype)
    mid_ref[MID_PAD:MID_PAD + slab1, :] = h

    # ---- conv2 (3x3, SAME) + folded BN + LeakyReLU ----
    acc2 = jnp.zeros((slab2, cdim), jnp.float32)
    for dy in range(3):
        for dx in range(3):
            off = MID_PAD - 1 + dy * Wp + dx
            ms = mid_ref[off:off + slab2, :].astype(jnp.bfloat16)
            acc2 = acc2 + jnp.dot(ms, w2_ref[dy * 3 + dx],
                                  preferred_element_type=jnp.float32)
    y = acc2 * aff_ref[2:3, :] + aff_ref[3:4, :]
    y = jnp.maximum(y, NEG_SLOPE * y)
    o_ref[0] = y.astype(o_ref.dtype)


def _pick_tile_h(H, W, max_rows=2048):
    """Largest row tile dividing H whose layer-1 slab stays <= max_rows rows."""
    Wp = W + 2
    if (H + 2) * Wp <= max_rows:
        return H
    for d in range(H - 1, 0, -1):
        if H % d == 0 and (d * Wp) % 8 == 0 and (d + 2) * Wp <= max_rows:
            return d
    return H   # no clean row tiling; fall back to whole image


def _vmem_limit_bytes(Lx, Cin, mrows, Coutp, slab1, slab2):
    """Explicit scoped-VMEM budget (with headroom) derived from the tile sizes."""
    pad8 = lambda r: -(-r // 8) * 8
    padl = lambda c: -(-c // 128) * 128
    vb = lambda r, c, it: pad8(r) * padl(c) * it
    b = 0
    b += 2 * vb(Lx, Cin, 2)                 # x block (double buffered, bf16)
    b += 2 * vb(mrows, 1, 4)                # mask
    b += 2 * 9 * vb(Cin, Coutp, 2)          # w1
    b += 2 * 9 * vb(Coutp, Coutp, 2)        # w2
    b += 2 * vb(4, Coutp, 4)                # scale/shift table
    b += 2 * vb(slab2, Coutp, 4)            # output block
    b += vb(Lx, Cin, 4)                     # f32 activation staging scratch
    b += vb(slab1 + 16, Coutp, 4)           # mid scratch
    b += 3 * vb(slab1, Coutp, 4)            # accumulators / temporaries
    return int(min(max(2 * b + (4 << 20), 32 << 20), 112 << 20))


def conv_block_nhwc(x_nhwc, p, *, tile_h=None):
    """Fused ConvBlock forward (eval semantics), NHWC in / NHWC out."""
    N, H, W, Cin = x_nhwc.shape
    Cout = p["w1"].shape[-1]
    Wp = W + 2
    Coutp = -(-Cout // 128) * 128

    TH = tile_h if tile_h is not None else _pick_tile_h(H, W)
    if H % TH != 0 or (TH != H and (TH * Wp) % 8 != 0):
        raise ValueError(f"invalid tile_h={TH} for H={H}, W={W}")
    T = H // TH
    slab1 = (TH + 2) * Wp
    slab2 = TH * Wp
    Lx = (H + 4) * Wp + 2

    # ---- glue: zero-pad (2 rows for the fused halo, 1 col), flatten, bf16 ----
    xq = jnp.pad(x_nhwc, ((0, 0), (2, 2), (1, 1), (0, 0)))
    xfe = jnp.pad(xq.reshape(N, (H + 4) * Wp, Cin),
                  ((0, 0), (1, 1), (0, 0))).astype(jnp.bfloat16)     # (N, Lx, Cin)

    # validity mask over the conv-1 padded frame (shared across batch / tiles)
    ii = jnp.arange(H + 2)[:, None]
    jj = jnp.arange(Wp)[None, :]
    mask = ((ii >= 1) & (ii <= H) & (jj >= 1) & (jj <= W)).astype(jnp.float32)
    mask = mask.reshape((H + 2) * Wp, 1)

    # weights: tap-major (dy*3+dx), channels padded to Coutp, bf16 for the MXU
    w1 = jnp.pad(p["w1"].reshape(9, Cin, Cout),
                 ((0, 0), (0, 0), (0, Coutp - Cout))).astype(jnp.bfloat16)
    w2 = jnp.pad(p["w2"].reshape(9, Cout, Cout),
                 ((0, 0), (0, Coutp - Cout), (0, Coutp - Cout))).astype(jnp.bfloat16)

    # fold eval-mode BN + conv bias into per-channel scale/shift (f32)
    s1 = p["g1"] / jnp.sqrt(p["v1"] + BN_EPS)
    t1 = p["be1"] + (p["b1"] - p["m1"]) * s1
    s2 = p["g2"] / jnp.sqrt(p["v2"] + BN_EPS)
    t2 = p["be2"] + (p["b2"] - p["m2"]) * s2
    aff = jnp.pad(jnp.stack([s1, t1, s2, t2], axis=0),
                  ((0, 0), (0, Coutp - Cout))).astype(jnp.float32)

    kern = functools.partial(_conv_block_kernel, W=W, TH=TH)
    out = pl.pallas_call(
        kern,
        out_shape=jax.ShapeDtypeStruct((N, H * Wp, Coutp), x_nhwc.dtype),
        grid_spec=pltpu.PrefetchScalarGridSpec(
            num_scalar_prefetch=0,
            grid=(N, T),
            in_specs=[
                pl.BlockSpec((1, Lx, Cin), lambda n, t: (n, 0, 0)),
                pl.BlockSpec(((H + 2) * Wp, 1), lambda n, t: (0, 0)),
                pl.BlockSpec((9, Cin, Coutp), lambda n, t: (0, 0, 0)),
                pl.BlockSpec((9, Coutp, Coutp), lambda n, t: (0, 0, 0)),
                pl.BlockSpec((4, Coutp), lambda n, t: (0, 0)),
            ],
            out_specs=pl.BlockSpec((1, slab2, Coutp), lambda n, t: (n, t, 0)),
            scratch_shapes=[
                pltpu.VMEM((Lx, Cin), jnp.float32),
                pltpu.VMEM((slab1 + 16, Coutp), jnp.float32),
            ],
        ),
        compiler_params=pltpu.CompilerParams(
            dimension_semantics=("parallel", "parallel"),
            vmem_limit_bytes=_vmem_limit_bytes(Lx, Cin, (H + 2) * Wp,
                                               Coutp, slab1, slab2),
        ),
    )(xfe, mask, w1, w2, aff)

    # lane-dense padded-width slab -> (N, H, W, Cout)
    return out.reshape(N, H, Wp, Coutp)[:, :, 1:1 + W, :Cout]


def conv_block(x_nchw, p, *, tile_h=None):
    """PyTorch-layout (NCHW) entry point.  Callers that already have NHWC data
    should use conv_block_nhwc directly and skip these two transposes."""
    x = jnp.transpose(x_nchw, (0, 2, 3, 1))
    y = conv_block_nhwc(x, p, tile_h=tile_h)
    return jnp.transpose(y, (0, 3, 1, 2))


def conv_block_ref(x_nchw, p):
    """Pure-JAX f32 reference for correctness check."""
    def layer(x, w, b, g, be, m, v):
        y = lax.conv_general_dilated(
            x, w, (1, 1), "SAME", dimension_numbers=("NHWC", "HWIO", "NHWC"))
        y = y + b
        y = (y - m) / jnp.sqrt(v + BN_EPS) * g + be
        return jnp.where(y >= 0, y, NEG_SLOPE * y)

    x = jnp.transpose(x_nchw, (0, 2, 3, 1))
    y = layer(x, p["w1"], p["b1"], p["g1"], p["be1"], p["m1"], p["v1"])
    y = layer(y, p["w2"], p["b2"], p["g2"], p["be2"], p["m2"], p["v2"])
    return jnp.transpose(y, (0, 3, 1, 2))


def init_params(key, cin, cout):
    ks = jax.random.split(key, 12)
    f = jnp.float32
    return {
        # conv weights stored HWIO (3, 3, Cin, Cout)
        "w1": 0.1 * jax.random.normal(ks[0], (3, 3, cin, cout), f),
        "b1": 0.1 * jax.random.normal(ks[1], (cout,), f),
        "g1": 1.0 + 0.1 * jax.random.normal(ks[2], (cout,), f),
        "be1": 0.1 * jax.random.normal(ks[3], (cout,), f),
        "m1": 0.1 * jax.random.normal(ks[4], (cout,), f),
        "v1": jax.random.uniform(ks[5], (cout,), f, 0.5, 1.5),
        "w2": 0.1 * jax.random.normal(ks[6], (3, 3, cout, cout), f),
        "b2": 0.1 * jax.random.normal(ks[7], (cout,), f),
        "g2": 1.0 + 0.1 * jax.random.normal(ks[8], (cout,), f),
        "be2": 0.1 * jax.random.normal(ks[9], (cout,), f),
        "m2": 0.1 * jax.random.normal(ks[10], (cout,), f),
        "v2": jax.random.uniform(ks[11], (cout,), f, 0.5, 1.5),
    }


if __name__ == "__main__":
    key = jax.random.PRNGKey(0)
    kx, kp = jax.random.split(key)

    N, Cin, Cout, H, W = 2, 4, 8, 16, 16          # ConvBlock(4, 8, dropout_p=0.1)
    x = jax.random.normal(kx, (N, Cin, H, W), jnp.float32)
    params = init_params(kp, Cin, Cout)

    # tile_h=8 -> grid (N=2, T=2): exercises the row-tiled / multi-step path.
    out = jax.block_until_ready(conv_block(x, params, tile_h=8))
    ref = jax.block_until_ready(conv_block_ref(x, params))

    assert out.shape == (N, Cout, H, W)
    # bf16-matmul error budget vs. the pure-f32 reference.
    err = float(jnp.max(jnp.abs(out - ref)))
    assert bool(jnp.allclose(out, ref, rtol=5e-2, atol=5e-2)), f"max |err| = {err}"
    print("KERNEL_OK")
</pallas_src>

<mosaic_0001>
module attributes {stable_mosaic.version = 11 : i64} {
  func.func @_conv_block_kernel(%arg0: i32, %arg1: i32, %arg2: memref<1x362x4xbf16, #tpu.memory_space<vmem>>, %arg3: memref<324x1xf32, #tpu.memory_space<vmem>>, %arg4: memref<9x4x128xbf16, #tpu.memory_space<vmem>>, %arg5: memref<9x128x128xbf16, #tpu.memory_space<vmem>>, %arg6: memref<4x128xf32, #tpu.memory_space<vmem>>, %arg7: memref<1x144x128xf32, #tpu.memory_space<vmem>>, %arg8: memref<362x4xf32, #tpu.memory_space<vmem>>, %arg9: memref<196x128xf32, #tpu.memory_space<vmem>>) attributes {dimension_semantics = [#tpu.dimension_semantics<parallel>, #tpu.dimension_semantics<parallel>], iteration_bounds = array<i64: 2, 2>, scalar_prefetch = 0 : i64, scratch_operands = 2 : i64, tpu.core_type = #tpu.core_type<tc>, window_params = [{transform_indices = @transform_0, window_bounds = array<i64: 1, 362, 4>}, {pipeline_mode = #tpu.pipeline_mode<synchronous>, transform_indices = @transform_1, window_bounds = array<i64: 324, 1>}, {pipeline_mode = #tpu.pipeline_mode<synchronous>, transform_indices = @transform_2, window_bounds = array<i64: 9, 4, 128>}, {pipeline_mode = #tpu.pipeline_mode<synchronous>, transform_indices = @transform_3, window_bounds = array<i64: 9, 128, 128>}, {pipeline_mode = #tpu.pipeline_mode<synchronous>, transform_indices = @transform_4, window_bounds = array<i64: 4, 128>}, {transform_indices = @transform_5, window_bounds = array<i64: 1, 144, 128>}]} {
    %c144_i32 = arith.constant 144 : i32
    %0 = arith.muli %arg1, %c144_i32 : i32
    %c0 = arith.constant 0 : index
    %c0_0 = arith.constant 0 : index
    %c0_1 = arith.constant 0 : index
    %1 = vector.load %arg2[%c0, %c0_0, %c0_1] : memref<1x362x4xbf16, #tpu.memory_space<vmem>>, vector<1x362x4xbf16>
    %2 = vector.shape_cast %1 : vector<1x362x4xbf16> to vector<362x4xbf16>
    %3 = arith.extf %2 : vector<362x4xbf16> to vector<362x4xf32>
    %c0_2 = arith.constant 0 : index
    %c0_3 = arith.constant 0 : index
    %4 = vector.load %arg8[%c0_2, %c0_3] : memref<362x4xf32, #tpu.memory_space<vmem>>, vector<362x4xf32>
    tpu.vector_store %arg8[%c0_2, %c0_3], %3 {strides = array<i32>} : memref<362x4xf32, #tpu.memory_space<vmem>>, vector<362x4xf32>,
    %cst = arith.constant 0.000000e+00 : f32
    %5 = vector.broadcast %cst : f32 to vector<180x128xf32>
    %c0_i32 = arith.constant 0 : i32
    %6 = arith.addi %0, %c0_i32 : i32
    %c0_i32_4 = arith.constant 0 : i32
    %7 = arith.addi %6, %c0_i32_4 : i32
    %8 = arith.index_cast %7 : i32 to index
    %c0_5 = arith.constant 0 : index
    %9 = vector.load %arg8[%8, %c0_5] : memref<362x4xf32, #tpu.memory_space<vmem>>, vector<180x4xf32>
    %10 = arith.truncf %9 : vector<180x4xf32> to vector<180x4xbf16>
    %c0_6 = arith.constant 0 : index
    %c0_7 = arith.constant 0 : index
    %c0_8 = arith.constant 0 : index
    %11 = vector.load %arg4[%c0_6, %c0_7, %c0_8] : memref<9x4x128xbf16, #tpu.memory_space<vmem>>, vector<1x4x128xbf16>
    %12 = vector.shape_cast %11 : vector<1x4x128xbf16> to vector<4x128xbf16>
    %cst_9 = arith.constant dense<0.000000e+00> : vector<180x128xf32>
    %13 = tpu.matmul %10, %12, %cst_9 {dimension_numbers = #tpu.dot_dimension_numbers<[1], [0], [0], [1], [0, 0, 1, 1], [], []>} : vector<180x4xbf16>, vector<4x128xbf16>, vector<180x128xf32> -> vector<180x128xf32>
    %14 = arith.addf %5, %13 : vector<180x128xf32>
    %c0_i32_10 = arith.constant 0 : i32
    %15 = arith.addi %0, %c0_i32_10 : i32
    %c1_i32 = arith.constant 1 : i32
    %16 = arith.addi %15, %c1_i32 : i32
    %17 = arith.index_cast %16 : i32 to index
    %c0_11 = arith.constant 0 : index
    %18 = vector.load %arg8[%17, %c0_11] : memref<362x4xf32, #tpu.memory_space<vmem>>, vector<180x4xf32>
    %19 = arith.truncf %18 : vector<180x4xf32> to vector<180x4xbf16>
    %c1 = arith.constant 1 : index
    %c0_12 = arith.constant 0 : index
    %c0_13 = arith.constant 0 : index
    %20 = vector.load %arg4[%c1, %c0_12, %c0_13] : memref<9x4x128xbf16, #tpu.memory_space<vmem>>, vector<1x4x128xbf16>
    %21 = vector.shape_cast %20 : vector<1x4x128xbf16> to vector<4x128xbf16>
    %cst_14 = arith.constant dense<0.000000e+00> : vector<180x128xf32>
    %22 = tpu.matmul %19, %21, %cst_14 {dimension_numbers = #tpu.dot_dimension_numbers<[1], [0], [0], [1], [0, 0, 1, 1], [], []>} : vector<180x4xbf16>, vector<4x128xbf16>, vector<180x128xf32> -> vector<180x128xf32>
    %23 = arith.addf %14, %22 : vector<180x128xf32>
    %c0_i32_15 = arith.constant 0 : i32
    %24 = arith.addi %0, %c0_i32_15 : i32
    %c2_i32 = arith.constant 2 : i32
    %25 = arith.addi %24, %c2_i32 : i32
    %26 = arith.index_cast %25 : i32 to index
    %c0_16 = arith.constant 0 : index
    %27 = vector.load %arg8[%26, %c0_16] : memref<362x4xf32, #tpu.memory_space<vmem>>, vector<180x4xf32>
    %28 = arith.truncf %27 : vector<180x4xf32> to vector<180x4xbf16>
    %c2 = arith.constant 2 : index
    %c0_17 = arith.constant 0 : index
    %c0_18 = arith.constant 0 : index
    %29 = vector.load %arg4[%c2, %c0_17, %c0_18] : memref<9x4x128xbf16, #tpu.memory_space<vmem>>, vector<1x4x128xbf16>
    %30 = vector.shape_cast %29 : vector<1x4x128xbf16> to vector<4x128xbf16>
    %cst_19 = arith.constant dense<0.000000e+00> : vector<180x128xf32>
    %31 = tpu.matmul %28, %30, %cst_19 {dimension_numbers = #tpu.dot_dimension_numbers<[1], [0], [0], [1], [0, 0, 1, 1], [], []>} : vector<180x4xbf16>, vector<4x128xbf16>, vector<180x128xf32> -> vector<180x128xf32>
    %32 = arith.addf %23, %31 : vector<180x128xf32>
    %c18_i32 = arith.constant 18 : i32
    %33 = arith.addi %0, %c18_i32 : i32
    %c0_i32_20 = arith.constant 0 : i32
    %34 = arith.addi %33, %c0_i32_20 : i32
    %35 = arith.index_cast %34 : i32 to index
    %c0_21 = arith.constant 0 : index
    %36 = vector.load %arg8[%35, %c0_21] : memref<362x4xf32, #tpu.memory_space<vmem>>, vector<180x4xf32>
    %37 = arith.truncf %36 : vector<180x4xf32> to vector<180x4xbf16>
    %c3 = arith.constant 3 : index
    %c0_22 = arith.constant 0 : index
    %c0_23 = arith.constant 0 : index
    %38 = vector.load %arg4[%c3, %c0_22, %c0_23] : memref<9x4x128xbf16, #tpu.memory_space<vmem>>, vector<1x4x128xbf16>
    %39 = vector.shape_cast %38 : vector<1x4x128xbf16> to vector<4x128xbf16>
    %cst_24 = arith.constant dense<0.000000e+00> : vector<180x128xf32>
    %40 = tpu.matmul %37, %39, %cst_24 {dimension_numbers = #tpu.dot_dimension_numbers<[1], [0], [0], [1], [0, 0, 1, 1], [], []>} : vector<180x4xbf16>, vector<4x128xbf16>, vector<180x128xf32> -> vector<180x128xf32>
    %41 = arith.addf %32, %40 : vector<180x128xf32>
    %c18_i32_25 = arith.constant 18 : i32
    %42 = arith.addi %0, %c18_i32_25 : i32
    %c1_i32_26 = arith.constant 1 : i32
    %43 = arith.addi %42, %c1_i32_26 : i32
    %44 = arith.index_cast %43 : i32 to index
    %c0_27 = arith.constant 0 : index
    %45 = vector.load %arg8[%44, %c0_27] : memref<362x4xf32, #tpu.memory_space<vmem>>, vector<180x4xf32>
    %46 = arith.truncf %45 : vector<180x4xf32> to vector<180x4xbf16>
    %c4 = arith.constant 4 : index
    %c0_28 = arith.constant 0 : index
    %c0_29 = arith.constant 0 : index
    %47 = vector.load %arg4[%c4, %c0_28, %c0_29] : memref<9x4x128xbf16, #tpu.memory_space<vmem>>, vector<1x4x128xbf16>
    %48 = vector.shape_cast %47 : vector<1x4x128xbf16> to vector<4x128xbf16>
    %cst_30 = arith.constant dense<0.000000e+00> : vector<180x128xf32>
    %49 = tpu.matmul %46, %48, %cst_30 {dimension_numbers = #tpu.dot_dimension_numbers<[1], [0], [0], [1], [0, 0, 1, 1], [], []>} : vector<180x4xbf16>, vector<4x128xbf16>, vector<180x128xf32> -> vector<180x128xf32>
    %50 = arith.addf %41, %49 : vector<180x128xf32>
    %c18_i32_31 = arith.constant 18 : i32
    %51 = arith.addi %0, %c18_i32_31 : i32
    %c2_i32_32 = arith.constant 2 : i32
    %52 = arith.addi %51, %c2_i32_32 : i32
    %53 = arith.index_cast %52 : i32 to index
    %c0_33 = arith.constant 0 : index
    %54 = vector.load %arg8[%53, %c0_33] : memref<362x4xf32, #tpu.memory_space<vmem>>, vector<180x4xf32>
    %55 = arith.truncf %54 : vector<180x4xf32> to vector<180x4xbf16>
    %c5 = arith.constant 5 : index
    %c0_34 = arith.constant 0 : index
    %c0_35 = arith.constant 0 : index
    %56 = vector.load %arg4[%c5, %c0_34, %c0_35] : memref<9x4x128xbf16, #tpu.memory_space<vmem>>, vector<1x4x128xbf16>
    %57 = vector.shape_cast %56 : vector<1x4x128xbf16> to vector<4x128xbf16>
    %cst_36 = arith.constant dense<0.000000e+00> : vector<180x128xf32>
    %58 = tpu.matmul %55, %57, %cst_36 {dimension_numbers = #tpu.dot_dimension_numbers<[1], [0], [0], [1], [0, 0, 1, 1], [], []>} : vector<180x4xbf16>, vector<4x128xbf16>, vector<180x128xf32> -> vector<180x128xf32>
    %59 = arith.addf %50, %58 : vector<180x128xf32>
    %c36_i32 = arith.constant 36 : i32
    %60 = arith.addi %0, %c36_i32 : i32
    %c0_i32_37 = arith.constant 0 : i32
    %61 = arith.addi %60, %c0_i32_37 : i32
    %62 = arith.index_cast %61 : i32 to index
    %c0_38 = arith.constant 0 : index
    %63 = vector.load %arg8[%62, %c0_38] : memref<362x4xf32, #tpu.memory_space<vmem>>, vector<180x4xf32>
    %64 = arith.truncf %63 : vector<180x4xf32> to vector<180x4xbf16>
    %c6 = arith.constant 6 : index
    %c0_39 = arith.constant 0 : index
    %c0_40 = arith.constant 0 : index
    %65 = vector.load %arg4[%c6, %c0_39, %c0_40] : memref<9x4x128xbf16, #tpu.memory_space<vmem>>, vector<1x4x128xbf16>
    %66 = vector.shape_cast %65 : vector<1x4x128xbf16> to vector<4x128xbf16>
    %cst_41 = arith.constant dense<0.000000e+00> : vector<180x128xf32>
    %67 = tpu.matmul %64, %66, %cst_41 {dimension_numbers = #tpu.dot_dimension_numbers<[1], [0], [0], [1], [0, 0, 1, 1], [], []>} : vector<180x4xbf16>, vector<4x128xbf16>, vector<180x128xf32> -> vector<180x128xf32>
    %68 = arith.addf %59, %67 : vector<180x128xf32>
    %c36_i32_42 = arith.constant 36 : i32
    %69 = arith.addi %0, %c36_i32_42 : i32
    %c1_i32_43 = arith.constant 1 : i32
    %70 = arith.addi %69, %c1_i32_43 : i32
    %71 = arith.index_cast %70 : i32 to index
    %c0_44 = arith.constant 0 : index
    %72 = vector.load %arg8[%71, %c0_44] : memref<362x4xf32, #tpu.memory_space<vmem>>, vector<180x4xf32>
    %73 = arith.truncf %72 : vector<180x4xf32> to vector<180x4xbf16>
    %c7 = arith.constant 7 : index
    %c0_45 = arith.constant 0 : index
    %c0_46 = arith.constant 0 : index
    %74 = vector.load %arg4[%c7, %c0_45, %c0_46] : memref<9x4x128xbf16, #tpu.memory_space<vmem>>, vector<1x4x128xbf16>
    %75 = vector.shape_cast %74 : vector<1x4x128xbf16> to vector<4x128xbf16>
    %cst_47 = arith.constant dense<0.000000e+00> : vector<180x128xf32>
    %76 = tpu.matmul %73, %75, %cst_47 {dimension_numbers = #tpu.dot_dimension_numbers<[1], [0], [0], [1], [0, 0, 1, 1], [], []>} : vector<180x4xbf16>, vector<4x128xbf16>, vector<180x128xf32> -> vector<180x128xf32>
    %77 = arith.addf %68, %76 : vector<180x128xf32>
    %c36_i32_48 = arith.constant 36 : i32
    %78 = arith.addi %0, %c36_i32_48 : i32
    %c2_i32_49 = arith.constant 2 : i32
    %79 = arith.addi %78, %c2_i32_49 : i32
    %80 = arith.index_cast %79 : i32 to index
    %c0_50 = arith.constant 0 : index
    %81 = vector.load %arg8[%80, %c0_50] : memref<362x4xf32, #tpu.memory_space<vmem>>, vector<180x4xf32>
    %82 = arith.truncf %81 : vector<180x4xf32> to vector<180x4xbf16>
    %c8 = arith.constant 8 : index
    %c0_51 = arith.constant 0 : index
    %c0_52 = arith.constant 0 : index
    %83 = vector.load %arg4[%c8, %c0_51, %c0_52] : memref<9x4x128xbf16, #tpu.memory_space<vmem>>, vector<1x4x128xbf16>
    %84 = vector.shape_cast %83 : vector<1x4x128xbf16> to vector<4x128xbf16>
    %cst_53 = arith.constant dense<0.000000e+00> : vector<180x128xf32>
    %85 = tpu.matmul %82, %84, %cst_53 {dimension_numbers = #tpu.dot_dimension_numbers<[1], [0], [0], [1], [0, 0, 1, 1], [], []>} : vector<180x4xbf16>, vector<4x128xbf16>, vector<180x128xf32> -> vector<180x128xf32>
    %86 = arith.addf %77, %85 : vector<180x128xf32>
    %c0_54 = arith.constant 0 : index
    %c0_55 = arith.constant 0 : index
    %87 = vector.load %arg6[%c0_54, %c0_55] : memref<4x128xf32, #tpu.memory_space<vmem>>, vector<1x128xf32>
    %88 = vector.broadcast %87 : vector<1x128xf32> to vector<180x128xf32>
    %89 = arith.mulf %86, %88 : vector<180x128xf32>
    %c1_56 = arith.constant 1 : index
    %c0_57 = arith.constant 0 : index
    %90 = vector.load %arg6[%c1_56, %c0_57] : memref<4x128xf32, #tpu.memory_space<vmem>>, vector<1x128xf32>
    %91 = vector.broadcast %90 : vector<1x128xf32> to vector<180x128xf32>
    %92 = arith.addf %89, %91 : vector<180x128xf32>
    %cst_58 = arith.constant 0.00999999977 : f32
    %93 = vector.broadcast %cst_58 : f32 to vector<180x128xf32>
    %94 = arith.mulf %93, %92 : vector<180x128xf32>
    %95 = arith.maximumf %92, %94 : vector<180x128xf32>
    %96 = arith.index_cast %0 : i32 to index
    %c0_59 = arith.constant 0 : index
    %97 = vector.load %arg3[%96, %c0_59] : memref<324x1xf32, #tpu.memory_space<vmem>>, vector<180x1xf32>
    %98 = vector.broadcast %97 : vector<180x1xf32> to vector<180x128xf32>
    %99 = arith.mulf %95, %98 : vector<180x128xf32>
    %cst_60 = arith.constant 0.000000e+00 : f32
    %100 = vector.broadcast %cst_60 : f32 to vector<8x128xf32>
    %c0_61 = arith.constant 0 : index
    %c0_62 = arith.constant 0 : index
    %101 = vector.load %arg9[%c0_61, %c0_62] : memref<196x128xf32, #tpu.memory_space<vmem>>, vector<8x128xf32>
    tpu.vector_store %arg9[%c0_61, %c0_62], %100 {strides = array<i32>} : memref<196x128xf32, #tpu.memory_space<vmem>>, vector<8x128xf32>,
    %cst_63 = arith.constant 0.000000e+00 : f32
    %102 = vector.broadcast %cst_63 : f32 to vector<8x128xf32>
    %c188 = arith.constant 188 : index
    %c0_64 = arith.constant 0 : index
    %103 = vector.load %arg9[%c188, %c0_64] : memref<196x128xf32, #tpu.memory_space<vmem>>, vector<8x128xf32>
    tpu.vector_store %arg9[%c188, %c0_64], %102 {strides = array<i32>} : memref<196x128xf32, #tpu.memory_space<vmem>>, vector<8x128xf32>,
    %c8_65 = arith.constant 8 : index
    %c0_66 = arith.constant 0 : index
    %104 = vector.load %arg9[%c8_65, %c0_66] : memref<196x128xf32, #tpu.memory_space<vmem>>, vector<180x128xf32>
    tpu.vector_store %arg9[%c8_65, %c0_66], %99 {strides = array<i32>} : memref<196x128xf32, #tpu.memory_space<vmem>>, vector<180x128xf32>,
    %cst_67 = arith.constant 0.000000e+00 : f32
    %105 = vector.broadcast %cst_67 : f32 to vector<144x128xf32>
    %c7_68 = arith.constant 7 : index
    %c0_69 = arith.constant 0 : index
    %106 = vector.load %arg9[%c7_68, %c0_69] : memref<196x128xf32, #tpu.memory_space<vmem>>, vector<144x128xf32>
    %107 = arith.truncf %106 : vector<144x128xf32> to vector<144x128xbf16>
    %c0_70 = arith.constant 0 : index
    %c0_71 = arith.constant 0 : index
    %c0_72 = arith.constant 0 : index
    %108 = vector.load %arg5[%c0_70, %c0_71, %c0_72] : memref<9x128x128xbf16, #tpu.memory_space<vmem>>, vector<1x128x128xbf16>
    %109 = vector.shape_cast %108 : vector<1x128x128xbf16> to vector<128x128xbf16>
    %cst_73 = arith.constant dense<0.000000e+00> : vector<144x128xf32>
    %110 = tpu.matmul %107, %109, %cst_73 {dimension_numbers = #tpu.dot_dimension_numbers<[1], [0], [0], [1], [0, 0, 1, 1], [], []>} : vector<144x128xbf16>, vector<128x128xbf16>, vector<144x128xf32> -> vector<144x128xf32>
    %111 = arith.addf %105, %110 : vector<144x128xf32>
    %c8_74 = arith.constant 8 : index
    %c0_75 = arith.constant 0 : index
    %112 = vector.load %arg9[%c8_74, %c0_75] : memref<196x128xf32, #tpu.memory_space<vmem>>, vector<144x128xf32>
    %113 = arith.truncf %112 : vector<144x128xf32> to vector<144x128xbf16>
    %c1_76 = arith.constant 1 : index
    %c0_77 = arith.constant 0 : index
    %c0_78 = arith.constant 0 : index
    %114 = vector.load %arg5[%c1_76, %c0_77, %c0_78] : memref<9x128x128xbf16, #tpu.memory_space<vmem>>, vector<1x128x128xbf16>
    %115 = vector.shape_cast %114 : vector<1x128x128xbf16> to vector<128x128xbf16>
    %cst_79 = arith.constant dense<0.000000e+00> : vector<144x128xf32>
    %116 = tpu.matmul %113, %115, %cst_79 {dimension_numbers = #tpu.dot_dimension_numbers<[1], [0], [0], [1], [0, 0, 1, 1], [], []>} : vector<144x128xbf16>, vector<128x128xbf16>, vector<144x128xf32> -> vector<144x128xf32>
    %117 = arith.addf %111, %116 : vector<144x128xf32>
    %c9 = arith.constant 9 : index
    %c0_80 = arith.constant 0 : index
    %118 = vector.load %arg9[%c9, %c0_80] : memref<196x128xf32, #tpu.memory_space<vmem>>, vector<144x128xf32>
    %119 = arith.truncf %118 : vector<144x128xf32> to vector<144x128xbf16>
    %c2_81 = arith.constant 2 : index
    %c0_82 = arith.constant 0 : index
    %c0_83 = arith.constant 0 : index
    %120 = vector.load %arg5[%c2_81, %c0_82, %c0_83] : memref<9x128x128xbf16, #tpu.memory_space<vmem>>, vector<1x128x128xbf16>
    %121 = vector.shape_cast %120 : vector<1x128x128xbf16> to vector<128x128xbf16>
    %cst_84 = arith.constant dense<0.000000e+00> : vector<144x128xf32>
    %122 = tpu.matmul %119, %121, %cst_84 {dimension_numbers = #tpu.dot_dimension_numbers<[1], [0], [0], [1], [0, 0, 1, 1], [], []>} : vector<144x128xbf16>, vector<128x128xbf16>, vector<144x128xf32> -> vector<144x128xf32>
    %123 = arith.addf %117, %122 : vector<144x128xf32>
    %c25 = arith.constant 25 : index
    %c0_85 = arith.constant 0 : index
    %124 = vector.load %arg9[%c25, %c0_85] : memref<196x128xf32, #tpu.memory_space<vmem>>, vector<144x128xf32>
    %125 = arith.truncf %124 : vector<144x128xf32> to vector<144x128xbf16>
    %c3_86 = arith.constant 3 : index
    %c0_87 = arith.constant 0 : index
    %c0_88 = arith.constant 0 : index
    %126 = vector.load %arg5[%c3_86, %c0_87, %c0_88] : memref<9x128x128xbf16, #tpu.memory_space<vmem>>, vector<1x128x128xbf16>
    %127 = vector.shape_cast %126 : vector<1x128x128xbf16> to vector<128x128xbf16>
    %cst_89 = arith.constant dense<0.000000e+00> : vector<144x128xf32>
    %128 = tpu.matmul %125, %127, %cst_89 {dimension_numbers = #tpu.dot_dimension_numbers<[1], [0], [0], [1], [0, 0, 1, 1], [], []>} : vector<144x128xbf16>, vector<128x128xbf16>, vector<144x128xf32> -> vector<144x128xf32>
    %129 = arith.addf %123, %128 : vector<144x128xf32>
    %c26 = arith.constant 26 : index
    %c0_90 = arith.constant 0 : index
    %130 = vector.load %arg9[%c26, %c0_90] : memref<196x128xf32, #tpu.memory_space<vmem>>, vector<144x128xf32>
    %131 = arith.truncf %130 : vector<144x128xf32> to vector<144x128xbf16>
    %c4_91 = arith.constant 4 : index
    %c0_92 = arith.constant 0 : index
    %c0_93 = arith.constant 0 : index
    %132 = vector.load %arg5[%c4_91, %c0_92, %c0_93] : memref<9x128x128xbf16, #tpu.memory_space<vmem>>, vector<1x128x128xbf16>
    %133 = vector.shape_cast %132 : vector<1x128x128xbf16> to vector<128x128xbf16>
    %cst_94 = arith.constant dense<0.000000e+00> : vector<144x128xf32>
    %134 = tpu.matmul %131, %133, %cst_94 {dimension_numbers = #tpu.dot_dimension_numbers<[1], [0], [0], [1], [0, 0, 1, 1], [], []>} : vector<144x128xbf16>, vector<128x128xbf16>, vector<144x128xf32> -> vector<144x128xf32>
    %135 = arith.addf %129, %134 : vector<144x128xf32>
    %c27 = arith.constant 27 : index
    %c0_95 = arith.constant 0 : index
    %136 = vector.load %arg9[%c27, %c0_95] : memref<196x128xf32, #tpu.memory_space<vmem>>, vector<144x128xf32>
    %137 = arith.truncf %136 : vector<144x128xf32> to vector<144x128xbf16>
    %c5_96 = arith.constant 5 : index
    %c0_97 = arith.constant 0 : index
    %c0_98 = arith.constant 0 : index
    %138 = vector.load %arg5[%c5_96, %c0_97, %c0_98] : memref<9x128x128xbf16, #tpu.memory_space<vmem>>, vector<1x128x128xbf16>
    %139 = vector.shape_cast %138 : vector<1x128x128xbf16> to vector<128x128xbf16>
    %cst_99 = arith.constant dense<0.000000e+00> : vector<144x128xf32>
    %140 = tpu.matmul %137, %139, %cst_99 {dimension_numbers = #tpu.dot_dimension_numbers<[1], [0], [0], [1], [0, 0, 1, 1], [], []>} : vector<144x128xbf16>, vector<128x128xbf16>, vector<144x128xf32> -> vector<144x128xf32>
    %141 = arith.addf %135, %140 : vector<144x128xf32>
    %c43 = arith.constant 43 : index
    %c0_100 = arith.constant 0 : index
    %142 = vector.load %arg9[%c43, %c0_100] : memref<196x128xf32, #tpu.memory_space<vmem>>, vector<144x128xf32>
    %143 = arith.truncf %142 : vector<144x128xf32> to vector<144x128xbf16>
    %c6_101 = arith.constant 6 : index
    %c0_102 = arith.constant 0 : index
    %c0_103 = arith.constant 0 : index
    %144 = vector.load %arg5[%c6_101, %c0_102, %c0_103] : memref<9x128x128xbf16, #tpu.memory_space<vmem>>, vector<1x128x128xbf16>
    %145 = vector.shape_cast %144 : vector<1x128x128xbf16> to vector<128x128xbf16>
    %cst_104 = arith.constant dense<0.000000e+00> : vector<144x128xf32>
    %146 = tpu.matmul %143, %145, %cst_104 {dimension_numbers = #tpu.dot_dimension_numbers<[1], [0], [0], [1], [0, 0, 1, 1], [], []>} : vector<144x128xbf16>, vector<128x128xbf16>, vector<144x128xf32> -> vector<144x128xf32>
    %147 = arith.addf %141, %146 : vector<144x128xf32>
    %c44 = arith.constant 44 : index
    %c0_105 = arith.constant 0 : index
    %148 = vector.load %arg9[%c44, %c0_105] : memref<196x128xf32, #tpu.memory_space<vmem>>, vector<144x128xf32>
    %149 = arith.truncf %148 : vector<144x128xf32> to vector<144x128xbf16>
    %c7_106 = arith.constant 7 : index
    %c0_107 = arith.constant 0 : index
    %c0_108 = arith.constant 0 : index
    %150 = vector.load %arg5[%c7_106, %c0_107, %c0_108] : memref<9x128x128xbf16, #tpu.memory_space<vmem>>, vector<1x128x128xbf16>
    %151 = vector.shape_cast %150 : vector<1x128x128xbf16> to vector<128x128xbf16>
    %cst_109 = arith.constant dense<0.000000e+00> : vector<144x128xf32>
    %152 = tpu.matmul %149, %151, %cst_109 {dimension_numbers = #tpu.dot_dimension_numbers<[1], [0], [0], [1], [0, 0, 1, 1], [], []>} : vector<144x128xbf16>, vector<128x128xbf16>, vector<144x128xf32> -> vector<144x128xf32>
    %153 = arith.addf %147, %152 : vector<144x128xf32>
    %c45 = arith.constant 45 : index
    %c0_110 = arith.constant 0 : index
    %154 = vector.load %arg9[%c45, %c0_110] : memref<196x128xf32, #tpu.memory_space<vmem>>, vector<144x128xf32>
    %155 = arith.truncf %154 : vector<144x128xf32> to vector<144x128xbf16>
    %c8_111 = arith.constant 8 : index
    %c0_112 = arith.constant 0 : index
    %c0_113 = arith.constant 0 : index
    %156 = vector.load %arg5[%c8_111, %c0_112, %c0_113] : memref<9x128x128xbf16, #tpu.memory_space<vmem>>, vector<1x128x128xbf16>
    %157 = vector.shape_cast %156 : vector<1x128x128xbf16> to vector<128x128xbf16>
    %cst_114 = arith.constant dense<0.000000e+00> : vector<144x128xf32>
    %158 = tpu.matmul %155, %157, %cst_114 {dimension_numbers = #tpu.dot_dimension_numbers<[1], [0], [0], [1], [0, 0, 1, 1], [], []>} : vector<144x128xbf16>, vector<128x128xbf16>, vector<144x128xf32> -> vector<144x128xf32>
    %159 = arith.addf %153, %158 : vector<144x128xf32>
    %c2_115 = arith.constant 2 : index
    %c0_116 = arith.constant 0 : index
    %160 = vector.load %arg6[%c2_115, %c0_116] : memref<4x128xf32, #tpu.memory_space<vmem>>, vector<1x128xf32>
    %161 = vector.broadcast %160 : vector<1x128xf32> to vector<144x128xf32>
    %162 = arith.mulf %159, %161 : vector<144x128xf32>
    %c3_117 = arith.constant 3 : index
    %c0_118 = arith.constant 0 : index
    %163 = vector.load %arg6[%c3_117, %c0_118] : memref<4x128xf32, #tpu.memory_space<vmem>>, vector<1x128xf32>
    %164 = vector.broadcast %163 : vector<1x128xf32> to vector<144x128xf32>
    %165 = arith.addf %162, %164 : vector<144x128xf32>
    %cst_119 = arith.constant 0.00999999977 : f32
    %166 = vector.broadcast %cst_119 : f32 to vector<144x128xf32>
    %167 = arith.mulf %166, %165 : vector<144x128xf32>
    %168 = arith.maximumf %165, %167 : vector<144x128xf32>
    %c0_120 = arith.constant 0 : index
    %c0_121 = arith.constant 0 : index
    %c0_122 = arith.constant 0 : index
    %169 = vector.load %arg7[%c0_120, %c0_121, %c0_122] : memref<1x144x128xf32, #tpu.memory_space<vmem>>, vector<1x144x128xf32>
    %170 = vector.shape_cast %169 : vector<1x144x128xf32> to vector<144x128xf32>
    %171 = vector.shape_cast %168 : vector<144x128xf32> to vector<1x144x128xf32>
    tpu.vector_store %arg7[%c0_120, %c0_121, %c0_122], %171 {strides = array<i32>} : memref<1x144x128xf32, #tpu.memory_space<vmem>>, vector<1x144x128xf32>,
    return
  }
  func.func @transform_0(%arg0: i32, %arg1: i32) -> (i32, i32, i32) {
    %c0_i32 = arith.constant 0 : i32
    %c0_i32_0 = arith.constant 0 : i32
    %c0_i32_1 = arith.constant 0 : i32
    return %arg0, %c0_i32, %c0_i32_0 : i32, i32, i32
  }
  func.func @transform_1(%arg0: i32, %arg1: i32) -> (i32, i32) {
    %c0_i32 = arith.constant 0 : i32
    %c0_i32_0 = arith.constant 0 : i32
    %c0_i32_1 = arith.constant 0 : i32
    return %c0_i32, %c0_i32_0 : i32, i32
  }
  func.func @transform_2(%arg0: i32, %arg1: i32) -> (i32, i32, i32) {
    %c0_i32 = arith.constant 0 : i32
    %c0_i32_0 = arith.constant 0 : i32
    %c0_i32_1 = arith.constant 0 : i32
    %c0_i32_2 = arith.constant 0 : i32
    return %c0_i32, %c0_i32_0, %c0_i32_1 : i32, i32, i32
  }
  func.func @transform_3(%arg0: i32, %arg1: i32) -> (i32, i32, i32) {
    %c0_i32 = arith.constant 0 : i32
    %c0_i32_0 = arith.constant 0 : i32
    %c0_i32_1 = arith.constant 0 : i32
    %c0_i32_2 = arith.constant 0 : i32
    return %c0_i32, %c0_i32_0, %c0_i32_1 : i32, i32, i32
  }
  func.func @transform_4(%arg0: i32, %arg1: i32) -> (i32, i32) {
    %c0_i32 = arith.constant 0 : i32
    %c0_i32_0 = arith.constant 0 : i32
    %c0_i32_1 = arith.constant 0 : i32
    return %c0_i32, %c0_i32_0 : i32, i32
  }
  func.func @transform_5(%arg0: i32, %arg1: i32) -> (i32, i32, i32) {
    %c0_i32 = arith.constant 0 : i32
    %c0_i32_0 = arith.constant 0 : i32
    return %arg0, %arg1, %c0_i32 : i32, i32, i32
  }
}

</mosaic_0001>

<bundles_post_ra>
// kernel: tpu_custom_call.1
= control target key start
LH: loop header
LB: loop body
LE: loop exit
PB: predicated region body
PF: predicated region fallthrough
CT: control target
= control target key end

     0   :  { %10 = vsyncpa [#allocation5], 0  ;;  %s8555_s0 = inlined_call_operand.vmem [shape: bf16[2,362,4], index: 0, kind: input, shape index: {}]   ;;  %s8556_s1 = inlined_call_operand.vmem [shape: f32[324,1], index: 1, kind: input, shape index: {}]   ;;  %s8557_s2 = inlined_call_operand.vmem [shape: bf16[9,4,128], index: 2, kind: input, shape index: {}]   ;;  %s8558_s3 = inlined_call_operand.vmem [shape: bf16[9,128,128], index: 3, kind: input, shape index: {}]   ;;  %s8559_s4 = inlined_call_operand.vmem [shape: f32[4,128], index: 4, kind: input, shape index: {}]   ;;  %s8560_s5 = inlined_call_operand.hbm [shape: f32[2,288,128], index: 5, kind: output, shape index: {}]  }
   0x1   :  { %12 = vsyncpa [#allocation5 + $0x1], 0  ;;  %s7162_s18 = smov 0   ;;  %s7164_s19 = smov 0  }
   0x2   :  { %s7166_s20 = smov 0   ;;  %s7168_s21 = smov 0  }
   0x3   :  { %s7170_s22 = smov 0   ;;  %s7172_s23 = smov 0  }
   0x4   :  { %s7174_s24 = smov 0   ;;  %s7176_s25 = smov 0  }
   0x5 LB: > { %s4801_s26 = sadd.s32 4294967295, %s7124_s25   ;;  %s4802_s27 = sadd.s32 4294967294, %s7124_s25   ;;  %s7124_s25 = sphi %s7176_s25, %s18_s25   ;;  %s7120_s24 = sphi %s7174_s24, %s8569_s24   ;;  %s7116_s23 = sphi %s7172_s23, %s8568_s23   ;;  %s7112_s22 = sphi %s7170_s22, %s8567_s22   ;;  %s7108_s21 = sphi %s7168_s21, %s8566_s21   ;;  %s7104_s20 = sphi %s7166_s20, %s8565_s20   ;;  %s7100_s19 = sphi %s7164_s19, %s8564_s19   ;;  %s7096_s18 = sphi %s7162_s18, %s8563_s18  }
   0x6   : > { %s27_s28 = sadd.s32 1, %s7116_s23  ;;  %s30_s29 = sadd.s32 1, %s7120_s24 }
   0x7   : > { %p28_p0 = scmp.ge.s32.totalorder %s27_s28, 2  ;;  %p159_p1 = scmp.ne.s32.totalorder %s7104_s20, %s7100_s19 }
   0x8   : > { %p160_p2 = scmp.eq.s32.totalorder %s4801_s26, 3  ;;  %p165_p5 = scmp.ne.s32.totalorder %s7100_s19, %s7096_s18 }
   0x9   : > { %s8571_s28 = smov (%p28_p0, %s27_s28), 0  ;;  %s8573_s29 = smov (!%p28_p0, %s30_s29), %s7120_s24 }
   0xa   : > { %s145_s30 = ssub.s32 %s7116_s23, %s8571_s28  ;;  %p7213_p3 = por %p160_p2, %p159_p1 }
   0xb   : > { %p32_p4 = scmp.ge.s32.totalorder %s8573_s29, 2  ;;  %p166_p6 = scmp.eq.s32.totalorder %s4802_s27, 3 }
   0xc   : > { %p4805_p7 = scmp.ge.s32.totalorder %s7124_s25, 1  ;;  %p204_p9 = scmp.lt.s32.totalorder %s7124_s25, 5 }
   0xd   : > { %s8575_s29 = smov (%p32_p4, %s8573_s29), 0  ;;  %p7222_p8 = por %p166_p6, %p165_p5 }
   0xe   : > { %s144_s8 = ssub.s32 %s7120_s24, %s8575_s29  ;;  %s149_s9 = sadd.s32 1, %s7104_s20 }
   0xf   : > { %s146_s10 = sor.u32 %s145_s30, %s144_s8  ;;  %p205_p10 = pnand %p4805_p7, %p204_p9 }
  0x10   : > { %p147_p11 = scmp.eq.s32.totalorder %s146_s10, 0  ;;  %v4830_v0 = vld [vmem:[%s8557_s2 + $0x2] sm:$0x3] (!%p205_p10)  ;;  %vm492_vm0 = vcmask (!%p205_p10), 1041408   ;;  %p232_p12 = scmp.lt.s32.totalorder (!%p205_p10), %s7112_s22, 1  ;;  %vm332_vm1 = vcmask (!%p205_p10), 31744  }
  0x11   : > { %208 = sbr.rel (%p205_p10) target bundleno = 1444 (0x5a4), region = 40  ;;  %6861 = vmatprep.subr.msk.bf16.mxu0 (!%p205_p10), %vm492_vm0, %v4830_v0  ;;  %v494_v1 = vsel (!%p205_p10), %vm492_vm0, %v4830_v0, 0  ;;  %v7242_v2 = vld [vmem:[%s8557_s2] sm:$0x3] (!%p205_p10)  ;;  %vm378_vm2 = vcmask (!%p205_p10), 25600   ;;  %vm7128_vm3 = vmmov (!%p205_p10), 0  }
  0x12   : > { %s7231_s11 = scalar_select %p147_p11, %s7104_s20, %s149_s9  }
  0x13   : > { %5694 = vmatpush3.bf16.msra.mxu0 (!%p205_p10), %v494_v1  ;;  %s239_s8 = smul.u32 (!%p205_p10), 144, %s7108_s21  ;;  %s229_s13 = sand.u32 (!%p205_p10), 1, %s7100_s19  }
  0x14   : > { %6862 = vmatprep.subr.msk.bf16.mxu0 (!%p205_p10), %vm492_vm0, %v7242_v2  ;;  %s6872_s26 = smul.u32 (!%p205_p10), 36, %s7112_s22  ;;  %s8503_s12 = scalar_lea.sflag (!%p205_p10), [#allocation5], %s229_s13 }
  0x15   : > { %s7325_s9 = scalar_lea.vmem (!%p205_p10), [#allocation2], %s239_s8  ;;  %s7129_s15 = smov (!%p205_p10), [#allocation4]  }
  0x18   : > { %s233_s16 = scalar_select %p232_p12, %s7112_s22, 1 }
  0x1a   : > { %s6871_s17 = smul.u32 184, %s233_s16 }
  0x1b   : > { %s6870_s16 = smul.u32 144, %s229_s13 }
  0x1c   : > { %s7250_s30 = scalar_lea.vmem %s8555_s0, %s6871_s17  ;;  %s7565_s17 = scalar_lea.vmem %s8556_s1, %s239_s8 }
  0x1d   : > { %v5315_v3 = vld [vmem:[%s7250_s30] sm:$0xff]   ;;  %v5402_v4 = vld [vmem:[%s7250_s30 + $0x8] sm:$0xff]   ;;  %v5403_v5 = vld [vmem:[%s7250_s30 + $0x10] sm:$0xff]   ;;  %s4689_s8 = smul.u32 18, %s7108_s21 }
  0x1e   : > { %v5316_v6 = vunpack.c.l.bf16 %v5315_v3  ;;  %v5317_v7 = vunpack.c.h.bf16 %v5315_v3  ;;  %v5320_v8 = vunpack.c.l.bf16 %v5402_v4  ;;  %v5321_v9 = vunpack.c.h.bf16 %v5402_v4  ;;  %v5404_v10 = vld [vmem:[%s7250_s30 + $0x18] sm:$0xff]   ;;  %v5405_v11 = vld [vmem:[%s7250_s30 + $0x20] sm:$0xff]   ;;  %v5406_v12 = vld [vmem:[%s7250_s30 + $0x28] sm:$0xff]  }
  0x1f   : > { %v5324_v13 = vunpack.c.l.bf16 %v5403_v5  ;;  %v5325_v14 = vunpack.c.h.bf16 %v5403_v5  ;;  %v5328_v15 = vunpack.c.l.bf16 %v5404_v10  ;;  %v5329_v16 = vunpack.c.h.bf16 %v5404_v10  ;;  %v5407_v17 = vld [vmem:[%s7250_s30 + $0x30] sm:$0xff]   ;;  %v5408_v18 = vld [vmem:[%s7250_s30 + $0x38] sm:$0xff]   ;;  %v5409_v19 = vld [vmem:[%s7250_s30 + $0x40] sm:$0xff]   ;;  %s4694_s21 = sadd.s32 %s6872_s26, %s4689_s8 }
  0x20   : > { %v5332_v20 = vunpack.c.l.bf16 %v5405_v11  ;;  %v5333_v21 = vunpack.c.h.bf16 %v5405_v11  ;;  %v5336_v22 = vunpack.c.l.bf16 %v5406_v12  ;;  %v5337_v23 = vunpack.c.h.bf16 %v5406_v12  ;;  %v5410_v24 = vld [vmem:[%s7250_s30 + $0x48] sm:$0xff]   ;;  %v5411_v25 = vld [vmem:[%s7250_s30 + $0x50] sm:$0xff]   ;;  %v5412_v26 = vld [vmem:[%s7250_s30 + $0x58] sm:$0xff]   ;;  %333 = vst.msk [vmem:[#allocation2] sm:$0xff] %vm332_vm1, %v5316_v6  ;;  %s5311_s27 = sshll.u32 %s4694_s21, 7 }
  0x21   : > { %334 = vst.msk [vmem:[#allocation2 + $0x8] sm:$0xff] %vm332_vm1, %v5317_v7  ;;  %335 = vst.msk [vmem:[#allocation2 + $0x10] sm:$0xff] %vm332_vm1, %v5320_v8  ;;  %v5340_v27 = vunpack.c.l.bf16 %v5407_v17  ;;  %v5341_v28 = vunpack.c.h.bf16 %v5407_v17  ;;  %v5344_v29 = vunpack.c.l.bf16 %v5408_v18  ;;  %v5345_v30 = vunpack.c.h.bf16 %v5408_v18  ;;  %v5413_v31 = vld [vmem:[%s7250_s30 + $0x60] sm:$0xff]   ;;  %v5414_v32 = vld [vmem:[%s7250_s30 + $0x68] sm:$0xff]   ;;  %s8498_s10 = scalar_lea.hbm %s8560_s5, %s5311_s27 }
  0x22   : > { %336 = vst.msk [vmem:[#allocation2 + $0x18] sm:$0xff] %vm332_vm1, %v5321_v9  ;;  %v5415_v33 = vld [vmem:[%s7250_s30 + $0x70] sm:$0xff]   ;;  %337 = vst.msk [vmem:[#allocation2 + $0x20] sm:$0xff] %vm332_vm1, %v5324_v13  ;;  %v5348_v34 = vunpack.c.l.bf16 %v5409_v19  ;;  %v5349_v35 = vunpack.c.h.bf16 %v5409_v19  ;;  %v5352_v36 = vunpack.c.l.bf16 %v5410_v24  ;;  %v5353_v37 = vunpack.c.h.bf16 %v5410_v24  ;;  %v5416_v38 = vld [vmem:[%s7250_s30 + $0x78] sm:$0xff]  }
  0x23   : > { %338 = vst.msk [vmem:[#allocation2 + $0x28] sm:$0xff] %vm332_vm1, %v5325_v14  ;;  %339 = vst.msk [vmem:[#allocation2 + $0x30] sm:$0xff] %vm332_vm1, %v5328_v15  ;;  %v5417_v39 = vld [vmem:[%s7250_s30 + $0x80] sm:$0xff]   ;;  %v5418_v40 = vld [vmem:[%s7250_s30 + $0x88] sm:$0xff]   ;;  %v5356_v41 = vunpack.c.l.bf16 %v5411_v25  ;;  %v5357_v42 = vunpack.c.h.bf16 %v5411_v25  ;;  %v5360_v43 = vunpack.c.l.bf16 %v5412_v26  ;;  %v5361_v44 = vunpack.c.h.bf16 %v5412_v26 }
  0x24   : > { %340 = vst.msk [vmem:[#allocation2 + $0x38] sm:$0xff] %vm332_vm1, %v5329_v16  ;;  %341 = vst.msk [vmem:[#allocation2 + $0x40] sm:$0xff] %vm332_vm1, %v5332_v20  ;;  %v5419_v45 = vld [vmem:[%s7250_s30 + $0x90] sm:$0xff]   ;;  %v5420_v46 = vld [vmem:[%s7250_s30 + $0x98] sm:$0xff]   ;;  %v5364_v48 = vunpack.c.l.bf16 %v5413_v31  ;;  %v5365_v49 = vunpack.c.h.bf16 %v5413_v31  ;;  %v5368_v50 = vunpack.c.l.bf16 %v5414_v32  ;;  %v5369_v51 = vunpack.c.h.bf16 %v5414_v32 }
  0x25   : > { %342 = vst.msk [vmem:[#allocation2 + $0x48] sm:$0xff] %vm332_vm1, %v5333_v21  ;;  %343 = vst.msk [vmem:[#allocation2 + $0x50] sm:$0xff] %vm332_vm1, %v5336_v22  ;;  %v5421_v47 = vld [vmem:[%s7250_s30 + $0xa0] sm:$0xff]   ;;  %v5422_v52 = vld [vmem:[%s7250_s30 + $0xa8] sm:$0xff]   ;;  %v5372_v55 = vunpack.c.l.bf16 %v5415_v33  ;;  %v5373_v56 = vunpack.c.h.bf16 %v5415_v33  ;;  %v5376_v57 = vunpack.c.l.bf16 %v5416_v38  ;;  %v5377_v58 = vunpack.c.h.bf16 %v5416_v38 }
  0x26   : > { %344 = vst.msk [vmem:[#allocation2 + $0x58] sm:$0xff] %vm332_vm1, %v5337_v23  ;;  %345 = vst.msk [vmem:[#allocation2 + $0x60] sm:$0xff] %vm332_vm1, %v5340_v27  ;;  %v284_v53 = vld [vmem:[%s7250_s30 + $0xb0] sm:$0xf]  ;;  %v285_v54 = vld [vmem:[%s7250_s30 + $0xb4] sm:$0x1]  ;;  %v5380_v59 = vunpack.c.l.bf16 %v5417_v39  ;;  %v5381_v60 = vunpack.c.h.bf16 %v5417_v39  ;;  %v5384_v61 = vunpack.c.l.bf16 %v5418_v40  ;;  %v5385_v62 = vunpack.c.h.bf16 %v5418_v40 }
  0x27   : > { %346 = vst.msk [vmem:[#allocation2 + $0x68] sm:$0xff] %vm332_vm1, %v5341_v28  ;;  %347 = vst.msk [vmem:[#allocation2 + $0x70] sm:$0xff] %vm332_vm1, %v5344_v29  ;;  %v5388_v63 = vunpack.c.l.bf16 %v5419_v45  ;;  %v5389_v0 = vunpack.c.h.bf16 %v5419_v45  ;;  %v5392_v1 = vunpack.c.l.bf16 %v5420_v46  ;;  %v5393_v3 = vunpack.c.h.bf16 %v5420_v46  ;;  %v4878_v20 = vld [vmem:[%s8557_s2 + $0x4] sm:$0x3] }
  0x28   : > { %348 = vst.msk [vmem:[#allocation2 + $0x78] sm:$0xff] %vm332_vm1, %v5345_v30  ;;  %349 = vst.msk [vmem:[#allocation2 + $0x80] sm:$0xff] %vm332_vm1, %v5348_v34  ;;  %v5396_v4 = vunpack.c.l.bf16 %v5421_v47  ;;  %v5397_v5 = vunpack.c.h.bf16 %v5421_v47  ;;  %v5400_v6 = vunpack.c.l.bf16 %v5422_v52  ;;  %v5401_v7 = vunpack.c.h.bf16 %v5422_v52 }
  0x29   : > { %350 = vst.msk [vmem:[#allocation2 + $0x88] sm:$0xff] %vm332_vm1, %v5349_v35  ;;  %351 = vst.msk [vmem:[#allocation2 + $0x90] sm:$0xff] %vm332_vm1, %v5352_v36  ;;  %v330_v8 = vunpack.c.l.bf16 %v284_v53  ;;  %v331_v9 = vunpack.c.l.bf16 %v285_v54  ;;  %v661_v18 = vsel %vm492_vm0, %v7242_v2, 0 }
  0x2a   : > { %352 = vst.msk [vmem:[#allocation2 + $0x98] sm:$0xff] %vm332_vm1, %v5353_v37  ;;  %353 = vst.msk [vmem:[#allocation2 + $0xa0] sm:$0xff] %vm332_vm1, %v5356_v41  ;;  %v867_v37 = vsel %vm492_vm0, %v4878_v20, 0 }
  0x2b   : > { %354 = vst.msk [vmem:[#allocation2 + $0xa8] sm:$0xff] %vm332_vm1, %v5357_v42  ;;  %355 = vst.msk [vmem:[#allocation2 + $0xb0] sm:$0xff] %vm332_vm1, %v5360_v43 }
  0x2c   : > { %356 = vst.msk [vmem:[#allocation2 + $0xb8] sm:$0xff] %vm332_vm1, %v5361_v44  ;;  %357 = vst.msk [vmem:[#allocation2 + $0xc0] sm:$0xff] %vm332_vm1, %v5364_v48 }
  0x2d   : > { %358 = vst.msk [vmem:[#allocation2 + $0xc8] sm:$0xff] %vm332_vm1, %v5365_v49  ;;  %359 = vst.msk [vmem:[#allocation2 + $0xd0] sm:$0xff] %vm332_vm1, %v5368_v50 }
  0x2e   : > { %360 = vst.msk [vmem:[#allocation2 + $0xd8] sm:$0xff] %vm332_vm1, %v5369_v51  ;;  %361 = vst.msk [vmem:[#allocation2 + $0xe0] sm:$0xff] %vm332_vm1, %v5372_v55 }
  0x2f   : > { %362 = vst.msk [vmem:[#allocation2 + $0xe8] sm:$0xff] %vm332_vm1, %v5373_v56  ;;  %363 = vst.msk [vmem:[#allocation2 + $0xf0] sm:$0xff] %vm332_vm1, %v5376_v57  ;;  %v4914_v56 = vld [vmem:[%s8557_s2 + $0x6] sm:$0x3] }
  0x30   : > { %364 = vst.msk [vmem:[#allocation2 + $0xf8] sm:$0xff] %vm332_vm1, %v5377_v58  ;;  %365 = vst.msk [vmem:[#allocation2 + $0x100] sm:$0xff] %vm332_vm1, %v5380_v59 }
  0x31   : > { %366 = vst.msk [vmem:[#allocation2 + $0x108] sm:$0xff] %vm332_vm1, %v5381_v60  ;;  %367 = vst.msk [vmem:[#allocation2 + $0x110] sm:$0xff] %vm332_vm1, %v5384_v61 }
  0x32   : > { %368 = vst.msk [vmem:[#allocation2 + $0x118] sm:$0xff] %vm332_vm1, %v5385_v62  ;;  %369 = vst.msk [vmem:[#allocation2 + $0x120] sm:$0xff] %vm332_vm1, %v5388_v63 }
  0x33   : > { %370 = vst.msk [vmem:[#allocation2 + $0x128] sm:$0xff] %vm332_vm1, %v5389_v0  ;;  %371 = vst.msk [vmem:[#allocation2 + $0x130] sm:$0xff] %vm332_vm1, %v5392_v1 }
  0x34   : > { %372 = vst.msk [vmem:[#allocation2 + $0x138] sm:$0xff] %vm332_vm1, %v5393_v3  ;;  %373 = vst.msk [vmem:[#allocation2 + $0x140] sm:$0xff] %vm332_vm1, %v5396_v4 }
  0x35   : > { %374 = vst.msk [vmem:[#allocation2 + $0x148] sm:$0xff] %vm332_vm1, %v5397_v5  ;;  %375 = vst.msk [vmem:[#allocation2 + $0x150] sm:$0xff] %vm332_vm1, %v5400_v6 }
  0x36   : > { %376 = vst.msk [vmem:[#allocation2 + $0x158] sm:$0xff] %vm332_vm1, %v5401_v7  ;;  %377 = vst.msk [vmem:[#allocation2 + $0x160] sm:$0xff] %vm332_vm1, %v330_v8 }
  0x37   : > { %379 = vst.msk [vmem:[#allocation2 + $0x168] sm:$0x3] %vm378_vm2, %v331_v9 }
  0x3e   : > { %v4807_v10 = vld [vmem:[%s7325_s9 + $0x1] sm:$0xff]  ;;  %v4808_v11 = vld [vmem:[%s7325_s9 + $0x9] sm:$0xff]  ;;  %v4809_v12 = vld [vmem:[%s7325_s9 + $0x11] sm:$0xff] }
  0x3f   : > { %v442_v13 = vpack.c.bf16 %v4808_v11, %v4807_v10  ;;  %v4810_v14 = vld [vmem:[%s7325_s9 + $0x19] sm:$0xff]  ;;  %v4811_v15 = vld [vmem:[%s7325_s9 + $0x21] sm:$0xff]  ;;  %v4812_v16 = vld [vmem:[%s7325_s9 + $0x29] sm:$0xff] }
  0x40   : > { %v443_v17 = vpack.c.bf16 %v4810_v14, %v4809_v12  ;;  %v444_v19 = vpack.c.bf16 %v4812_v16, %v4811_v15  ;;  %v4813_v21 = vld [vmem:[%s7325_s9 + $0x31] sm:$0xff]  ;;  %v4814_v22 = vld [vmem:[%s7325_s9 + $0x39] sm:$0xff]  ;;  %v4815_v2 = vld [vmem:[%s7325_s9 + $0x41] sm:$0xff] }
  0x41   : > { %5695 = vmatprep.mubr.msk.bf16.mxu0 %vm332_vm1, %v442_v13  ;;  %v4816_v23 = vld [vmem:[%s7325_s9 + $0x49] sm:$0xff]  ;;  %v445_v24 = vpack.c.bf16 %v4814_v22, %v4813_v21  ;;  %v4817_v26 = vld [vmem:[%s7325_s9 + $0x51] sm:$0xff]  ;;  %v4818_v27 = vld [vmem:[%s7325_s9 + $0x59] sm:$0xff] }
  0x42   : > { %5696 = vmatmul.mubr.msk.bf16.vlgmr.msra.gmra.mrb[0].mxu0 %vm332_vm1, %v443_v17  ;;  %v446_v25 = vpack.c.bf16 %v4816_v23, %v4815_v2  ;;  %v4819_v28 = vld [vmem:[%s7325_s9 + $0x61] sm:$0xff]  ;;  %v4820_v29 = vld [vmem:[%s7325_s9 + $0x69] sm:$0xff]  ;;  %v447_v30 = vpack.c.bf16 %v4818_v27, %v4817_v26  ;;  %v4821_v32 = vld [vmem:[%s7325_s9 + $0x71] sm:$0xff] }
  0x43   : > { %5720 = vmatpush3.bf16.msra.mxu0 %v661_v18  ;;  %5699 = vmatprep.mubr.msk.bf16.mxu0 %vm332_vm1, %v444_v19  ;;  %v448_v31 = vpack.c.bf16 %v4820_v29, %v4819_v28  ;;  %v4822_v33 = vld [vmem:[%s7325_s9 + $0x79] sm:$0xff]  ;;  %v4823_v34 = vld [vmem:[%s7325_s9 + $0x81] sm:$0xff]  ;;  %v4824_v35 = vld [vmem:[%s7325_s9 + $0x89] sm:$0xff]  ;;  %v1096_v28 = vsel %vm492_vm0, %v4914_v56, 0 }
  0x44   : > { %6863 = vmatprep.subr.msk.bf16.mxu0 %vm492_vm0, %v4878_v20  ;;  %v449_v36 = vpack.c.bf16 %v4822_v33, %v4821_v32  ;;  %v450_v38 = vpack.c.bf16 %v4824_v35, %v4823_v34  ;;  %v4825_v39 = vld [vmem:[%s7325_s9 + $0x91] sm:$0xff]  ;;  %v4826_v40 = vld [vmem:[%s7325_s9 + $0x99] sm:$0xff]  ;;  %v4827_v41 = vld [vmem:[%s7325_s9 + $0xa1] sm:$0xff] }
  0x45   : > { %v4828_v42 = vld [vmem:[%s7325_s9 + $0xa9] sm:$0xff]  ;;  %v451_v43 = vpack.c.bf16 %v4826_v40, %v4825_v39  ;;  %v4829_v45 = vld [vmem:[%s7325_s9 + $0xb1] sm:$0xf]  ;;  %v381_v46 = vld [vmem:[%s7325_s9] sm:$0xff] }
  0x46   : > { %v452_v44 = vpack.c.bf16 %v4828_v42, %v4827_v41  ;;  %v382_v47 = vld [vmem:[%s7325_s9 + $0x8] sm:$0xff]  ;;  %v453_v48 = vpack.c.bf16 %v4829_v45, %v4829_v45  ;;  %v383_v50 = vld [vmem:[%s7325_s9 + $0x10] sm:$0xff]  ;;  %v384_v51 = vld [vmem:[%s7325_s9 + $0x18] sm:$0xff] }
  0x47   : > { %v404_v49 = vpack.c.bf16 %v382_v47, %v381_v46  ;;  %v385_v52 = vld [vmem:[%s7325_s9 + $0x20] sm:$0xff]  ;;  %v386_v53 = vld [vmem:[%s7325_s9 + $0x28] sm:$0xff]  ;;  %v405_v54 = vpack.c.bf16 %v384_v51, %v383_v50  ;;  %v387_v57 = vld [vmem:[%s7325_s9 + $0x30] sm:$0xff] }
  0x48   : > { %v406_v55 = vpack.c.bf16 %v386_v53, %v385_v52  ;;  %v388_v58 = vld [vmem:[%s7325_s9 + $0x38] sm:$0xff]  ;;  %v389_v59 = vld [vmem:[%s7325_s9 + $0x40] sm:$0xff]  ;;  %v390_v60 = vld [vmem:[%s7325_s9 + $0x48] sm:$0xff] }
  0x49   : > { %v407_v61 = vpack.c.bf16 %v388_v58, %v387_v57  ;;  %v408_v62 = vpack.c.bf16 %v390_v60, %v389_v59  ;;  %v391_v63 = vld [vmem:[%s7325_s9 + $0x50] sm:$0xff]  ;;  %v392_v0 = vld [vmem:[%s7325_s9 + $0x58] sm:$0xff]  ;;  %v393_v1 = vld [vmem:[%s7325_s9 + $0x60] sm:$0xff] }
  0x4a   : > { %5700 = vmatmul.mubr.msk.bf16.gmra.mrb[4].mxu0 %vm332_vm1, %v445_v24  ;;  %v394_v3 = vld [vmem:[%s7325_s9 + $0x68] sm:$0xff]  ;;  %v409_v4 = vpack.c.bf16 %v392_v0, %v391_v63  ;;  %v395_v6 = vld [vmem:[%s7325_s9 + $0x70] sm:$0xff]  ;;  %v396_v7 = vld [vmem:[%s7325_s9 + $0x78] sm:$0xff] }
  0x4b   : > { %5703 = vmatprep.mubr.msk.bf16.mxu0 %vm332_vm1, %v446_v25  ;;  %v410_v5 = vpack.c.bf16 %v394_v3, %v393_v1  ;;  %v397_v8 = vld [vmem:[%s7325_s9 + $0x80] sm:$0xff]  ;;  %v398_v9 = vld [vmem:[%s7325_s9 + $0x88] sm:$0xff]  ;;  %v411_v10 = vpack.c.bf16 %v396_v7, %v395_v6  ;;  %v399_v12 = vld [vmem:[%s7325_s9 + $0x90] sm:$0xff] }
  0x4c   : > { %v412_v11 = vpack.c.bf16 %v398_v9, %v397_v8  ;;  %v400_v13 = vld [vmem:[%s7325_s9 + $0x98] sm:$0xff]  ;;  %v401_v14 = vld [vmem:[%s7325_s9 + $0xa0] sm:$0xff]  ;;  %v402_v15 = vld [vmem:[%s7325_s9 + $0xa8] sm:$0xff] }
  0x4d   : > { %v413_v16 = vpack.c.bf16 %v400_v13, %v399_v12  ;;  %v414_v17 = vpack.c.bf16 %v402_v15, %v401_v14  ;;  %v403_v18 = vld [vmem:[%s7325_s9 + $0xb0] sm:$0xf]  ;;  %v4855_v19 = vld [vmem:[%s7325_s9 + $0x2] sm:$0xff]  ;;  %v4858_v23 = vld [vmem:[%s7325_s9 + $0x1a] sm:$0xff] }
  0x4e   : > { %v4856_v20 = vld [vmem:[%s7325_s9 + $0xa] sm:$0xff]  ;;  %v415_v21 = vpack.c.bf16 %v403_v18, %v403_v18  ;;  %v4857_v2 = vld [vmem:[%s7325_s9 + $0x12] sm:$0xff]  ;;  %v4859_v24 = vld [vmem:[%s7325_s9 + $0x22] sm:$0xff] }
  0x4f   : > { %v816_v22 = vpack.c.bf16 %v4856_v20, %v4855_v19  ;;  %v4860_v25 = vld [vmem:[%s7325_s9 + $0x2a] sm:$0xff]  ;;  %v817_v26 = vpack.c.bf16 %v4858_v23, %v4857_v2  ;;  %v4950_v29 = vld [vmem:[%s8557_s2 + $0x8] sm:$0x3]  ;;  %v4869_v42 = vld [vmem:[%s7325_s9 + $0x72] sm:$0xff] }
  0x50   : > { %v818_v27 = vpack.c.bf16 %v4860_v25, %v4859_v24  ;;  %v4863_v32 = vld [vmem:[%s7325_s9 + $0x42] sm:$0xff]  ;;  %v4864_v33 = vld [vmem:[%s7325_s9 + $0x4a] sm:$0xff]  ;;  %v4911_v58 = vld [vmem:[%s7325_s9 + $0xb2] sm:$0xff] }
  0x51   : > { %v820_v35 = vpack.c.bf16 %v4864_v33, %v4863_v32  ;;  %v4868_v39 = vld [vmem:[%s7325_s9 + $0x6a] sm:$0xff]  ;;  %v4875_v50 = vld [vmem:[%s7325_s9 + $0xa2] sm:$0xff]  ;;  %v4912_v59 = vld [vmem:[%s7325_s9 + $0xba] sm:$0xff] }
  0x52   : > { %5704 = vmatmul.mubr.msk.bf16.gmra.mrb[8].mxu0 %vm332_vm1, %v447_v30  ;;  %v4861_v30 = vld [vmem:[%s7325_s9 + $0x32] sm:$0xff]  ;;  %v4872_v45 = vld [vmem:[%s7325_s9 + $0x8a] sm:$0xff]  ;;  %v1055_v60 = vpack.c.bf16 %v4912_v59, %v4911_v58  ;;  %v4928_v63 = vld [vmem:[%s7325_s9 + $0x1b] sm:$0xff] }
  0x53   : > { %5707 = vmatprep.mubr.msk.bf16.mxu0 %vm332_vm1, %v448_v31  ;;  %v4862_v31 = vld [vmem:[%s7325_s9 + $0x3a] sm:$0xff]  ;;  %v4876_v51 = vld [vmem:[%s7325_s9 + $0xaa] sm:$0xff] }
  0x54   : > { %v819_v34 = vpack.c.bf16 %v4862_v31, %v4861_v30  ;;  %v826_v53 = vpack.c.bf16 %v4876_v51, %v4875_v50  ;;  %v4986_v57 = vld [vmem:[%s8557_s2 + $0xa] sm:$0x3]  ;;  %v4932_v6 = vld [vmem:[%s7325_s9 + $0x3b] sm:$0xff]  ;;  %v4935_v13 = vld [vmem:[%s7325_s9 + $0x53] sm:$0xff] }
  0x55   : > { %v4929_v3 = vld [vmem:[%s7325_s9 + $0x23] sm:$0xff]  ;;  %v1554_v9 = vsel %vm492_vm0, %v4986_v57, 0  ;;  %v4934_v12 = vld [vmem:[%s7325_s9 + $0x4b] sm:$0xff]  ;;  %v4936_v14 = vld [vmem:[%s7325_s9 + $0x5b] sm:$0xff] }
  0x56   : > { %v4938_v18 = vld [vmem:[%s7325_s9 + $0x6b] sm:$0xff]  ;;  %v4939_v19 = vld [vmem:[%s7325_s9 + $0x73] sm:$0xff]  ;;  %v4940_v20 = vld [vmem:[%s7325_s9 + $0x7b] sm:$0xff] }
  0x57   : > { %v4941_v2 = vld [vmem:[%s7325_s9 + $0x83] sm:$0xff]  ;;  %v4942_v23 = vld [vmem:[%s7325_s9 + $0x8b] sm:$0xff]  ;;  %v4943_v24 = vld [vmem:[%s7325_s9 + $0x93] sm:$0xff] }
  0x58   : > { %v4944_v25 = vld [vmem:[%s7325_s9 + $0x9b] sm:$0xff]  ;;  %v4947_v30 = vld [vmem:[%s7325_s9 + $0xb3] sm:$0xff]  ;;  %v4977_v59 = vld [vmem:[%s7325_s9 + $0x84] sm:$0xff] }
  0x59   : > { %v4948_v31 = vld [vmem:[%s7325_s9 + $0xbb] sm:$0xff] }
  0x5a   : > { %5708 = vmatmul.mubr.msk.bf16.gmra.mrb[12].mxu0 %vm332_vm1, %v449_v36  ;;  %v4865_v36 = vld [vmem:[%s7325_s9 + $0x52] sm:$0xff]  ;;  %v1284_v33 = vpack.c.bf16 %v4948_v31, %v4947_v30  ;;  %v4972_v50 = vld [vmem:[%s7325_s9 + $0x5c] sm:$0xff]  ;;  %v5035_v30 = vld [vmem:[%s7325_s9 + $0x25] sm:$0xff] }
  0x5b   : > { %5711 = vmatprep.mubr.msk.bf16.mxu0 %vm332_vm1, %v450_v38  ;;  %v4867_v38 = vld [vmem:[%s7325_s9 + $0x62] sm:$0xff]  ;;  %v5036_v31 = vld [vmem:[%s7325_s9 + $0x2d] sm:$0xff] }
  0x5c   : > { %v822_v41 = vpack.c.bf16 %v4868_v39, %v4867_v38  ;;  %v4965_v39 = vld [vmem:[%s7325_s9 + $0x24] sm:$0xff] }
  0x62   : > { %5712 = vmatmul.mubr.msk.bf16.gmra.mrb[16].mxu0 %vm332_vm1, %v451_v43  ;;  %v4870_v43 = vld [vmem:[%s7325_s9 + $0x7a] sm:$0xff] }
  0x63   : > { %5715 = vmatprep.mubr.msk.bf16.mxu0 %vm332_vm1, %v452_v44  ;;  %v4871_v44 = vld [vmem:[%s7325_s9 + $0x82] sm:$0xff]  ;;  %v823_v46 = vpack.c.bf16 %v4870_v43, %v4869_v42 }
  0x64   : > { %v824_v47 = vpack.c.bf16 %v4872_v45, %v4871_v44  ;;  %v4968_v42 = vld [vmem:[%s7325_s9 + $0x3c] sm:$0xff] }
  0x6a   : > { %5716 = vmatmul.mubr.msk.bf16.gmra.mrb[20].mxu0 %vm332_vm1, %v453_v48  ;;  %v4873_v48 = vld [vmem:[%s7325_s9 + $0x92] sm:$0xff] }
  0x6b   : > { %5721 = vmatprep.mubr.msk.bf16.mxu0 %vm332_vm1, %v404_v49  ;;  %v4874_v49 = vld [vmem:[%s7325_s9 + $0x9a] sm:$0xff] }
  0x6c   : > { %v825_v52 = vpack.c.bf16 %v4874_v49, %v4873_v48  ;;  %v4970_v48 = vld [vmem:[%s7325_s9 + $0x4c] sm:$0xff]  ;;  %v4971_v49 = vld [vmem:[%s7325_s9 + $0x54] sm:$0xff] }
  0x72   : > { %5722 = vmatmul.mubr.msk.bf16.vlgmr.msra.gmra.mrb[0].mxu0 %vm332_vm1, %v405_v54  ;;  %v4877_v54 = vld [vmem:[%s7325_s9 + $0xb2] sm:$0xf] }
  0x73   : > { %5746 = vmatpush3.bf16.msra.mxu0 %v867_v37  ;;  %5725 = vmatprep.mubr.msk.bf16.mxu0 %vm332_vm1, %v406_v55  ;;  %v4866_v37 = vld [vmem:[%s7325_s9 + $0x5a] sm:$0xff]  ;;  %v827_v55 = vpack.c.bf16 %v4877_v54, %v4877_v54  ;;  %v4974_v54 = vld [vmem:[%s7325_s9 + $0x6c] sm:$0xff] }
  0x74   : > { %6864 = vmatprep.subr.msk.bf16.mxu0 %vm492_vm0, %v4914_v56  ;;  %v821_v40 = vpack.c.bf16 %v4866_v37, %v4865_v36  ;;  %v1325_v56 = vsel %vm492_vm0, %v4950_v29, 0  ;;  %v4964_v36 = vld [vmem:[%s7325_s9 + $0x1c] sm:$0xff] }
  0x7a   : > { %5726 = vmatmul.mubr.msk.bf16.gmra.mrb[4].mxu0 %vm332_vm1, %v407_v61  ;;  %v4913_v61 = vld [vmem:[%s7325_s9 + $0xc2] sm:$0xf] }
  0x7b   : > { %5729 = vmatprep.mubr.msk.bf16.mxu0 %vm332_vm1, %v408_v62  ;;  %v4927_v62 = vld [vmem:[%s7325_s9 + $0x13] sm:$0xff]  ;;  %v1056_v0 = vpack.c.bf16 %v4913_v61, %v4913_v61 }
  0x7c   : > { %v1274_v1 = vpack.c.bf16 %v4928_v63, %v4927_v62  ;;  %v4979_v61 = vld [vmem:[%s7325_s9 + $0x94] sm:$0xff]  ;;  %v4980_v62 = vld [vmem:[%s7325_s9 + $0x9c] sm:$0xff] }
  0x82   : > { %5730 = vmatmul.mubr.msk.bf16.gmra.mrb[8].mxu0 %vm332_vm1, %v409_v4  ;;  %v4930_v4 = vld [vmem:[%s7325_s9 + $0x2b] sm:$0xff] }
  0x83   : > { %5733 = vmatprep.mubr.msk.bf16.mxu0 %vm332_vm1, %v410_v5  ;;  %v4931_v5 = vld [vmem:[%s7325_s9 + $0x33] sm:$0xff]  ;;  %v1275_v7 = vpack.c.bf16 %v4930_v4, %v4929_v3 }
  0x84   : > { %v1276_v8 = vpack.c.bf16 %v4932_v6, %v4931_v5  ;;  %v4982_v3 = vld [vmem:[%s7325_s9 + $0xac] sm:$0xff]  ;;  %v4983_v4 = vld [vmem:[%s7325_s9 + $0xb4] sm:$0xff]  ;;  %v4984_v5 = vld [vmem:[%s7325_s9 + $0xbc] sm:$0xff] }
  0x8a   : > { %5734 = vmatmul.mubr.msk.bf16.gmra.mrb[12].mxu0 %vm332_vm1, %v411_v10  ;;  %v5022_v10 = vld [vmem:[%s8557_s2 + $0xc] sm:$0x3] }
  0x8b   : > { %5737 = vmatprep.mubr.msk.bf16.mxu0 %vm332_vm1, %v412_v11  ;;  %v4933_v11 = vld [vmem:[%s7325_s9 + $0x43] sm:$0xff]  ;;  %v1783_v45 = vsel %vm492_vm0, %v5022_v10, 0 }
  0x8c   : > { %v1277_v15 = vpack.c.bf16 %v4934_v12, %v4933_v11  ;;  %v7553_v11 = vld [vmem:[%s8557_s2 + $0x10] sm:$0x3]  ;;  %v7126_v12 = vmov 0  }
  0x8d   : > { %6949 = vset.pattern.permute.xlu0 %v7126_v12  ;;  %6950 = vset.pattern.permute.xlu1 %v7126_v12 }
  0x92   : > { %5738 = vmatmul.mubr.msk.bf16.gmra.mrb[16].mxu0 %vm332_vm1, %v413_v16  ;;  %v1278_v16 = vpack.c.bf16 %v4936_v14, %v4935_v13  ;;  %v2497_v13 = vld [vmem:[%s7565_s17] sm:$0xff]  ;;  %v2499_v14 = vld [vmem:[%s7565_s17 + $0x10] sm:$0xff] }
  0x93   : > { %5741 = vmatprep.mubr.msk.bf16.mxu0 %vm332_vm1, %v414_v17  ;;  %v4937_v17 = vld [vmem:[%s7325_s9 + $0x63] sm:$0xff]  ;;  %2522 = vperm.xlu0 %6949, %v2497_v13  }
  0x94   : > { %2532 = vperm.xlu1 %6950, %v2499_v14   ;;  %v5057_v14 = vld [vmem:[%s7325_s9 + $0xd5] sm:$0xf] }
  0x9a   : > { %5742 = vmatmul.mubr.msk.bf16.gmra.mrb[20].mxu0 %vm332_vm1, %v415_v21  ;;  %v1279_v21 = vpack.c.bf16 %v4938_v18, %v4937_v17  ;;  %v2501_v17 = vld [vmem:[%s7565_s17 + $0x20] sm:$0xff]  ;;  %v2502_v18 = vld [vmem:[%s7565_s17 + $0x28] sm:$0xff] }
  0x9b   : > { %5747 = vmatprep.mubr.msk.bf16.mxu0 %vm332_vm1, %v816_v22  ;;  %v1280_v22 = vpack.c.bf16 %v4940_v20, %v4939_v19  ;;  %v2503_v19 = vld [vmem:[%s7565_s17 + $0x30] sm:$0xff]  ;;  %v2504_v20 = vld [vmem:[%s7565_s17 + $0x38] sm:$0xff] }
  0xa2   : > { %5748 = vmatmul.mubr.msk.bf16.vlgmr.msra.gmra.mrb[0].mxu0 %vm332_vm1, %v817_v26 }
  0xa3   : > { %5772 = vmatpush3.bf16.msra.mxu0 %v1096_v28  ;;  %5751 = vmatprep.mubr.msk.bf16.mxu0 %vm332_vm1, %v818_v27  ;;  %v4945_v28 = vld [vmem:[%s7325_s9 + $0xa3] sm:$0xff] }
  0xa4   : > { %6865 = vmatprep.subr.msk.bf16.mxu0 %vm492_vm0, %v4950_v29  ;;  %v4946_v29 = vld [vmem:[%s7325_s9 + $0xab] sm:$0xff] }
  0xa5   : > { %v1283_v32 = vpack.c.bf16 %v4946_v29, %v4945_v28  ;;  %v2510_v28 = vld [vmem:[%s7565_s17 + $0x68] sm:$0xff]  ;;  %v5021_v29 = vld [vmem:[%s7325_s9 + $0xd4] sm:$0xf] }
  0xaa   : > { %5752 = vmatmul.mubr.msk.bf16.gmra.mrb[4].mxu0 %vm332_vm1, %v819_v34 }
  0xab   : > { %5755 = vmatprep.mubr.msk.bf16.mxu0 %vm332_vm1, %v820_v35 }
  0xb2   : > { %5756 = vmatmul.mubr.msk.bf16.gmra.mrb[8].mxu0 %vm332_vm1, %v821_v40 }
  0xb3   : > { %5759 = vmatprep.mubr.msk.bf16.mxu0 %vm332_vm1, %v822_v41 }
  0xba   : > { %5760 = vmatmul.mubr.msk.bf16.gmra.mrb[12].mxu0 %vm332_vm1, %v823_v46 }
  0xbb   : > { %5763 = vmatprep.mubr.msk.bf16.mxu0 %vm332_vm1, %v824_v47 }
  0xc2   : > { %5764 = vmatmul.mubr.msk.bf16.gmra.mrb[16].mxu0 %vm332_vm1, %v825_v52 }
  0xc3   : > { %5767 = vmatprep.mubr.msk.bf16.mxu0 %vm332_vm1, %v826_v53 }
  0xca   : > { %5768 = vmatmul.mubr.msk.bf16.gmra.mrb[20].mxu0 %vm332_vm1, %v827_v55  ;;  %v4975_v55 = vld [vmem:[%s7325_s9 + $0x74] sm:$0xff] }
  0xcb   : > { %5773 = vmatprep.mubr.msk.bf16.mxu0 %vm332_vm1, %v817_v26  ;;  %v1281_v26 = vpack.c.bf16 %v4942_v23, %v4941_v2  ;;  %v5019_v2 = vld [vmem:[%s7325_s9 + $0xc4] sm:$0xff]  ;;  %v5020_v23 = vld [vmem:[%s7325_s9 + $0xcc] sm:$0xff] }
  0xd2   : > { %5774 = vmatmul.mubr.msk.bf16.vlgmr.msra.gmra.mrb[0].mxu0 %vm332_vm1, %v818_v27  ;;  %v1282_v27 = vpack.c.bf16 %v4944_v25, %v4943_v24  ;;  %v2507_v24 = vld [vmem:[%s7565_s17 + $0x50] sm:$0xff]  ;;  %v2508_v25 = vld [vmem:[%s7565_s17 + $0x58] sm:$0xff] }
  0xd3   : > { %5798 = vmatpush3.bf16.msra.mxu0 %v1325_v56  ;;  %5777 = vmatprep.mubr.msk.bf16.mxu0 %vm332_vm1, %v819_v34  ;;  %v4949_v34 = vld [vmem:[%s7325_s9 + $0xc3] sm:$0xf] }
  0xd4   : > { %6866 = vmatprep.subr.msk.bf16.mxu0 %vm492_vm0, %v4986_v57  ;;  %v1285_v37 = vpack.c.bf16 %v4949_v34, %v4949_v34  ;;  %v4976_v56 = vld [vmem:[%s7325_s9 + $0x7c] sm:$0xff]  ;;  %v1743_v34 = vpack.c.bf16 %v5021_v29, %v5021_v29  ;;  %v5080_v29 = vld [vmem:[%s7325_s9 + $0x6e] sm:$0xff] }
  0xd5   : > { %v1509_v58 = vpack.c.bf16 %v4976_v56, %v4975_v55  ;;  %v5044_v55 = vld [vmem:[%s7325_s9 + $0x6d] sm:$0xff] }
  0xd6   : > { %v2519_v56 = vld [vmem:[%s7565_s17 + $0xb0] sm:$0xf] }
  0xda   : > { %5778 = vmatmul.mubr.msk.bf16.gmra.mrb[4].mxu0 %vm332_vm1, %v820_v35  ;;  %v4963_v35 = vld [vmem:[%s7325_s9 + $0x14] sm:$0xff] }
  0xdb   : > { %5781 = vmatprep.mubr.msk.bf16.mxu0 %vm332_vm1, %v821_v40  ;;  %v1503_v38 = vpack.c.bf16 %v4964_v36, %v4963_v35  ;;  %v4966_v40 = vld [vmem:[%s7325_s9 + $0x2c] sm:$0xff]  ;;  %v2512_v35 = vld [vmem:[%s7565_s17 + $0x78] sm:$0xff]  ;;  %v1961_v36 = vpack.c.bf16 %v5036_v31, %v5035_v30 }
  0xdc   : > { %v1504_v43 = vpack.c.bf16 %v4966_v40, %v4965_v39  ;;  %v2514_v39 = vld [vmem:[%s7565_s17 + $0x88] sm:$0xff]  ;;  %v5037_v40 = vld [vmem:[%s7325_s9 + $0x35] sm:$0xff] }
  0xe2   : > { %5782 = vmatmul.mubr.msk.bf16.gmra.mrb[8].mxu0 %vm332_vm1, %v822_v41  ;;  %v4967_v41 = vld [vmem:[%s7325_s9 + $0x34] sm:$0xff] }
  0xe3   : > { %5785 = vmatprep.mubr.msk.bf16.mxu0 %vm332_vm1, %v823_v46  ;;  %v1505_v44 = vpack.c.bf16 %v4968_v42, %v4967_v41  ;;  %v5058_v46 = vld [vmem:[%s8557_s2 + $0xe] sm:$0x3]  ;;  %v5038_v41 = vld [vmem:[%s7325_s9 + $0x3d] sm:$0xff] }
  0xe4   : > { %v6953_v42 = vld [vmem:[%s8558_s3 + $0x8] sm:$0xff]  }
  0xea   : > { %5786 = vmatmul.mubr.msk.bf16.gmra.mrb[12].mxu0 %vm332_vm1, %v824_v47  ;;  %v4969_v47 = vld [vmem:[%s7325_s9 + $0x44] sm:$0xff] }
  0xeb   : > { %5789 = vmatprep.mubr.msk.bf16.mxu0 %vm332_vm1, %v825_v52  ;;  %v1506_v51 = vpack.c.bf16 %v4970_v48, %v4969_v47  ;;  %v1507_v52 = vpack.c.bf16 %v4972_v50, %v4971_v49  ;;  %v2516_v47 = vld [vmem:[%s7565_s17 + $0x98] sm:$0xff]  ;;  %v2241_v49 = vsel %vm492_vm0, %v7553_v11, 0  ;;  %v2517_v50 = vld [vmem:[%s7565_s17 + $0xa0] sm:$0xff] }
  0xf2   : > { %5790 = vmatmul.mubr.msk.bf16.gmra.mrb[16].mxu0 %vm332_vm1, %v826_v53  ;;  %v4973_v53 = vld [vmem:[%s7325_s9 + $0x64] sm:$0xff] }
  0xf3   : > { %5793 = vmatprep.mubr.msk.bf16.mxu0 %vm332_vm1, %v1055_v60  ;;  %v1508_v57 = vpack.c.bf16 %v4974_v54, %v4973_v53  ;;  %v4978_v60 = vld [vmem:[%s7325_s9 + $0x8c] sm:$0xff]  ;;  %v5042_v53 = vld [vmem:[%s7325_s9 + $0x5d] sm:$0xff] }
  0xf4   : > { %v1510_v63 = vpack.c.bf16 %v4978_v60, %v4977_v59  ;;  %v5043_v54 = vld [vmem:[%s7325_s9 + $0x65] sm:$0xff]  ;;  %v5045_v59 = vld [vmem:[%s7325_s9 + $0x75] sm:$0xff]  ;;  %v5046_v60 = vld [vmem:[%s7325_s9 + $0x7d] sm:$0xff] }
  0xfa   : > { %5794 = vmatmul.mubr.msk.bf16.gmra.mrb[20].mxu0 %vm332_vm1, %v1056_v0  ;;  %v1511_v0 = vpack.c.bf16 %v4980_v62, %v4979_v61  ;;  %v5047_v61 = vld [vmem:[%s7325_s9 + $0x85] sm:$0xff]  ;;  %v5048_v62 = vld [vmem:[%s7325_s9 + $0x8d] sm:$0xff] }
  0xfb   : > { %5799 = vmatprep.mubr.msk.bf16.mxu0 %vm332_vm1, %v1274_v1  ;;  %v4981_v1 = vld [vmem:[%s7325_s9 + $0xa4] sm:$0xff] }
  0xfc   : > { %v1512_v6 = vpack.c.bf16 %v4982_v3, %v4981_v1  ;;  %v5049_v1 = vld [vmem:[%s7325_s9 + $0x95] sm:$0xff]  ;;  %v5050_v3 = vld [vmem:[%s7325_s9 + $0x9d] sm:$0xff] }
 0x102   : > { %5800 = vmatmul.mubr.msk.bf16.vlgmr.msra.gmra.mrb[0].mxu0 %vm332_vm1, %v1275_v7  ;;  %v1513_v7 = vpack.c.bf16 %v4984_v5, %v4983_v4  ;;  %v5051_v4 = vld [vmem:[%s7325_s9 + $0xa5] sm:$0xff]  ;;  %v5052_v5 = vld [vmem:[%s7325_s9 + $0xad] sm:$0xff] }
 0x103   : > { %5824 = vmatpush3.bf16.msra.mxu0 %v1554_v9  ;;  %5803 = vmatprep.mubr.msk.bf16.mxu0 %vm332_vm1, %v1276_v8  ;;  %v4985_v8 = vld [vmem:[%s7325_s9 + $0xc4] sm:$0xf] }
 0x104   : > { %6867 = vmatprep.subr.msk.bf16.mxu0 %vm492_vm0, %v5022_v10  ;;  %v1514_v9 = vpack.c.bf16 %v4985_v8, %v4985_v8  ;;  %v2012_v10 = vsel %vm492_vm0, %v5058_v46, 0  ;;  %v5053_v8 = vld [vmem:[%s7325_s9 + $0xb5] sm:$0xff] }
 0x10a   : > { %5804 = vmatmul.mubr.msk.bf16.gmra.mrb[4].mxu0 %vm332_vm1, %v1277_v15  ;;  %v2498_v15 = vld [vmem:[%s7565_s17 + $0x8] sm:$0xff] }
 0x10b   : > { %5807 = vmatprep.mubr.msk.bf16.mxu0 %vm332_vm1, %v1278_v16  ;;  %v2500_v16 = vld [vmem:[%s7565_s17 + $0x18] sm:$0xff]  ;;  %2527 = vperm.xlu0 %6949, %v2498_v15   ;;  %v5071_v15 = vld [vmem:[%s7325_s9 + $0x26] sm:$0xff] }
 0x10c   : > { %2537 = vperm.xlu1 %6950, %v2500_v16   ;;  %v5072_v16 = vld [vmem:[%s7325_s9 + $0x2e] sm:$0xff] }
 0x10f   : > { %2542 = vperm.xlu0 %6949, %v2501_v17   ;;  %v1972_v17 = vpack.c.bf16 %v5057_v14, %v5057_v14 }
 0x110   : > { %2547 = vperm.xlu1 %6950, %v2502_v18   ;;  %v2190_v18 = vpack.c.bf16 %v5072_v16, %v5071_v15 }
 0x112   : > { %5808 = vmatmul.mubr.msk.bf16.gmra.mrb[8].mxu0 %vm332_vm1, %v1279_v21  ;;  %v2505_v21 = vld [vmem:[%s7565_s17 + $0x40] sm:$0xff] }
 0x113   : > { %5811 = vmatprep.mubr.msk.bf16.mxu0 %vm332_vm1, %v1280_v22  ;;  %2552 = vperm.xlu0 %6949, %v2503_v19   ;;  %v2506_v22 = vld [vmem:[%s7565_s17 + $0x48] sm:$0xff]  ;;  %v5073_v19 = vld [vmem:[%s7325_s9 + $0x36] sm:$0xff] }
 0x114   : > { %2557 = vperm.xlu1 %6950, %v2504_v20   ;;  %v5074_v20 = vld [vmem:[%s7325_s9 + $0x3e] sm:$0xff] }
 0x117   : > { %2562 = vperm.xlu0 %6949, %v2505_v21   ;;  %v5075_v21 = vld [vmem:[%s7325_s9 + $0x46] sm:$0xff] }
 0x118   : > { %2567 = vperm.xlu1 %6950, %v2506_v22   ;;  %v5076_v22 = vld [vmem:[%s7325_s9 + $0x4e] sm:$0xff] }
 0x11a   : > { %5812 = vmatmul.mubr.msk.bf16.gmra.mrb[12].mxu0 %vm332_vm1, %v1281_v26  ;;  %v1742_v26 = vpack.c.bf16 %v5020_v23, %v5019_v2  ;;  %v2191_v2 = vpack.c.bf16 %v5074_v20, %v5073_v19  ;;  %v2192_v23 = vpack.c.bf16 %v5076_v22, %v5075_v21 }
 0x11b   : > { %5815 = vmatprep.mubr.msk.bf16.mxu0 %vm332_vm1, %v1282_v27  ;;  %2572 = vperm.xlu0 %6949, %v2507_v24   ;;  %v2509_v27 = vld [vmem:[%s7565_s17 + $0x60] sm:$0xff] }
 0x11c   : > { %2577 = vperm.xlu1 %6950, %v2508_v25   ;;  %v6952_v24 = vld [vmem:[%s8558_s3 + $0x40] sm:$0xff]   ;;  %v5077_v25 = vld [vmem:[%s7325_s9 + $0x56] sm:$0xff] }
 0x11f   : > { %2582 = vperm.xlu0 %6949, %v2509_v27   ;;  %v6954_v27 = vld [vmem:[%s8558_s3 + $0x48] sm:$0xff]  }
 0x120   : > { %2587 = vperm.xlu1 %6950, %v2510_v28   ;;  %v5079_v28 = vld [vmem:[%s7325_s9 + $0x66] sm:$0xff] }
 0x121   : > { %v2194_v31 = vpack.c.bf16 %v5080_v29, %v5079_v28 }
 0x122   : > { %5816 = vmatmul.mubr.msk.bf16.gmra.mrb[16].mxu0 %vm332_vm1, %v1283_v32  ;;  %v7127_v32 = vmov 0.0  }
 0x123   : > { %5819 = vmatprep.mubr.msk.bf16.mxu0 %vm332_vm1, %v1284_v33  ;;  %5979 = vmatprep.subr.bf16.mxu1 %v7127_v32  ;;  %2658 = vst [vmem:[#allocation3] sm:$0xff] %v7127_v32  ;;  %2659 = vst [vmem:[#allocation3 + $0xbc] sm:$0xff] %v7127_v32  ;;  %v2511_v33 = vld [vmem:[%s7565_s17 + $0x70] sm:$0xff] }
 0x124   : > { %2592 = vperm.xlu0 %6949, %v2511_v33   ;;  %2597 = vperm.xlu1 %6950, %v2512_v35   ;;  %v5081_v33 = vld [vmem:[%s7325_s9 + $0x76] sm:$0xff]  ;;  %v5083_v35 = vld [vmem:[%s7325_s9 + $0x86] sm:$0xff] }
 0x125   : > { %5995 = vmatprep.mubr.msk.bf16.mxu1 %vm7128_vm3, %v7127_v32 }
 0x128   : > { %2607 = vperm.xlu1 %6950, %v2514_v39   ;;  %v5085_v39 = vld [vmem:[%s7325_s9 + $0x96] sm:$0xff] }
 0x12a   : > { %5820 = vmatmul.mubr.msk.bf16.gmra.mrb[20].mxu0 %vm332_vm1, %v1285_v37  ;;  %v6951_v37 = vld [vmem:[%s8558_s3] sm:$0xff]  }
 0x12b   : > { %5825 = vmatprep.mubr.msk.bf16.mxu0 %vm332_vm1, %v1503_v38  ;;  %v2513_v38 = vld [vmem:[%s7565_s17 + $0x80] sm:$0xff]  ;;  %5980 = vmatpush3.bf16.msra.mxu1 %v6951_v37 }
 0x12c   : > { %5981 = vmatprep.subr.bf16.mxu1 %v7127_v32  ;;  %2602 = vperm.xlu0 %6949, %v2513_v38  }
 0x12d   : > { %2617 = vperm.xlu1 %6950, %v2516_v47   ;;  %v5091_v47 = vld [vmem:[%s7325_s9 + $0xc6] sm:$0xff] }
 0x12f   : > { %5982 = vmatpush3.bf16.msra.mxu1 %v6953_v42  ;;  %v5088_v42 = vld [vmem:[%s7325_s9 + $0xae] sm:$0xff] }
 0x130   : > { %5983 = vmatprep.subr.bf16.mxu1 %v7127_v32 }
 0x132   : > { %5826 = vmatmul.mubr.msk.bf16.vlgmr.msra.gmra.mrb[0].mxu0 %vm332_vm1, %v1504_v43 }
 0x133   : > { %5850 = vmatpush3.bf16.msra.mxu0 %v1783_v45  ;;  %5829 = vmatprep.mubr.msk.bf16.mxu0 %vm332_vm1, %v1505_v44  ;;  %v2515_v45 = vld [vmem:[%s7565_s17 + $0x90] sm:$0xff] }
 0x134   : > { %6868 = vmatprep.subr.msk.bf16.mxu0 %vm492_vm0, %v5058_v46  ;;  %v1962_v46 = vpack.c.bf16 %v5038_v41, %v5037_v40  ;;  %2612 = vperm.xlu0 %6949, %v2515_v45   ;;  %v5086_v40 = vld [vmem:[%s7325_s9 + $0x9e] sm:$0xff]  ;;  %v5087_v41 = vld [vmem:[%s7325_s9 + $0xa6] sm:$0xff]  ;;  %v5089_v45 = vld [vmem:[%s7325_s9 + $0xb6] sm:$0xff] }
 0x138   : > { %2622 = vperm.xlu0 %6949, %v2517_v50  }
 0x13a   : > { %5830 = vmatmul.mubr.msk.bf16.gmra.mrb[4].mxu0 %vm332_vm1, %v1506_v51 }
 0x13b   : > { %5833 = vmatprep.mubr.msk.bf16.mxu0 %vm332_vm1, %v1507_v52 }
 0x13c   : > { %2632 = vperm.xlu0 %6949, %v2519_v56   ;;  %v6960_v56 = vld [vmem:[%s8558_s3 + $0x60] sm:$0xff]  }
 0x142   : > { %5834 = vmatmul.mubr.msk.bf16.gmra.mrb[8].mxu0 %vm332_vm1, %v1508_v57 }
 0x143   : > { %5837 = vmatprep.mubr.msk.bf16.mxu0 %vm332_vm1, %v1509_v58 }
 0x14a   : > { %5838 = vmatmul.mubr.msk.bf16.gmra.mrb[12].mxu0 %vm332_vm1, %v1510_v63 }
 0x14b   : > { %5841 = vmatprep.mubr.msk.bf16.mxu0 %vm332_vm1, %v1511_v0 }
 0x152   : > { %5842 = vmatmul.mubr.msk.bf16.gmra.mrb[16].mxu0 %vm332_vm1, %v1512_v6 }
 0x153   : > { %5845 = vmatprep.mubr.msk.bf16.mxu0 %vm332_vm1, %v1513_v7 }
 0x15a   : > { %5846 = vmatmul.mubr.msk.bf16.gmra.mrb[20].mxu0 %vm332_vm1, %v1514_v9  ;;  %v5054_v9 = vld [vmem:[%s7325_s9 + $0xbd] sm:$0xff] }
 0x15b   : > { %5851 = vmatprep.mubr.msk.bf16.mxu0 %vm332_vm1, %v1504_v43  ;;  %v5039_v43 = vld [vmem:[%s7325_s9 + $0x45] sm:$0xff]  ;;  %v1970_v12 = vpack.c.bf16 %v5054_v9, %v5053_v8 }
 0x162   : > { %5852 = vmatmul.mubr.msk.bf16.vlgmr.msra.gmra.mrb[0].mxu0 %vm332_vm1, %v1505_v44  ;;  %v5040_v44 = vld [vmem:[%s7325_s9 + $0x4d] sm:$0xff] }
 0x163   : > { %5876 = vmatpush3.bf16.msra.mxu0 %v2012_v10  ;;  %5855 = vmatprep.mubr.msk.bf16.mxu0 %vm332_vm1, %v1506_v51  ;;  %v1963_v48 = vpack.c.bf16 %v5040_v44, %v5039_v43  ;;  %v2518_v51 = vld [vmem:[%s7565_s17 + $0xa8] sm:$0xff]  ;;  %v2197_v43 = vpack.c.bf16 %v5086_v40, %v5085_v39  ;;  %v2198_v44 = vpack.c.bf16 %v5088_v42, %v5087_v41  ;;  %s8416_s17 = scalar_lea.vmem [#allocation4], %s6870_s16  ;;  %s7034_s16 = sshll.u32 %s7129_s15, 4  ;;  %s7035_s16 = int_to_ptr.vmem [resolvable:$false] %s7034_s16 }
 0x164   : > { %6869 = vmatprep.subr.msk.bf16.mxu0 %vm492_vm0, %v7553_v11  ;;  %2627 = vperm.xlu1 %6950, %v2518_v51   ;;  %v5055_v10 = vld [vmem:[%s7325_s9 + $0xc5] sm:$0xff]  ;;  %v5056_v11 = vld [vmem:[%s7325_s9 + $0xcd] sm:$0xff]  ;;  %v5093_v51 = vld [vmem:[%s7325_s9 + $0xd6] sm:$0xf]  ;;  %s4697_s22 = sshll.u32 %s8416_s17, 4  ;;  %s7036_s8 = scalar_lea.vmem %s7035_s16, 4608  ;;  %s8492_s22 = int_to_ptr.vmem [resolvable:$true] %s4697_s22 }
 0x165   : > { %v1971_v13 = vpack.c.bf16 %v5056_v11, %v5055_v10  ;;  %v7757_v11 = vld [vmem:[%s8559_s4 + $0x1] ss:$0 sm:$0xff]  ;;  %s7030_s14 = scalar_lea.vmem %s8492_s22, 2304  ;;  %p7037_p2 = scmp.lt.s32.totalorder %s8492_s22, %s7035_s16 }
 0x166   : > { %p7031_p13 = scmp.ne.s32.totalorder %s8492_s22, %s7030_s14  ;;  %p7038_p4 = scmp.lt.s32.totalorder %s7036_s8, %s7030_s14 }
 0x168   : > { %p7032_p0 = pnand %p7031_p13, %p7213_p3  ;;  %p7039_p5 = por %p7038_p4, %p7037_p2 }
 0x16a   : > { %5856 = vmatmul.mubr.msk.bf16.gmra.mrb[4].mxu0 %vm332_vm1, %v1507_v52  ;;  %v5041_v52 = vld [vmem:[%s7325_s9 + $0x55] sm:$0xff]  ;;  %p7033_p1 = pneg %p7032_p0 }
 0x16b   : > { %5859 = vmatprep.mubr.msk.bf16.mxu0 %vm332_vm1, %v1508_v57  ;;  %v1964_v57 = vpack.c.bf16 %v5042_v53, %v5041_v52  ;;  %v2201_v52 = vpack.c.bf16 %v5093_v51, %v5093_v51  ;;  %v6956_v53 = vld [vmem:[%s8558_s3 + $0x50] sm:$0xff]  }
 0x16c   : > { %p7040_p6 = pnand %p7039_p5, %p7033_p1 }
 0x172   : > { %5860 = vmatmul.mubr.msk.bf16.gmra.mrb[8].mxu0 %vm332_vm1, %v1509_v58  ;;  %v1965_v58 = vpack.c.bf16 %v5044_v55, %v5043_v54  ;;  %v6958_v54 = vld [vmem:[%s8558_s3 + $0x58] sm:$0xff]   ;;  %v6955_v55 = vld [vmem:[%s8558_s3 + $0x10] sm:$0xff]  }
 0x173   : > { %5863 = vmatprep.mubr.msk.bf16.mxu0 %vm332_vm1, %v1510_v63  ;;  %v1966_v63 = vpack.c.bf16 %v5046_v60, %v5045_v59  ;;  %5984 = vmatpush3.bf16.msra.mxu1 %v6955_v55  ;;  %v6959_v59 = vld [vmem:[%s8558_s3 + $0x20] sm:$0xff]   ;;  %v6964_v60 = vld [vmem:[%s8558_s3 + $0x70] sm:$0xff]  }
 0x174   : > { %5985 = vmatprep.subr.bf16.mxu1 %v7127_v32 }
 0x17a   : > { %5864 = vmatmul.mubr.msk.bf16.gmra.mrb[12].mxu0 %vm332_vm1, %v1511_v0  ;;  %v1967_v0 = vpack.c.bf16 %v5048_v62, %v5047_v61  ;;  %v6961_v61 = vld [vmem:[%s8558_s3 + $0x28] sm:$0xff]   ;;  %v6966_v62 = vld [vmem:[%s8558_s3 + $0x78] sm:$0xff]  }
 0x17b   : > { %5867 = vmatprep.mubr.msk.bf16.mxu0 %vm332_vm1, %v1512_v6  ;;  %v1968_v6 = vpack.c.bf16 %v5050_v3, %v5049_v1  ;;  %v2523_v1 = vpop.permute.xlu0 %2522 }
 0x182   : > { %5868 = vmatmul.mubr.msk.bf16.gmra.mrb[16].mxu0 %vm332_vm1, %v1513_v7  ;;  %v1969_v7 = vpack.c.bf16 %v5052_v5, %v5051_v4  ;;  %v2533_v4 = vpop.permute.xlu1 %2532 }
 0x183   : > { %5871 = vmatprep.mubr.msk.bf16.mxu0 %vm332_vm1, %v1742_v26  ;;  %v5078_v26 = vld [vmem:[%s7325_s9 + $0x5e] sm:$0xff] }
 0x184   : > { %v2193_v30 = vpack.c.bf16 %v5078_v26, %v5077_v25 }
 0x18a   : > { %5872 = vmatmul.mubr.msk.bf16.gmra.mrb[20].mxu0 %vm332_vm1, %v1743_v34  ;;  %v5082_v34 = vld [vmem:[%s7325_s9 + $0x7e] sm:$0xff]  ;;  %v2528_v3 = vpop.permute.xlu0 %2527 }
 0x18b   : > { %5877 = vmatprep.mubr.msk.bf16.mxu0 %vm332_vm1, %v1961_v36  ;;  %v5084_v36 = vld [vmem:[%s7325_s9 + $0x8e] sm:$0xff]  ;;  %v2195_v37 = vpack.c.bf16 %v5082_v34, %v5081_v33 }
 0x18c   : > { %v2196_v38 = vpack.c.bf16 %v5084_v36, %v5083_v35 }
 0x18e   : > { %v7745_v5 = vpop.permute.xlu0 %2542 }
 0x192   : > { %5878 = vmatmul.mubr.msk.bf16.vlgmr.msra.gmra.mrb[0].mxu0 %vm332_vm1, %v1962_v46  ;;  %v5090_v46 = vld [vmem:[%s7325_s9 + $0xbe] sm:$0xff]  ;;  %v2553_v8 = vpop.permute.xlu0 %2552 }
 0x193   : > { %5902 = vmatpush3.bf16.msra.mxu0 %v2241_v49  ;;  %5881 = vmatprep.mubr.msk.bf16.mxu0 %vm332_vm1, %v1963_v48  ;;  %v5092_v48 = vld [vmem:[%s7325_s9 + $0xce] sm:$0xff]  ;;  %v2199_v49 = vpack.c.bf16 %v5090_v46, %v5089_v45 }
 0x194   : > { %5927 = vmatprep.subr.bf16.mxu0 %v7127_v32  ;;  %v2200_v50 = vpack.c.bf16 %v5092_v48, %v5091_v47 }
 0x196   : > { %v7765_v21 = vpop.permute.xlu0 %2562 }
 0x19a   : > { %5882 = vmatmul.mubr.msk.bf16.gmra.mrb[4].mxu0 %vm332_vm1, %v1964_v57  ;;  %v6957_v57 = vld [vmem:[%s8558_s3 + $0x18] sm:$0xff]   ;;  %v7773_v40 = vpop.permute.xlu0 %2572 }
 0x19b   : > { %5885 = vmatprep.mubr.msk.bf16.mxu0 %vm332_vm1, %v1965_v58  ;;  %v6962_v58 = vld [vmem:[%s8558_s3 + $0x68] sm:$0xff]   ;;  %5986 = vmatpush3.bf16.msra.mxu1 %v6957_v57 }
 0x19c   : > { %5987 = vmatprep.subr.bf16.mxu1 %v7127_v32 }
 0x19f   : > { %5988 = vmatpush3.bf16.msra.mxu1 %v6959_v59 }
 0x1a0   : > { %5989 = vmatprep.subr.bf16.mxu1 %v7127_v32 }
 0x1a2   : > { %5886 = vmatmul.mubr.msk.bf16.gmra.mrb[8].mxu0 %vm332_vm1, %v1966_v63  ;;  %v6963_v63 = vld [vmem:[%s8558_s3 + $0x30] sm:$0xff]  }
 0x1a3   : > { %5889 = vmatprep.mubr.msk.bf16.mxu0 %vm332_vm1, %v1967_v0  ;;  %5990 = vmatpush3.bf16.msra.mxu1 %v6961_v61  ;;  %v6965_v0 = vld [vmem:[%s8558_s3 + $0x38] sm:$0xff]   ;;  %v7792_v61 = vpop.permute.xlu0 %2582 }
 0x1a4   : > { %5991 = vmatprep.subr.bf16.mxu1 %v7127_v32 }
 0x1a7   : > { %5992 = vmatpush3.bf16.msra.mxu1 %v6963_v63 }
 0x1a8   : > { %5993 = vmatprep.subr.bf16.mxu1 %v7127_v32 }
 0x1aa   : > { %5890 = vmatmul.mubr.msk.bf16.gmra.mrb[12].mxu0 %vm332_vm1, %v1968_v6  ;;  %v2538_v6 = vpop.permute.xlu1 %2537 }
 0x1ab   : > { %5893 = vmatprep.mubr.msk.bf16.mxu0 %vm332_vm1, %v1969_v7  ;;  %5994 = vmatpush3.bf16.msra.mxu1 %v6965_v0  ;;  %v7750_v7 = vld [vmem:[%s8559_s4] ss:$0 sm:$0xff] }
 0x1ac   : > { %6031 = vmatprep.subr.bf16.mxu1 %v7127_v32 }
 0x1ae   : > { %v7752_v9 = vpop.permute.xlu1 %2547 }
 0x1b2   : > { %5894 = vmatmul.mubr.msk.bf16.gmra.mrb[16].mxu0 %vm332_vm1, %v1970_v12 }
 0x1b3   : > { %5897 = vmatprep.mubr.msk.bf16.mxu0 %vm332_vm1, %v1971_v13 }
 0x1ba   : > { %5898 = vmatmul.mubr.msk.bf16.gmra.mrb[20].mxu0 %vm332_vm1, %v1972_v17 }
 0x1bb   : > { %5903 = vmatprep.mubr.msk.bf16.mxu0 %vm332_vm1, %v2190_v18 }
 0x1c2   : > { %5904 = vmatmul.mubr.msk.bf16.vlgmr.msra.gmra.mrb[0].mxu0 %vm332_vm1, %v2191_v2 }
 0x1c3   : > { %5907 = vmatprep.mubr.msk.bf16.mxu0 %vm332_vm1, %v2192_v23  ;;  %5928 = vmatpush3.bf16.msra.mxu0 %v6952_v24  ;;  %v2558_v23 = vpop.permute.xlu1 %2557 }
 0x1c4   : > { %5929 = vmatprep.subr.bf16.mxu0 %v7127_v32 }
 0x1c7   : > { %5930 = vmatpush3.bf16.msra.mxu0 %v6954_v27  ;;  %v7780_v45 = vpop.permute.xlu1 %2567 }
 0x1c8   : > { %5931 = vmatprep.subr.bf16.mxu0 %v7127_v32 }
 0x1ca   : > { %5908 = vmatmul.mubr.msk.bf16.gmra.mrb[4].mxu0 %vm332_vm1, %v2193_v30 }
 0x1cb   : > { %5911 = vmatprep.mubr.msk.bf16.mxu0 %vm332_vm1, %v2194_v31  ;;  %5932 = vmatpush3.bf16.msra.mxu0 %v6956_v53 }
 0x1cc   : > { %5933 = vmatprep.subr.bf16.mxu0 %v7127_v32 }
 0x1cf   : > { %5934 = vmatpush3.bf16.msra.mxu0 %v6958_v54 }
 0x1d0   : > { %5935 = vmatprep.subr.bf16.mxu0 %v7127_v32 }
 0x1d2   : > { %5912 = vmatmul.mubr.msk.bf16.gmra.mrb[8].mxu0 %vm332_vm1, %v2195_v37 }
 0x1d3   : > { %5915 = vmatprep.mubr.msk.bf16.mxu0 %vm332_vm1, %v2196_v38  ;;  %5936 = vmatpush3.bf16.msra.mxu0 %v6960_v56 }
 0x1d4   : > { %5937 = vmatprep.subr.bf16.mxu0 %v7127_v32 }
 0x1d7   : > { %5938 = vmatpush3.bf16.msra.mxu0 %v6962_v58 }
 0x1d8   : > { %5939 = vmatprep.subr.bf16.mxu0 %v7127_v32 }
 0x1da   : > { %5916 = vmatmul.mubr.msk.bf16.gmra.mrb[12].mxu0 %vm332_vm1, %v2197_v43 }
 0x1db   : > { %5919 = vmatprep.mubr.msk.bf16.mxu0 %vm332_vm1, %v2198_v44  ;;  %5940 = vmatpush3.bf16.msra.mxu0 %v6964_v60 }
 0x1dc   : > { %5941 = vmatprep.subr.bf16.mxu0 %v7127_v32 }
 0x1df   : > { %5942 = vmatpush3.bf16.msra.mxu0 %v6966_v62 }
 0x1e0   : > { %6343 = vmatprep.subr.bf16.mxu0 %v7127_v32 }
 0x1e2   : > { %5920 = vmatmul.mubr.msk.bf16.gmra.mrb[16].mxu0 %vm332_vm1, %v2199_v49 }
 0x1e3   : > { %5923 = vmatprep.mubr.msk.bf16.mxu0 %vm332_vm1, %v2200_v50 }
 0x1ea   : > { %5924 = vmatmul.mubr.msk.bf16.gmra.mrb[20].mxu0 %vm332_vm1, %v2201_v52  ;;  %v6972_v52 = vld [vmem:[%s8558_s3 + $0x200] sm:$0xff]  }
 0x1eb   : > { %5943 = vmatprep.mubr.msk.bf16.mxu0 %vm7128_vm3, %v7127_v32 }
 0x295   : > { %v5905_v10 = vpop.f32.mrb[0].mxu0 }
 0x296   : > { %v2401_v12 = vmul.f32 %v5905_v10, %v7750_v7  ;;  %v2277_v13 = vpop.f32.mrb[1].mxu0 }
 0x297   : > { %v2399_v14 = vmul.f32 %v7750_v7, %v2277_v13  ;;  %v5906_v15 = vpop.f32.mrb[2].mxu0 }
 0x298   : > { %v2429_v16 = vadd.f32 %v7757_v11, %v2401_v12  ;;  %v2402_v17 = vmul.f32 %v5906_v15, %v7750_v7  ;;  %v2280_v18 = vpop.f32.mrb[3].mxu0 }
 0x299   : > { %v2427_v19 = vadd.f32 %v7757_v11, %v2399_v14  ;;  %v2400_v20 = vmul.f32 %v7750_v7, %v2280_v18 }
 0x29a   : > { %v2452_v22 = vmul.f32 0.01, %v2429_v16  ;;  %v2430_v2 = vadd.f32 %v7757_v11, %v2402_v17 }
 0x29b   : > { %v2450_v24 = vmul.f32 0.01, %v2427_v19  ;;  %v2428_v25 = vadd.f32 %v7757_v11, %v2400_v20 }
 0x29c   : > { %v2475_v26 = vmax.f32 %v2429_v16, %v2452_v22  ;;  %v2453_v27 = vmul.f32 0.01, %v2430_v2 }
 0x29d   : > { %v2473_v28 = vmax.f32 %v2427_v19, %v2450_v24  ;;  %v2451_v29 = vmul.f32 0.01, %v2428_v25  ;;  %v5909_v30 = vpop.f32.mrb[4].mxu0 }
 0x29e   : > { %v7769_v31 = vmul.f32 %v2533_v4, %v2475_v26  ;;  %v2476_v33 = vmax.f32 %v2430_v2, %v2453_v27  ;;  %v2405_v34 = vmul.f32 %v5909_v30, %v7750_v7  ;;  %v2293_v35 = vpop.f32.mrb[5].mxu0  ;;  %v2578_v4 = vpop.permute.xlu1 %2577 }
 0x29f   : > { %v2635_v36 = vmul.f32 %v2523_v1, %v2473_v28  ;;  %v2474_v37 = vmax.f32 %v2428_v25, %v2451_v29  ;;  %v2403_v38 = vmul.f32 %v7750_v7, %v2293_v35  ;;  %v5910_v39 = vpop.f32.mrb[6].mxu0  ;;  %v2593_v27 = vpop.permute.xlu0 %2592 }
 0x2a0   : > { %2662 = vst [vmem:[#allocation3 + $0x18] sm:$0xff] %v7769_v31  ;;  %v7776_v41 = vmul.f32 %v2538_v6, %v2476_v33  ;;  %v2433_v42 = vadd.f32 %v7757_v11, %v2405_v34  ;;  %v2406_v43 = vmul.f32 %v5910_v39, %v7750_v7  ;;  %v2296_v44 = vpop.f32.mrb[7].mxu0 }
 0x2a1   : > { %2660 = vst [vmem:[#allocation3 + $0x8] sm:$0xff] %v2635_v36  ;;  %v2636_v46 = vmul.f32 %v2528_v3, %v2474_v37  ;;  %v2431_v47 = vadd.f32 %v7757_v11, %v2403_v38  ;;  %v2404_v48 = vmul.f32 %v7750_v7, %v2296_v44  ;;  %v6974_v3 = vld [vmem:[%s8558_s3 + $0x208] sm:$0xff]  }
 0x2a2   : > { %2663 = vst [vmem:[#allocation3 + $0x20] sm:$0xff] %v7776_v41  ;;  %v2456_v49 = vmul.f32 0.01, %v2433_v42  ;;  %v2434_v50 = vadd.f32 %v7757_v11, %v2406_v43  ;;  %v2745_v51 = vpack.c.bf16 %v7776_v41, %v7769_v31  ;;  %v6975_v31 = vld [vmem:[%s8558_s3 + $0x210] sm:$0xff]   ;;  %v7833_v33 = vpop.permute.xlu1 %2587 }
 0x2a3   : > { %2661 = vst [vmem:[#allocation3 + $0x10] sm:$0xff] %v2636_v46  ;;  %v2454_v53 = vmul.f32 0.01, %v2431_v47  ;;  %v2432_v54 = vadd.f32 %v7757_v11, %v2404_v48  ;;  %v2744_v55 = vpack.c.bf16 %v2636_v46, %v2635_v36 }
 0x2a4   : > { %v2479_v56 = vmax.f32 %v2433_v42, %v2456_v49  ;;  %v2457_v57 = vmul.f32 0.01, %v2434_v50  ;;  %v6968_v42 = vld [vmem:[%s8558_s3 + $0x88] sm:$0xff]  }
 0x2a5   : > { %v2477_v58 = vmax.f32 %v2431_v47, %v2454_v53  ;;  %v2455_v59 = vmul.f32 0.01, %v2432_v54  ;;  %v5913_v60 = vpop.f32.mrb[8].mxu0  ;;  %5944 = vmatmul.mubr.bf16.vlgmr.msra.gmra.mrb[24].mxu0 %v2744_v55 }
 0x2a6   : > { %v7794_v62 = vmul.f32 %v2553_v8, %v2479_v56  ;;  %v2480_v63 = vmax.f32 %v2434_v50, %v2457_v57  ;;  %v2409_v0 = vmul.f32 %v5913_v60, %v7750_v7  ;;  %v2309_v1 = vpop.f32.mrb[9].mxu0  ;;  %5947 = vmatprep.mubr.msk.bf16.mxu0 %vm7128_vm3, %v7127_v32  ;;  %6344 = vmatpush3.bf16.msra.mxu0 %v6972_v52  ;;  %v6976_v52 = vld [vmem:[%s8558_s3 + $0x218] sm:$0xff]   ;;  %v7866_v56 = vpop.permute.xlu0 %2602 }
 0x2a7   : > { %v7803_v6 = vmul.f32 %v7745_v5, %v2477_v58  ;;  %v2478_v10 = vmax.f32 %v2432_v54, %v2455_v59  ;;  %v2407_v8 = vmul.f32 %v7750_v7, %v2309_v1  ;;  %v5914_v12 = vpop.f32.mrb[10].mxu0  ;;  %6345 = vmatprep.subr.bf16.mxu0 %v7127_v32  ;;  %v6969_v59 = vld [vmem:[%s8558_s3 + $0x90] sm:$0xff]   ;;  %v2598_v60 = vpop.permute.xlu1 %2597 }
 0x2a8   : > { %2666 = vst [vmem:[#allocation3 + $0x38] sm:$0xff] %v7794_v62  ;;  %v7808_v13 = vmul.f32 %v2558_v23, %v2480_v63  ;;  %v2437_v14 = vadd.f32 %v7757_v11, %v2409_v0  ;;  %v2410_v15 = vmul.f32 %v5914_v12, %v7750_v7  ;;  %v2312_v16 = vpop.f32.mrb[11].mxu0  ;;  %v2683_v22 = vld [vmem:[#allocation3 + $0x7] sm:$0xff]  ;;  %v6967_v23 = vld [vmem:[%s8558_s3 + $0x80] sm:$0xff]  }
 0x2a9   : > { %2664 = vst [vmem:[#allocation3 + $0x28] sm:$0xff] %v7803_v6  ;;  %v7814_v5 = vmul.f32 %v7752_v9, %v2478_v10  ;;  %v2435_v17 = vadd.f32 %v7757_v11, %v2407_v8  ;;  %v2408_v18 = vmul.f32 %v7750_v7, %v2312_v16 }
 0x2aa   : > { %2667 = vst [vmem:[#allocation3 + $0x40] sm:$0xff] %v7808_v13  ;;  %v2460_v19 = vmul.f32 0.01, %v2437_v14  ;;  %v2438_v20 = vadd.f32 %v7757_v11, %v2410_v15  ;;  %v2684_v2 = vld [vmem:[#allocation3 + $0xf] sm:$0xff]  ;;  %v2747_v24 = vpack.c.bf16 %v7808_v13, %v7794_v62  ;;  %6346 = vmatpush3.bf16.msra.mxu0 %v6974_v3 }
 0x2ab   : > { %2665 = vst [vmem:[#allocation3 + $0x30] sm:$0xff] %v7814_v5  ;;  %v2458_v9 = vmul.f32 0.01, %v2435_v17  ;;  %v2436_v25 = vadd.f32 %v7757_v11, %v2408_v18  ;;  %v2701_v26 = vpack.c.bf16 %v2684_v2, %v2683_v22  ;;  %6347 = vmatprep.subr.bf16.mxu0 %v7127_v32  ;;  %v2746_v30 = vpack.c.bf16 %v7814_v5, %v7803_v6  ;;  %v6970_v18 = vld [vmem:[%s8558_s3 + $0x98] sm:$0xff]  }
 0x2ac   : > { %v2483_v28 = vmax.f32 %v2437_v14, %v2460_v19  ;;  %v2461_v29 = vmul.f32 0.01, %v2438_v20  ;;  %v6978_v14 = vld [vmem:[%s8558_s3 + $0x220] sm:$0xff]  }
 0x2ad   : > { %v2481_v34 = vmax.f32 %v2435_v17, %v2458_v9  ;;  %v2459_v35 = vmul.f32 0.01, %v2436_v25  ;;  %v5917_v36 = vpop.f32.mrb[12].mxu0  ;;  %5996 = vmatmul.mubr.bf16.vlgmr.msra.gmra.mrb[0].mxu1 %v2701_v26  ;;  %5948 = vmatmul.mubr.bf16.gmra.mrb[28].mxu0 %v2745_v51  ;;  %v2686_v51 = vld [vmem:[#allocation3 + $0x1f] sm:$0xff] }
 0x2ae   : > { %v7836_v37 = vmul.f32 %v7773_v40, %v2483_v28  ;;  %v2484_v38 = vmax.f32 %v2438_v20, %v2461_v29  ;;  %v2413_v39 = vmul.f32 %v5917_v36, %v7750_v7  ;;  %6032 = vmatpush3.bf16.msra.mxu1 %v6967_v23  ;;  %v2325_v41 = vpop.f32.mrb[13].mxu0  ;;  %5999 = vmatprep.mubr.msk.bf16.mxu1 %vm7128_vm3, %v7127_v32  ;;  %v2613_v23 = vpop.permute.xlu0 %2612 }
 0x2af   : > { %v7845_v43 = vmul.f32 %v7765_v21, %v2481_v34  ;;  %v2482_v44 = vmax.f32 %v2436_v25, %v2459_v35  ;;  %v2411_v46 = vmul.f32 %v7750_v7, %v2325_v41  ;;  %v5918_v40 = vpop.f32.mrb[14].mxu0  ;;  %6033 = vmatprep.subr.bf16.mxu1 %v7127_v32  ;;  %5951 = vmatprep.mubr.msk.bf16.mxu0 %vm7128_vm3, %v7127_v32  ;;  %v2685_v21 = vld [vmem:[#allocation3 + $0x17] sm:$0xff]  ;;  %v2608_v28 = vpop.permute.xlu1 %2607 }
 0x2b0   : > { %2670 = vst [vmem:[#allocation3 + $0x58] sm:$0xff] %v7836_v37  ;;  %v7852_v47 = vmul.f32 %v2578_v4, %v2484_v38  ;;  %v2441_v48 = vadd.f32 %v7757_v11, %v2413_v39  ;;  %v2414_v49 = vmul.f32 %v5918_v40, %v7750_v7  ;;  %v2328_v50 = vpop.f32.mrb[15].mxu0  ;;  %6348 = vmatpush3.bf16.msra.mxu0 %v6975_v31  ;;  %v2687_v36 = vld [vmem:[#allocation3 + $0x27] sm:$0xff] }
 0x2b1   : > { %2668 = vst [vmem:[#allocation3 + $0x48] sm:$0xff] %v7845_v43  ;;  %v7861_v53 = vmul.f32 %v7780_v45, %v2482_v44  ;;  %v2439_v54 = vadd.f32 %v7757_v11, %v2411_v46  ;;  %v2412_v55 = vmul.f32 %v7750_v7, %v2328_v50  ;;  %6349 = vmatprep.subr.bf16.mxu0 %v7127_v32  ;;  %v6979_v44 = vld [vmem:[%s8558_s3 + $0x228] sm:$0xff]  }
 0x2b2   : > { %2671 = vst [vmem:[#allocation3 + $0x60] sm:$0xff] %v7852_v47  ;;  %v2464_v57 = vmul.f32 0.01, %v2441_v48  ;;  %v2442_v58 = vadd.f32 %v7757_v11, %v2414_v49  ;;  %6034 = vmatpush3.bf16.msra.mxu1 %v6968_v42  ;;  %v2749_v45 = vpack.c.bf16 %v7852_v47, %v7836_v37  ;;  %v2702_v1 = vpack.c.bf16 %v2686_v51, %v2685_v21  ;;  %v6971_v42 = vld [vmem:[%s8558_s3 + $0xa0] sm:$0xff]   ;;  %v2623_v51 = vpop.permute.xlu0 %2622 }
 0x2b3   : > { %2669 = vst [vmem:[#allocation3 + $0x50] sm:$0xff] %v7861_v53  ;;  %v2462_v63 = vmul.f32 0.01, %v2439_v54  ;;  %v2440_v0 = vadd.f32 %v7757_v11, %v2412_v55  ;;  %6035 = vmatprep.subr.bf16.mxu1 %v7127_v32  ;;  %v2748_v6 = vpack.c.bf16 %v7861_v53, %v7845_v43 }
 0x2b4   : > { %v2487_v3 = vmax.f32 %v2441_v48, %v2464_v57  ;;  %v2465_v4 = vmul.f32 0.01, %v2442_v58  ;;  %6350 = vmatpush3.bf16.msra.mxu0 %v6976_v52 }
 0x2b5   : > { %v2485_v10 = vmax.f32 %v2439_v54, %v2462_v63  ;;  %v2463_v8 = vmul.f32 0.01, %v2440_v0  ;;  %v5921_v12 = vpop.f32.mrb[16].mxu0  ;;  %6000 = vmatmul.mubr.bf16.gmra.mrb[4].mxu1 %v2702_v1  ;;  %5952 = vmatmul.mubr.bf16.gmra.mrb[32].mxu0 %v2746_v30  ;;  %v7944_v63 = vld [vmem:[%s8558_s3 + $0x230] sm:$0xff]  }
 0x2b6   : > { %v7883_v15 = vmul.f32 %v2593_v27, %v2487_v3  ;;  %v2488_v16 = vmax.f32 %v2442_v58, %v2465_v4  ;;  %v2417_v5 = vmul.f32 %v5921_v12, %v7750_v7  ;;  %v2341_v17 = vpop.f32.mrb[17].mxu0  ;;  %6003 = vmatprep.mubr.msk.bf16.mxu1 %vm7128_vm3, %v7127_v32  ;;  %6036 = vmatpush3.bf16.msra.mxu1 %v6969_v59  ;;  %v2688_v27 = vld [vmem:[#allocation3 + $0x2f] sm:$0xff]  ;;  %v2618_v58 = vpop.permute.xlu1 %2617  ;;  %v2689_v3 = vld [vmem:[#allocation3 + $0x37] sm:$0xff]  ;;  %v2690_v4 = vld [vmem:[#allocation3 + $0x3f] sm:$0xff] }
 0x2b7   : > { %v7892_v19 = vmul.f32 %v7792_v61, %v2485_v10  ;;  %v2486_v20 = vmax.f32 %v2440_v0, %v2463_v8  ;;  %v2415_v22 = vmul.f32 %v7750_v7, %v2341_v17  ;;  %v5922_v2 = vpop.f32.mrb[18].mxu0  ;;  %5955 = vmatprep.mubr.msk.bf16.mxu0 %vm7128_vm3, %v7127_v32  ;;  %6037 = vmatprep.subr.bf16.mxu1 %v7127_v32 }
 0x2b8   : > { %2674 = vst [vmem:[#allocation3 + $0x78] sm:$0xff] %v7883_v15  ;;  %v7899_v9 = vmul.f32 %v2598_v60, %v2488_v16  ;;  %v2445_v25 = vadd.f32 %v7757_v11, %v2417_v5  ;;  %v2418_v26 = vmul.f32 %v5922_v2, %v7750_v7  ;;  %v2344_v61 = vpop.f32.mrb[19].mxu0  ;;  %6351 = vmatprep.subr.bf16.mxu0 %v7127_v32 }
 0x2b9   : > { %2672 = vst [vmem:[#allocation3 + $0x68] sm:$0xff] %v7892_v19  ;;  %v7906_v29 = vmul.f32 %v7833_v33, %v2486_v20  ;;  %v2443_v30 = vadd.f32 %v7757_v11, %v2415_v22  ;;  %v2416_v31 = vmul.f32 %v7750_v7, %v2344_v61  ;;  %6352 = vmatpush3.bf16.msra.mxu0 %v6978_v14  ;;  %v7963_v20 = vld [vmem:[%s8558_s3 + $0x238] sm:$0xff]  }
 0x2ba   : > { %2675 = vst [vmem:[#allocation3 + $0x80] sm:$0xff] %v7899_v9  ;;  %v2468_v34 = vmul.f32 0.01, %v2445_v25  ;;  %v2446_v35 = vadd.f32 %v7757_v11, %v2418_v26  ;;  %6038 = vmatpush3.bf16.msra.mxu1 %v6970_v18  ;;  %v2751_v38 = vpack.c.bf16 %v7899_v9, %v7883_v15  ;;  %6353 = vmatprep.subr.bf16.mxu0 %v7127_v32  ;;  %v6977_v18 = vld [vmem:[%s8558_s3 + $0xb0] sm:$0xff]   ;;  %v2692_v43 = vld [vmem:[#allocation3 + $0x4f] sm:$0xff] }
 0x2bb   : > { %2673 = vst [vmem:[#allocation3 + $0x70] sm:$0xff] %v7906_v29  ;;  %v2466_v33 = vmul.f32 0.01, %v2443_v30  ;;  %v2444_v39 = vadd.f32 %v7757_v11, %v2416_v31  ;;  %v2703_v41 = vpack.c.bf16 %v2688_v27, %v2687_v36  ;;  %6039 = vmatprep.subr.bf16.mxu1 %v7127_v32  ;;  %v2750_v48 = vpack.c.bf16 %v7906_v29, %v7892_v19  ;;  %v6980_v27 = vld [vmem:[%s8558_s3 + $0xb8] sm:$0xff]   ;;  %v2693_v31 = vld [vmem:[#allocation3 + $0x57] sm:$0xff] }
 0x2bc   : > { %v2491_v46 = vmax.f32 %v2445_v25, %v2468_v34  ;;  %v2469_v40 = vmul.f32 0.01, %v2446_v35  ;;  %v2704_v17 = vpack.c.bf16 %v2690_v4, %v2689_v3  ;;  %v2694_v34 = vld [vmem:[#allocation3 + $0x5f] sm:$0xff]  ;;  %v4366_v15 = vld [vmem:[#allocation3 + $0x2d] sm:$0xff]  ;;  %v4367_v9 = vld [vmem:[#allocation3 + $0x35] sm:$0xff] }
 0x2bd   : > { %v2489_v49 = vmax.f32 %v2443_v30, %v2466_v33  ;;  %v2467_v50 = vmul.f32 0.01, %v2444_v39  ;;  %v5925_v21 = vpop.f32.mrb[20].mxu0  ;;  %6004 = vmatmul.mubr.bf16.gmra.mrb[8].mxu1 %v2703_v41  ;;  %5956 = vmatmul.mubr.bf16.gmra.mrb[36].mxu0 %v2747_v24  ;;  %v6973_v24 = vld [vmem:[%s8558_s3 + $0xa8] sm:$0xff]   ;;  %v4384_v41 = vpack.c.bf16 %v4367_v9, %v4366_v15  ;;  %v8039_v3 = vld [vmem:[#allocation3] sm:$0xff]  ;;  %v6987_v4 = vld [vmem:[%s8558_s3 + $0xe0] sm:$0xff]  }
 0x2be   : > { %v2653_v52 = vmul.f32 %v2613_v23, %v2491_v46  ;;  %v2492_v54 = vmax.f32 %v2446_v35, %v2469_v40  ;;  %v2421_v55 = vmul.f32 %v5925_v21, %v7750_v7  ;;  %v2357_v57 = vpop.f32.mrb[21].mxu0  ;;  %6007 = vmatprep.mubr.msk.bf16.mxu1 %vm7128_vm3, %v7127_v32  ;;  %5959 = vmatprep.mubr.msk.bf16.mxu0 %vm7128_vm3, %v7127_v32  ;;  %v4369_v46 = vld [vmem:[#allocation3 + $0x45] sm:$0xff]  ;;  %v6983_v40 = vld [vmem:[%s8558_s3 + $0xc0] sm:$0xff]   ;;  %v6984_v21 = vld [vmem:[%s8558_s3 + $0xc8] sm:$0xff]  }
 0x2bf   : > { %v7935_v59 = vmul.f32 %v7866_v56, %v2489_v49  ;;  %v2490_v60 = vmax.f32 %v2444_v39, %v2467_v50  ;;  %v2419_v62 = vmul.f32 %v7750_v7, %v2357_v57  ;;  %v5926_v13 = vpop.f32.mrb[22].mxu0  ;;  %6040 = vmatpush3.bf16.msra.mxu1 %v6971_v42  ;;  %6354 = vmatpush3.bf16.msra.mxu0 %v6979_v44  ;;  %v3076_v42 = vld [vmem:[#allocation3 + $0x9] sm:$0xff]  ;;  %v3077_v44 = vld [vmem:[#allocation3 + $0x11] sm:$0xff]  ;;  %v6985_v57 = vld [vmem:[%s8558_s3 + $0xd0] sm:$0xff]  }
 0x2c0   : > { %2678 = vst [vmem:[#allocation3 + $0x98] sm:$0xff] %v2653_v52  ;;  %v2654_v0 = vmul.f32 %v2618_v58, %v2492_v54  ;;  %v2449_v56 = vadd.f32 %v7757_v11, %v2421_v55  ;;  %v2360_v1 = vpop.f32.mrb[23].mxu0  ;;  %6041 = vmatprep.subr.bf16.mxu1 %v7127_v32  ;;  %6355 = vmatprep.subr.bf16.mxu0 %v7127_v32  ;;  %v2695_v47 = vld [vmem:[#allocation3 + $0x67] sm:$0xff]  ;;  %v4371_v54 = vld [vmem:[#allocation3 + $0x55] sm:$0xff] }
 0x2c1   : > { %2676 = vst [vmem:[#allocation3 + $0x88] sm:$0xff] %v7935_v59  ;;  %v7950_v10 = vmul.f32 %v2608_v28, %v2490_v60  ;;  %v2447_v8 = vadd.f32 %v7757_v11, %v2419_v62  ;;  %v2420_v12 = vmul.f32 %v7750_v7, %v2360_v1  ;;  %v2628_v28 = vpop.permute.xlu1 %2627  ;;  %v2706_v35 = vpack.c.bf16 %v2694_v34, %v2693_v31  ;;  %v2698_v29 = vld [vmem:[#allocation3 + $0x7f] sm:$0xff]  ;;  %v4370_v52 = vld [vmem:[#allocation3 + $0x4d] sm:$0xff] }
 0x2c2   : > { %2679 = vst [vmem:[#allocation3 + $0xa0] sm:$0xff] %v2654_v0  ;;  %v2472_v14 = vmul.f32 0.01, %v2449_v56  ;;  %v2696_v37 = vld [vmem:[#allocation3 + $0x6f] sm:$0xff]  ;;  %v2697_v19 = vld [vmem:[#allocation3 + $0x77] sm:$0xff]  ;;  %v3094_v49 = vpack.c.bf16 %v3077_v44, %v3076_v42  ;;  %v6997_v15 = vld [vmem:[%s8558_s3 + $0x130] sm:$0xff]  }
 0x2c3   : > { %2677 = vst [vmem:[#allocation3 + $0x90] sm:$0xff] %v7950_v10  ;;  %v2470_v16 = vmul.f32 0.01, %v2447_v8  ;;  %v2448_v5 = vadd.f32 %v7757_v11, %v2420_v12  ;;  %6042 = vmatpush3.bf16.msra.mxu1 %v6973_v24  ;;  %6356 = vmatpush3.bf16.msra.mxu0 %v7944_v63  ;;  %v2752_v22 = vpack.c.bf16 %v7950_v10, %v7935_v59  ;;  %v2633_v11 = vpop.permute.xlu0 %2632  ;;  %v3078_v55 = vld [vmem:[#allocation3 + $0x19] sm:$0xff]  ;;  %v6986_v60 = vld [vmem:[%s8558_s3 + $0xd8] sm:$0xff]   ;;  %v3081_v13 = vld [vmem:[#allocation3 + $0x31] sm:$0xff] }
 0x2c4   : > { %v2495_v7 = vmax.f32 %v2449_v56, %v2472_v14  ;;  %6043 = vmatprep.subr.bf16.mxu1 %v7127_v32  ;;  %6357 = vmatprep.subr.bf16.mxu0 %v7127_v32  ;;  %v2708_v36 = vpack.c.bf16 %v2698_v29, %v2697_v19  ;;  %v4386_v59 = vpack.c.bf16 %v4371_v54, %v4370_v52  ;;  %v3080_v62 = vld [vmem:[#allocation3 + $0x29] sm:$0xff]  ;;  %v4372_v0 = vld [vmem:[#allocation3 + $0x5d] sm:$0xff]  ;;  %v4375_v12 = vld [vmem:[#allocation3 + $0x75] sm:$0xff] }
 0x2c5   : > { %v2493_v2 = vmax.f32 %v2447_v8, %v2470_v16  ;;  %v2471_v23 = vmul.f32 0.01, %v2448_v5  ;;  %6008 = vmatmul.mubr.bf16.gmra.mrb[12].mxu1 %v2704_v17  ;;  %5960 = vmatmul.mubr.bf16.gmra.mrb[40].mxu0 %v2748_v6  ;;  %v2691_v6 = vld [vmem:[#allocation3 + $0x47] sm:$0xff]  ;;  %v8037_v56 = vpack.c.bf16 %v3081_v13, %v3080_v62  ;;  %v3082_v14 = vld [vmem:[#allocation3 + $0x39] sm:$0xff] }
 0x2c6   : > { %v2657_v25 = vmul.f32 %v2633_v11, %v2495_v7  ;;  %6011 = vmatprep.mubr.msk.bf16.mxu1 %vm7128_vm3, %v7127_v32  ;;  %5963 = vmatprep.mubr.msk.bf16.mxu0 %vm7128_vm3, %v7127_v32  ;;  %v2705_v30 = vpack.c.bf16 %v2692_v43, %v2691_v6  ;;  %v4373_v24 = vld [vmem:[#allocation3 + $0x65] sm:$0xff]  ;;  %v4374_v8 = vld [vmem:[#allocation3 + $0x6d] sm:$0xff] }
 0x2c7   : > { %v2655_v26 = vmul.f32 %v2623_v51, %v2493_v2  ;;  %v2494_v61 = vmax.f32 %v2448_v5, %v2471_v23  ;;  %6044 = vmatpush3.bf16.msra.mxu1 %v6977_v18  ;;  %6358 = vmatpush3.bf16.msra.mxu0 %v7963_v20  ;;  %v3079_v51 = vld [vmem:[#allocation3 + $0x21] sm:$0xff]  ;;  %v4387_v1 = vpack.c.bf16 %v4373_v24, %v4372_v0  ;;  %v3084_v7 = vld [vmem:[#allocation3 + $0x49] sm:$0xff]  ;;  %v3089_v43 = vld [vmem:[#allocation3 + $0x71] sm:$0xff] }
 0x2c8   : > { %2682 = vst [vmem:[#allocation3 + $0xb8] sm:$0xf] %v2657_v25  ;;  %6045 = vmatprep.subr.bf16.mxu1 %v7127_v32  ;;  %v8025_v58 = vpack.c.bf16 %v3079_v51, %v3078_v55  ;;  %v3083_v10 = vld [vmem:[#allocation3 + $0x41] sm:$0xff]  ;;  %v4388_v5 = vpack.c.bf16 %v4375_v12, %v4374_v8  ;;  %v6999_v51 = vld [vmem:[%s8558_s3 + $0x140] sm:$0xff]  }
 0x2c9   : > { %2680 = vst [vmem:[#allocation3 + $0xa8] sm:$0xff] %v2655_v26  ;;  %v2656_v53 = vmul.f32 %v2628_v28, %v2494_v61  ;;  %v3097_v16 = vpack.c.bf16 %v3083_v10, %v3082_v14  ;;  %v6989_v17 = vld [vmem:[%s8558_s3 + $0xf0] sm:$0xff]   ;;  %v6990_v18 = vld [vmem:[%s8558_s3 + $0xf8] sm:$0xff]   ;;  %v7003_v14 = vld [vmem:[%s8558_s3 + $0x160] sm:$0xff]  }
 0x2ca   : > { %v2700_v33 = vld [vmem:[#allocation3 + $0x8f] sm:$0xff]  ;;  %v4377_v11 = vld [vmem:[#allocation3 + $0x85] sm:$0xff]  ;;  %v4376_v2 = vld [vmem:[#allocation3 + $0x7d] sm:$0xff] }
 0x2cb   : > { %2681 = vst [vmem:[#allocation3 + $0xb0] sm:$0xff] %v2656_v53  ;;  %6046 = vmatpush3.bf16.msra.mxu1 %v6980_v27  ;;  %v4389_v25 = vpack.c.bf16 %v4377_v11, %v4376_v2  ;;  %v3087_v26 = vld [vmem:[#allocation3 + $0x61] sm:$0xff]  ;;  %v3086_v61 = vld [vmem:[#allocation3 + $0x59] sm:$0xff]  ;;  %v3088_v28 = vld [vmem:[#allocation3 + $0x69] sm:$0xff] }
 0x2cc   : > { %6083 = vmatprep.subr.bf16.mxu1 %v7127_v32  ;;  %v3099_v27 = vpack.c.bf16 %v3087_v26, %v3086_v61  ;;  %v3100_v53 = vpack.c.bf16 %v3089_v43, %v3088_v28  ;;  %v3091_v6 = vld [vmem:[#allocation3 + $0x81] sm:$0xff]  ;;  %v3092_v34 = vld [vmem:[#allocation3 + $0x89] sm:$0xff]  ;;  %v3307_v42 = vld [vmem:[#allocation3 + $0x99] sm:$0xff] }
 0x2cd   : > { %6012 = vmatmul.mubr.bf16.gmra.mrb[16].mxu1 %v2705_v30  ;;  %5964 = vmatmul.mubr.bf16.gmra.mrb[44].mxu0 %v2749_v45  ;;  %v2707_v45 = vpack.c.bf16 %v2696_v37, %v2695_v47  ;;  %v3090_v30 = vld [vmem:[#allocation3 + $0x79] sm:$0xff]  ;;  %v6991_v47 = vld [vmem:[%s8558_s3 + $0x100] sm:$0xff]   ;;  %v6994_v29 = vld [vmem:[%s8558_s3 + $0x118] sm:$0xff]  }
 0x2ce   : > { %6015 = vmatprep.mubr.msk.bf16.mxu1 %vm7128_vm3, %v7127_v32  ;;  %5967 = vmatprep.mubr.msk.bf16.mxu0 %vm7128_vm3, %v7127_v32  ;;  %v3101_v31 = vpack.c.bf16 %v3091_v6, %v3090_v30  ;;  %v6993_v19 = vld [vmem:[%s8558_s3 + $0x110] sm:$0xff]   ;;  %v6998_v9 = vld [vmem:[%s8558_s3 + $0x138] sm:$0xff]  }
 0x2cf   : > { %v7001_v24 = vld [vmem:[%s8558_s3 + $0x150] sm:$0xff]   ;;  %v7006_v61 = vld [vmem:[%s8558_s3 + $0x178] sm:$0xff]  }
 0x2d0   : > { %v3510_v8 = vld [vmem:[#allocation3 + $0x3a] sm:$0xff] }
 0x2d5   : > { %6016 = vmatmul.mubr.bf16.gmra.mrb[20].mxu1 %v2706_v35  ;;  %5968 = vmatmul.mubr.bf16.gmra.mrb[48].mxu0 %v2750_v48  ;;  %v4368_v48 = vld [vmem:[#allocation3 + $0x3d] sm:$0xff]  ;;  %v3093_v35 = vld [vmem:[#allocation3 + $0x91] sm:$0xff] }
 0x2d6   : > { %6019 = vmatprep.mubr.msk.bf16.mxu1 %vm7128_vm3, %v7127_v32  ;;  %5971 = vmatprep.mubr.msk.bf16.mxu0 %vm7128_vm3, %v7127_v32  ;;  %v4385_v50 = vpack.c.bf16 %v4369_v46, %v4368_v48  ;;  %v3102_v37 = vpack.c.bf16 %v3093_v35, %v3092_v34  ;;  %v3507_v48 = vld [vmem:[#allocation3 + $0x22] sm:$0xff]  ;;  %v3516_v34 = vld [vmem:[#allocation3 + $0x6a] sm:$0xff]  ;;  %v3517_v35 = vld [vmem:[#allocation3 + $0x72] sm:$0xff] }
 0x2dd   : > { %6020 = vmatmul.mubr.bf16.gmra.mrb[24].mxu1 %v2707_v45  ;;  %5972 = vmatmul.mubr.bf16.gmra.mrb[52].mxu0 %v2751_v38  ;;  %v2699_v38 = vld [vmem:[#allocation3 + $0x87] sm:$0xff]  ;;  %v6992_v45 = vld [vmem:[%s8558_s3 + $0x108] sm:$0xff]  }
 0x2de   : > { %6023 = vmatprep.mubr.msk.bf16.mxu1 %vm7128_vm3, %v7127_v32  ;;  %5975 = vmatprep.mubr.msk.bf16.mxu0 %vm7128_vm3, %v7127_v32  ;;  %v2709_v39 = vpack.c.bf16 %v2700_v33, %v2699_v38  ;;  %v6996_v33 = vld [vmem:[%s8558_s3 + $0x128] sm:$0xff]   ;;  %v3308_v38 = vld [vmem:[#allocation3 + $0xa1] sm:$0xff] }
 0x2df   : > { %v3317_v46 = vpack.c.bf16 %v3308_v38, %v3307_v42 }
 0x2e5   : > { %6024 = vmatmul.mubr.bf16.gmra.mrb[28].mxu1 %v2708_v36  ;;  %5976 = vmatmul.mubr.bf16.gmra.mrb[56].mxu0 %v2752_v22  ;;  %v3085_v22 = vld [vmem:[#allocation3 + $0x51] sm:$0xff] }
 0x2e6   : > { %6027 = vmatprep.mubr.msk.bf16.mxu1 %vm7128_vm3, %v7127_v32  ;;  %6359 = vmatprep.mubr.msk.bf16.mxu0 %vm7128_vm3, %v7127_v32  ;;  %v3098_v23 = vpack.c.bf16 %v3085_v22, %v3084_v7  ;;  %v6995_v36 = vld [vmem:[%s8558_s3 + $0x120] sm:$0xff]  }
 0x2e7   : > { %v3513_v7 = vld [vmem:[#allocation3 + $0x52] sm:$0xff] }
 0x2ed   : > { %6028 = vmatmul.mubr.bf16.gmra.mrb[32].mxu1 %v2709_v39  ;;  %6360 = vmatmul.mubr.bf16.vlgmr.msra.gmra.mrb[60].mxu0 %v4384_v41 }
 0x2ee   : > { %6047 = vmatprep.mubr.msk.bf16.mxu1 %vm7128_vm3, %v7127_v32  ;;  %6363 = vmatprep.mubr.msk.bf16.mxu0 %vm7128_vm3, %v7127_v32 }
 0x2f5   : > { %6048 = vmatmul.mubr.bf16.vlgmr.msra.gmra.mrb[0].mxu1 %v3094_v49  ;;  %6364 = vmatmul.mubr.bf16.gmra.mrb[64].mxu0 %v4385_v50 }
 0x2f6   : > { %6084 = vmatpush3.bf16.msra.mxu1 %v6983_v40  ;;  %6051 = vmatprep.mubr.msk.bf16.mxu1 %vm7128_vm3, %v7127_v32 }
 0x2f7   : > { %6085 = vmatprep.subr.bf16.mxu1 %v7127_v32  ;;  %6367 = vmatprep.mubr.msk.bf16.mxu0 %vm7128_vm3, %v7127_v32 }
 0x2fa   : > { %6086 = vmatpush3.bf16.msra.mxu1 %v6984_v21  ;;  %v3506_v21 = vld [vmem:[#allocation3 + $0x1a] sm:$0xff] }
 0x2fb   : > { %6087 = vmatprep.subr.bf16.mxu1 %v7127_v32  ;;  %v3524_v54 = vpack.c.bf16 %v3507_v48, %v3506_v21 }
 0x2fd   : > { %6052 = vmatmul.mubr.bf16.gmra.mrb[4].mxu1 %v8025_v58  ;;  %6368 = vmatmul.mubr.bf16.gmra.mrb[68].mxu0 %v4386_v59  ;;  %v3509_v59 = vld [vmem:[#allocation3 + $0x32] sm:$0xff] }
 0x2fe   : > { %6055 = vmatprep.mubr.msk.bf16.mxu1 %vm7128_vm3, %v7127_v32  ;;  %6088 = vmatpush3.bf16.msra.mxu1 %v6985_v57  ;;  %v7000_v57 = vld [vmem:[%s8558_s3 + $0x148] sm:$0xff]  }
 0x2ff   : > { %6371 = vmatprep.mubr.msk.bf16.mxu0 %vm7128_vm3, %v7127_v32  ;;  %6089 = vmatprep.subr.bf16.mxu1 %v7127_v32  ;;  %v6988_v32 = vld [vmem:[%s8558_s3 + $0xe8] sm:$0xff]  }
 0x302   : > { %6090 = vmatpush3.bf16.msra.mxu1 %v6986_v60 }
 0x303   : > { %6091 = vmatprep.subr.bf16.mxu1 %v8039_v3 }
 0x305   : > { %6056 = vmatmul.mubr.bf16.gmra.mrb[8].mxu1 %v8037_v56  ;;  %6372 = vmatmul.mubr.bf16.gmra.mrb[72].mxu0 %v4387_v1  ;;  %v7002_v1 = vld [vmem:[%s8558_s3 + $0x158] sm:$0xff]  }
 0x306   : > { %6059 = vmatprep.mubr.msk.bf16.mxu1 %vm7128_vm3, %v8039_v3  ;;  %6375 = vmatprep.mubr.msk.bf16.mxu0 %vm7128_vm3, %v8039_v3 }
 0x307   : > { %6092 = vmatpush3.bf16.msra.mxu1 %v6987_v4  ;;  %v3511_v4 = vld [vmem:[#allocation3 + $0x42] sm:$0xff] }
 0x308   : > { %6093 = vmatprep.subr.bf16.mxu1 %v8039_v3 }
 0x30b   : > { %6094 = vmatpush3.bf16.msra.mxu1 %v6988_v32 }
 0x30c   : > { %6095 = vmatprep.subr.bf16.mxu1 %v8039_v3 }
 0x30d   : > { %6060 = vmatmul.mubr.bf16.gmra.mrb[12].mxu1 %v3097_v16  ;;  %6376 = vmatmul.mubr.bf16.gmra.mrb[76].mxu0 %v4388_v5 }
 0x30e   : > { %6063 = vmatprep.mubr.msk.bf16.mxu1 %vm7128_vm3, %v8039_v3  ;;  %6379 = vmatprep.mubr.msk.bf16.mxu0 %vm7128_vm3, %v8039_v3 }
 0x30f   : > { %6096 = vmatpush3.bf16.msra.mxu1 %v6989_v17  ;;  %v7004_v17 = vld [vmem:[%s8558_s3 + $0x168] sm:$0xff]  }
 0x310   : > { %6097 = vmatprep.subr.bf16.mxu1 %v8039_v3 }
 0x313   : > { %6098 = vmatpush3.bf16.msra.mxu1 %v6990_v18  ;;  %v3512_v18 = vld [vmem:[#allocation3 + $0x4a] sm:$0xff] }
 0x314   : > { %6135 = vmatprep.subr.bf16.mxu1 %v8039_v3 }
 0x315   : > { %6064 = vmatmul.mubr.bf16.gmra.mrb[16].mxu1 %v3098_v23  ;;  %6380 = vmatmul.mubr.bf16.gmra.mrb[80].mxu0 %v4389_v25  ;;  %v3527_v25 = vpack.c.bf16 %v3513_v7, %v3512_v18  ;;  %v3723_v18 = vld [vmem:[#allocation3 + $0x2b] sm:$0xff]  ;;  %v3724_v7 = vld [vmem:[#allocation3 + $0x33] sm:$0xff] }
 0x316   : > { %6067 = vmatprep.mubr.msk.bf16.mxu1 %vm7128_vm3, %v8039_v3 }
 0x31d   : > { %6068 = vmatmul.mubr.bf16.gmra.mrb[20].mxu1 %v3099_v27 }
 0x31e   : > { %6071 = vmatprep.mubr.msk.bf16.mxu1 %vm7128_vm3, %v8039_v3 }
 0x325   : > { %6072 = vmatmul.mubr.bf16.gmra.mrb[24].mxu1 %v3100_v53 }
 0x326   : > { %6075 = vmatprep.mubr.msk.bf16.mxu1 %vm7128_vm3, %v8039_v3 }
 0x32d   : > { %6076 = vmatmul.mubr.bf16.gmra.mrb[28].mxu1 %v3101_v31 }
 0x32e   : > { %6079 = vmatprep.mubr.msk.bf16.mxu1 %vm7128_vm3, %v8039_v3 }
 0x335   : > { %6080 = vmatmul.mubr.bf16.gmra.mrb[32].mxu1 %v3102_v37 }
 0x336   : > { %6099 = vmatprep.mubr.msk.bf16.mxu1 %vm7128_vm3, %v8039_v3 }
 0x33d   : > { %6100 = vmatmul.mubr.bf16.vlgmr.msra.gmra.mrb[0].mxu1 %v8025_v58  ;;  %v3508_v58 = vld [vmem:[#allocation3 + $0x2a] sm:$0xff] }
 0x33e   : > { %6136 = vmatpush3.bf16.msra.mxu1 %v6991_v47  ;;  %6103 = vmatprep.mubr.msk.bf16.mxu1 %vm7128_vm3, %v8039_v3  ;;  %v3525_v0 = vpack.c.bf16 %v3509_v59, %v3508_v58  ;;  %v3522_v59 = vld [vmem:[#allocation3 + $0x9a] sm:$0xff] }
 0x33f   : > { %6137 = vmatprep.subr.bf16.mxu1 %v8039_v3 }
 0x342   : > { %6138 = vmatpush3.bf16.msra.mxu1 %v6992_v45 }
 0x343   : > { %6139 = vmatprep.subr.bf16.mxu1 %v8039_v3 }
 0x345   : > { %6104 = vmatmul.mubr.bf16.gmra.mrb[4].mxu1 %v8037_v56 }
 0x346   : > { %6107 = vmatprep.mubr.msk.bf16.mxu1 %vm7128_vm3, %v8039_v3  ;;  %6140 = vmatpush3.bf16.msra.mxu1 %v6993_v19  ;;  %v3529_v19 = vpack.c.bf16 %v3517_v35, %v3516_v34  ;;  %v3725_v34 = vld [vmem:[#allocation3 + $0x3b] sm:$0xff] }
 0x347   : > { %6141 = vmatprep.subr.bf16.mxu1 %v8039_v3 }
 0x34a   : > { %6142 = vmatpush3.bf16.msra.mxu1 %v6994_v29 }
 0x34b   : > { %6143 = vmatprep.subr.bf16.mxu1 %v8039_v3 }
 0x34d   : > { %6108 = vmatmul.mubr.bf16.gmra.mrb[8].mxu1 %v3097_v16  ;;  %v3526_v16 = vpack.c.bf16 %v3511_v4, %v3510_v8  ;;  %v7007_v8 = vld [vmem:[%s8558_s3 + $0x180] sm:$0xff]  }
 0x34e   : > { %6111 = vmatprep.mubr.msk.bf16.mxu1 %vm7128_vm3, %v8039_v3  ;;  %6144 = vmatpush3.bf16.msra.mxu1 %v6995_v36  ;;  %v3519_v36 = vld [vmem:[#allocation3 + $0x82] sm:$0xff] }
 0x34f   : > { %6145 = vmatprep.subr.bf16.mxu1 %v8039_v3 }
 0x352   : > { %6146 = vmatpush3.bf16.msra.mxu1 %v6996_v33 }
 0x353   : > { %6147 = vmatprep.subr.bf16.mxu1 %v8039_v3 }
 0x355   : > { %6112 = vmatmul.mubr.bf16.gmra.mrb[12].mxu1 %v3098_v23  ;;  %v7005_v23 = vld [vmem:[%s8558_s3 + $0x170] sm:$0xff]  }
 0x356   : > { %6115 = vmatprep.mubr.msk.bf16.mxu1 %vm7128_vm3, %v8039_v3  ;;  %6148 = vmatpush3.bf16.msra.mxu1 %v6997_v15 }
 0x357   : > { %6149 = vmatprep.subr.bf16.mxu1 %v8039_v3 }
 0x35a   : > { %6150 = vmatpush3.bf16.msra.mxu1 %v6998_v9  ;;  %v3518_v9 = vld [vmem:[#allocation3 + $0x7a] sm:$0xff] }
 0x35b   : > { %6187 = vmatprep.subr.bf16.mxu1 %v8039_v3 }
 0x35d   : > { %6116 = vmatmul.mubr.bf16.gmra.mrb[16].mxu1 %v3099_v27  ;;  %v3515_v27 = vld [vmem:[#allocation3 + $0x62] sm:$0xff] }
 0x35e   : > { %6119 = vmatprep.mubr.msk.bf16.mxu1 %vm7128_vm3, %v8039_v3 }
 0x365   : > { %6120 = vmatmul.mubr.bf16.gmra.mrb[20].mxu1 %v3100_v53  ;;  %v3514_v53 = vld [vmem:[#allocation3 + $0x5a] sm:$0xff] }
 0x366   : > { %6123 = vmatprep.mubr.msk.bf16.mxu1 %vm7128_vm3, %v8039_v3  ;;  %v3528_v30 = vpack.c.bf16 %v3515_v27, %v3514_v53  ;;  %v3726_v53 = vld [vmem:[#allocation3 + $0x43] sm:$0xff] }
 0x36d   : > { %6124 = vmatmul.mubr.bf16.gmra.mrb[24].mxu1 %v3101_v31 }
 0x36e   : > { %6127 = vmatprep.mubr.msk.bf16.mxu1 %vm7128_vm3, %v8039_v3 }
 0x375   : > { %6128 = vmatmul.mubr.bf16.gmra.mrb[28].mxu1 %v3102_v37 }
 0x376   : > { %6131 = vmatprep.mubr.msk.bf16.mxu1 %vm7128_vm3, %v8039_v3 }
 0x378   : > { %v8127_v39 = vpop.f32.mrb[24].mxu0 }
 0x379   : > { %v5945_v41 = vpop.f32.mrb[25].mxu0 }
 0x37a   : > { %v8129_v44 = vpop.f32.mrb[26].mxu0  ;;  %v3530_v41 = vpack.c.bf16 %v3519_v36, %v3518_v9  ;;  %v7012_v36 = vld [vmem:[%s8558_s3 + $0x1a8] sm:$0xff]  }
 0x37b   : > { %v5946_v40 = vpop.f32.mrb[27].mxu0  ;;  %v3728_v9 = vld [vmem:[#allocation3 + $0x53] sm:$0xff] }
 0x37c   : > { %v3521_v40 = vld [vmem:[#allocation3 + $0x92] sm:$0xff] }
 0x37d   : > { %6132 = vmatmul.mubr.bf16.gmra.mrb[32].mxu1 %v3317_v46  ;;  %v3520_v46 = vld [vmem:[#allocation3 + $0x8a] sm:$0xff] }
 0x37e   : > { %6151 = vmatprep.mubr.msk.bf16.mxu1 %vm7128_vm3, %v8039_v3 }
 0x380   : > { %v8133_v49 = vpop.f32.mrb[28].mxu0 }
 0x381   : > { %v5949_v50 = vpop.f32.mrb[29].mxu0 }
 0x382   : > { %v8138_v52 = vpop.f32.mrb[30].mxu0 }
 0x383   : > { %v5950_v55 = vpop.f32.mrb[31].mxu0 }
 0x384   : > { %v3523_v55 = vld [vmem:[#allocation3 + $0xa2] sm:$0xff] }
 0x385   : > { %6152 = vmatmul.mubr.bf16.vlgmr.msra.gmra.mrb[0].mxu1 %v3524_v54 }
 0x386   : > { %6188 = vmatpush3.bf16.msra.mxu1 %v6999_v51  ;;  %6155 = vmatprep.mubr.msk.bf16.mxu1 %vm7128_vm3, %v8039_v3  ;;  %v3531_v51 = vpack.c.bf16 %v3521_v40, %v3520_v46  ;;  %v7013_v40 = vld [vmem:[%s8558_s3 + $0x1b0] sm:$0xff]  }
 0x387   : > { %6189 = vmatprep.subr.bf16.mxu1 %v8039_v3 }
 0x388   : > { %v8146_v60 = vpop.f32.mrb[32].mxu0 }
 0x389   : > { %v5953_v62 = vpop.f32.mrb[33].mxu0 }
 0x38a   : > { %6190 = vmatpush3.bf16.msra.mxu1 %v7000_v57  ;;  %v8148_v13 = vpop.f32.mrb[34].mxu0 }
 0x38b   : > { %v5954_v56 = vpop.f32.mrb[35].mxu0  ;;  %6191 = vmatprep.subr.bf16.mxu1 %v8039_v3 }
 0x38c   : > { %v3722_v56 = vld [vmem:[#allocation3 + $0x23] sm:$0xff] }
 0x38d   : > { %6156 = vmatmul.mubr.bf16.gmra.mrb[4].mxu1 %v3525_v0 }
 0x38e   : > { %6159 = vmatprep.mubr.msk.bf16.mxu1 %vm7128_vm3, %v8039_v3  ;;  %6192 = vmatpush3.bf16.msra.mxu1 %v7001_v24  ;;  %v3532_v24 = vpack.c.bf16 %v3523_v55, %v3522_v59  ;;  %v3730_v55 = vld [vmem:[#allocation3 + $0x63] sm:$0xff] }
 0x38f   : > { %6193 = vmatprep.subr.bf16.mxu1 %v8039_v3 }
 0x390   : > { %v8160_v32 = vpop.f32.mrb[36].mxu0 }
 0x391   : > { %v5957_v10 = vpop.f32.mrb[37].mxu0 }
 0x392   : > { %v8162_v12 = vpop.f32.mrb[38].mxu0  ;;  %6194 = vmatpush3.bf16.msra.mxu1 %v7002_v1  ;;  %v3721_v10 = vld [vmem:[#allocation3 + $0x1b] sm:$0xff] }
 0x393   : > { %v5958_v5 = vpop.f32.mrb[39].mxu0  ;;  %6195 = vmatprep.subr.bf16.mxu1 %v8039_v3 }
 0x395   : > { %6160 = vmatmul.mubr.bf16.gmra.mrb[8].mxu1 %v3526_v16  ;;  %v3739_v16 = vpack.c.bf16 %v3722_v56, %v3721_v10  ;;  %v3731_v10 = vld [vmem:[#allocation3 + $0x6b] sm:$0xff] }
 0x396   : > { %6163 = vmatprep.mubr.msk.bf16.mxu1 %vm7128_vm3, %v8039_v3  ;;  %6196 = vmatpush3.bf16.msra.mxu1 %v7003_v14 }
 0x397   : > { %6197 = vmatprep.subr.bf16.mxu1 %v8039_v3 }
 0x398   : > { %v8174_v22 = vpop.f32.mrb[40].mxu0 }
 0x399   : > { %v5961_v11 = vpop.f32.mrb[41].mxu0 }
 0x39a   : > { %v8176_v2 = vpop.f32.mrb[42].mxu0  ;;  %6198 = vmatpush3.bf16.msra.mxu1 %v7004_v17  ;;  %v7008_v17 = vld [vmem:[%s8558_s3 + $0x188] sm:$0xff]  }
 0x39b   : > { %v5962_v26 = vpop.f32.mrb[43].mxu0  ;;  %6199 = vmatprep.subr.bf16.mxu1 %v8039_v3 }
 0x39c   : > { %v7009_v26 = vld [vmem:[%s8558_s3 + $0x190] sm:$0xff]  }
 0x39d   : > { %6164 = vmatmul.mubr.bf16.gmra.mrb[12].mxu1 %v3527_v25 }
 0x39e   : > { %6167 = vmatprep.mubr.msk.bf16.mxu1 %vm7128_vm3, %v8039_v3  ;;  %6200 = vmatpush3.bf16.msra.mxu1 %v7005_v23 }
 0x39f   : > { %6201 = vmatprep.subr.bf16.mxu1 %v8039_v3 }
 0x3a0   : > { %v8188_v28 = vpop.f32.mrb[44].mxu0 }
 0x3a1   : > { %v5965_v43 = vpop.f32.mrb[45].mxu0 }
 0x3a2   : > { %v8190_v6 = vpop.f32.mrb[46].mxu0  ;;  %6202 = vmatpush3.bf16.msra.mxu1 %v7006_v61  ;;  %v8239_v61 = vpack.c.bf16 %v3724_v7, %v3723_v18  ;;  %v7010_v43 = vld [vmem:[%s8558_s3 + $0x198] sm:$0xff]  }
 0x3a3   : > { %v5966_v31 = vpop.f32.mrb[47].mxu0  ;;  %6239 = vmatprep.subr.bf16.mxu1 %v8039_v3  ;;  %v3735_v7 = vld [vmem:[#allocation3 + $0x8b] sm:$0xff] }
 0x3a5   : > { %6168 = vmatmul.mubr.bf16.gmra.mrb[16].mxu1 %v3528_v30 }
 0x3a6   : > { %6171 = vmatprep.mubr.msk.bf16.mxu1 %vm7128_vm3, %v8039_v3 }
 0x3a8   : > { %v8195_v37 = vpop.f32.mrb[48].mxu0 }
 0x3a9   : > { %v5969_v47 = vpop.f32.mrb[49].mxu0 }
 0x3aa   : > { %v8197_v45 = vpop.f32.mrb[50].mxu0  ;;  %v7011_v47 = vld [vmem:[%s8558_s3 + $0x1a0] sm:$0xff]  }
 0x3ab   : > { %v5970_v29 = vpop.f32.mrb[51].mxu0 }
 0x3ad   : > { %6172 = vmatmul.mubr.bf16.gmra.mrb[20].mxu1 %v3529_v19  ;;  %v3741_v19 = vpack.c.bf16 %v3726_v53, %v3725_v34  ;;  %v7016_v34 = vld [vmem:[%s8558_s3 + $0x1c8] sm:$0xff]  }
 0x3ae   : > { %6175 = vmatprep.mubr.msk.bf16.mxu1 %vm7128_vm3, %v8039_v3 }
 0x3b0   : > { %v8201_v33 = vpop.f32.mrb[52].mxu0 }
 0x3b1   : > { %v5973_v15 = vpop.f32.mrb[53].mxu0 }
 0x3b2   : > { %v8203_v38 = vpop.f32.mrb[54].mxu0  ;;  %v3727_v15 = vld [vmem:[#allocation3 + $0x4b] sm:$0xff] }
 0x3b3   : > { %v5974_v42 = vpop.f32.mrb[55].mxu0 }
 0x3b5   : > { %6176 = vmatmul.mubr.bf16.gmra.mrb[24].mxu1 %v3530_v41 }
 0x3b6   : > { %6179 = vmatprep.mubr.msk.bf16.mxu1 %vm7128_vm3, %v8039_v3 }
 0x3b8   : > { %v8207_v48 = vpop.f32.mrb[56].mxu0 }
 0x3b9   : > { %v5977_v50 = vpop.f32.mrb[57].mxu0 }
 0x3ba   : > { %v8209_v21 = vpop.f32.mrb[58].mxu0  ;;  %v3742_v50 = vpack.c.bf16 %v3728_v9, %v3727_v15  ;;  %v7022_v15 = vld [vmem:[%s8558_s3 + $0x1f8] sm:$0xff]  }
 0x3bb   : > { %v5978_v54 = vpop.f32.mrb[59].mxu0  ;;  %v3952_v9 = vld [vmem:[#allocation3 + $0xab] sm:$0xff] }
 0x3bc   : > { %v7014_v54 = vld [vmem:[%s8558_s3 + $0x1b8] sm:$0xff]  }
 0x3bd   : > { %6180 = vmatmul.mubr.bf16.gmra.mrb[28].mxu1 %v3531_v51 }
 0x3be   : > { %6183 = vmatprep.mubr.msk.bf16.mxu1 %vm7128_vm3, %v8039_v3 }
 0x3c0   : > { %v8213_v57 = vpop.f32.mrb[60].mxu0 }
 0x3c1   : > { %v6361_v58 = vpop.f32.mrb[61].mxu0 }
 0x3c2   : > { %v8215_v62 = vpop.f32.mrb[62].mxu0 }
 0x3c3   : > { %v6362_v0 = vpop.f32.mrb[63].mxu0 }
 0x3c5   : > { %6184 = vmatmul.mubr.bf16.gmra.mrb[32].mxu1 %v3532_v24  ;;  %v3729_v24 = vld [vmem:[#allocation3 + $0x5b] sm:$0xff] }
 0x3c6   : > { %6203 = vmatprep.mubr.msk.bf16.mxu1 %vm7128_vm3, %v8039_v3  ;;  %v3743_v56 = vpack.c.bf16 %v3730_v55, %v3729_v24  ;;  %v7024_v55 = vld [vmem:[%s8558_s3 + $0x200] sm:$0xff]   ;;  %v4153_v24 = vld [vmem:[#allocation3 + $0x3c] sm:$0xff] }
 0x3c8   : > { %v8219_v1 = vpop.f32.mrb[64].mxu0 }
 0x3c9   : > { %v6365_v4 = vpop.f32.mrb[65].mxu0 }
 0x3ca   : > { %v8224_v14 = vpop.f32.mrb[66].mxu0 }
 0x3cb   : > { %v6366_v5 = vpop.f32.mrb[67].mxu0 }
 0x3cc   : > { %v3734_v5 = vld [vmem:[#allocation3 + $0x83] sm:$0xff] }
 0x3cd   : > { %6204 = vmatmul.mubr.bf16.vlgmr.msra.gmra.mrb[0].mxu1 %v3739_v16 }
 0x3ce   : > { %6240 = vmatpush3.bf16.msra.mxu1 %v7007_v8  ;;  %6207 = vmatprep.mubr.msk.bf16.mxu1 %vm7128_vm3, %v8039_v3  ;;  %v3732_v8 = vld [vmem:[#allocation3 + $0x73] sm:$0xff] }
 0x3cf   : > { %6241 = vmatprep.subr.bf16.mxu1 %v8039_v3  ;;  %v3744_v16 = vpack.c.bf16 %v3732_v8, %v3731_v10  ;;  %v7026_v10 = vld [vmem:[%s8558_s3 + $0x210] sm:$0xff]   ;;  %v4155_v8 = vld [vmem:[#allocation3 + $0x4c] sm:$0xff] }
 0x3d0   : > { %v8232_v11 = vpop.f32.mrb[68].mxu0 }
 0x3d1   : > { %v6369_v23 = vpop.f32.mrb[69].mxu0 }
 0x3d2   : > { %6242 = vmatpush3.bf16.msra.mxu1 %v7008_v17  ;;  %v8234_v25 = vpop.f32.mrb[70].mxu0  ;;  %v3733_v17 = vld [vmem:[#allocation3 + $0x7b] sm:$0xff]  ;;  %v3736_v23 = vld [vmem:[#allocation3 + $0x93] sm:$0xff] }
 0x3d3   : > { %v6370_v27 = vpop.f32.mrb[71].mxu0  ;;  %6243 = vmatprep.subr.bf16.mxu1 %v8039_v3  ;;  %v3745_v18 = vpack.c.bf16 %v3734_v5, %v3733_v17  ;;  %v7027_v5 = vld [vmem:[%s8558_s3 + $0x218] sm:$0xff]  }
 0x3d4   : > { %v3738_v27 = vld [vmem:[#allocation3 + $0xa3] sm:$0xff] }
 0x3d5   : > { %6208 = vmatmul.mubr.bf16.gmra.mrb[4].mxu1 %v8239_v61 }
 0x3d6   : > { %6211 = vmatprep.mubr.msk.bf16.mxu1 %vm7128_vm3, %v8039_v3  ;;  %6244 = vmatpush3.bf16.msra.mxu1 %v7009_v26  ;;  %v3746_v26 = vpack.c.bf16 %v3736_v23, %v3735_v7  ;;  %v4158_v7 = vld [vmem:[#allocation3 + $0x64] sm:$0xff]  ;;  %v4157_v23 = vld [vmem:[#allocation3 + $0x5c] sm:$0xff] }
 0x3d7   : > { %6245 = vmatprep.subr.bf16.mxu1 %v8039_v3 }
 0x3d8   : > { %v8249_v30 = vpop.f32.mrb[72].mxu0 }
 0x3d9   : > { %v6373_v31 = vpop.f32.mrb[73].mxu0 }
 0x3da   : > { %v8251_v35 = vpop.f32.mrb[74].mxu0  ;;  %6246 = vmatpush3.bf16.msra.mxu1 %v7010_v43  ;;  %v3737_v43 = vld [vmem:[#allocation3 + $0x9b] sm:$0xff]  ;;  %v7015_v31 = vld [vmem:[%s8558_s3 + $0x1c0] sm:$0xff]  }
 0x3db   : > { %v6374_v29 = vpop.f32.mrb[75].mxu0  ;;  %6247 = vmatprep.subr.bf16.mxu1 %v8039_v3  ;;  %v3747_v53 = vpack.c.bf16 %v3738_v27, %v3737_v43  ;;  %v4172_v27 = vpack.c.bf16 %v4158_v7, %v4157_v23  ;;  %v4159_v43 = vld [vmem:[#allocation3 + $0x6c] sm:$0xff] }
 0x3dc   : > { %v7019_v29 = vld [vmem:[%s8558_s3 + $0x1e0] sm:$0xff]  }
 0x3dd   : > { %6212 = vmatmul.mubr.bf16.gmra.mrb[8].mxu1 %v3741_v19 }
 0x3de   : > { %6215 = vmatprep.mubr.msk.bf16.mxu1 %vm7128_vm3, %v8039_v3  ;;  %6248 = vmatpush3.bf16.msra.mxu1 %v7011_v47  ;;  %v7017_v47 = vld [vmem:[%s8558_s3 + $0x1d0] sm:$0xff]  }
 0x3df   : > { %6249 = vmatprep.subr.bf16.mxu1 %v8039_v3 }
 0x3e0   : > { %v8263_v41 = vpop.f32.mrb[76].mxu0 }
 0x3e1   : > { %v6377_v42 = vpop.f32.mrb[77].mxu0 }
 0x3e2   : > { %v8265_v46 = vpop.f32.mrb[78].mxu0  ;;  %6250 = vmatpush3.bf16.msra.mxu1 %v7012_v36  ;;  %v7021_v36 = vld [vmem:[%s8558_s3 + $0x1f0] sm:$0xff]   ;;  %v3953_v42 = vld [vmem:[#allocation3 + $0xb3] sm:$0xff] }
 0x3e3   : > { %v6378_v51 = vpop.f32.mrb[79].mxu0  ;;  %6251 = vmatprep.subr.bf16.mxu1 %v8039_v3 }
 0x3e4   : > { %v4152_v51 = vld [vmem:[#allocation3 + $0x34] sm:$0xff] }
 0x3e5   : > { %6216 = vmatmul.mubr.bf16.gmra.mrb[12].mxu1 %v3742_v50 }
 0x3e6   : > { %6219 = vmatprep.mubr.msk.bf16.mxu1 %vm7128_vm3, %v8039_v3  ;;  %6252 = vmatpush3.bf16.msra.mxu1 %v7013_v40  ;;  %v3962_v40 = vpack.c.bf16 %v3953_v42, %v3952_v9  ;;  %v4167_v9 = vld [vmem:[#allocation3 + $0xac] sm:$0xff]  ;;  %v4168_v42 = vld [vmem:[#allocation3 + $0xb4] sm:$0xff] }
 0x3e7   : > { %6253 = vmatprep.subr.bf16.mxu1 %v8039_v3 }
 0x3e8   : > { %v8277_v58 = vpop.f32.mrb[80].mxu0 }
 0x3e9   : > { %v6381_v59 = vpop.f32.mrb[81].mxu0 }
 0x3ea   : > { %v8279_v0 = vpop.f32.mrb[82].mxu0  ;;  %6254 = vmatpush3.bf16.msra.mxu1 %v7014_v54  ;;  %v4154_v59 = vld [vmem:[#allocation3 + $0x44] sm:$0xff] }
 0x3eb   : > { %v6382_v4 = vpop.f32.mrb[83].mxu0  ;;  %6291 = vmatprep.subr.bf16.mxu1 %v8039_v3 }
 0x3ec   : > { %v4170_v4 = vpack.c.bf16 %v4154_v59, %v4153_v24  ;;  %v4380_v59 = vld [vmem:[#allocation3 + $0x9d] sm:$0xff] }
 0x3ed   : > { %6220 = vmatmul.mubr.bf16.gmra.mrb[16].mxu1 %v3743_v56 }
 0x3ee   : > { %6223 = vmatprep.mubr.msk.bf16.mxu1 %vm7128_vm3, %v8039_v3 }
 0x3f5   : > { %6224 = vmatmul.mubr.bf16.gmra.mrb[20].mxu1 %v3744_v16 }
 0x3f6   : > { %6227 = vmatprep.mubr.msk.bf16.mxu1 %vm7128_vm3, %v8039_v3 }
 0x3fd   : > { %6228 = vmatmul.mubr.bf16.gmra.mrb[24].mxu1 %v3745_v18 }
 0x3fe   : > { %6231 = vmatprep.mubr.msk.bf16.mxu1 %vm7128_vm3, %v8039_v3 }
 0x405   : > { %6232 = vmatmul.mubr.bf16.gmra.mrb[28].mxu1 %v3746_v26 }
 0x406   : > { %6235 = vmatprep.mubr.msk.bf16.mxu1 %vm7128_vm3, %v8039_v3 }
 0x40d   : > { %6236 = vmatmul.mubr.bf16.gmra.mrb[32].mxu1 %v3747_v53 }
 0x40e   : > { %6255 = vmatprep.mubr.msk.bf16.mxu1 %vm7128_vm3, %v8039_v3 }
 0x415   : > { %6256 = vmatmul.mubr.bf16.vlgmr.msra.gmra.mrb[0].mxu1 %v8239_v61  ;;  %v7018_v61 = vld [vmem:[%s8558_s3 + $0x1d8] sm:$0xff]  }
 0x416   : > { %6292 = vmatpush3.bf16.msra.mxu1 %v7015_v31  ;;  %6259 = vmatprep.mubr.msk.bf16.mxu1 %vm7128_vm3, %v8039_v3 }
 0x417   : > { %6293 = vmatprep.subr.bf16.mxu1 %v8039_v3 }
 0x41a   : > { %6294 = vmatpush3.bf16.msra.mxu1 %v7016_v34  ;;  %v4162_v34 = vld [vmem:[#allocation3 + $0x84] sm:$0xff] }
 0x41b   : > { %6295 = vmatprep.subr.bf16.mxu1 %v8039_v3 }
 0x41d   : > { %6260 = vmatmul.mubr.bf16.gmra.mrb[4].mxu1 %v3741_v19  ;;  %v7020_v19 = vld [vmem:[%s8558_s3 + $0x1e8] sm:$0xff]  }
 0x41e   : > { %6263 = vmatprep.mubr.msk.bf16.mxu1 %vm7128_vm3, %v8039_v3  ;;  %6296 = vmatpush3.bf16.msra.mxu1 %v7017_v47  ;;  %v4161_v47 = vld [vmem:[#allocation3 + $0x7c] sm:$0xff] }
 0x41f   : > { %6297 = vmatprep.subr.bf16.mxu1 %v8039_v3 }
 0x422   : > { %6298 = vmatpush3.bf16.msra.mxu1 %v7018_v61  ;;  %v4174_v61 = vpack.c.bf16 %v4162_v34, %v4161_v47 }
 0x423   : > { %6299 = vmatprep.subr.bf16.mxu1 %v8039_v3 }
 0x425   : > { %6264 = vmatmul.mubr.bf16.gmra.mrb[8].mxu1 %v3742_v50  ;;  %v4151_v50 = vld [vmem:[#allocation3 + $0x2c] sm:$0xff] }
 0x426   : > { %6267 = vmatprep.mubr.msk.bf16.mxu1 %vm7128_vm3, %v8039_v3  ;;  %6300 = vmatpush3.bf16.msra.mxu1 %v7019_v29  ;;  %v4169_v54 = vpack.c.bf16 %v4152_v51, %v4151_v50  ;;  %v4163_v29 = vld [vmem:[#allocation3 + $0x8c] sm:$0xff]  ;;  %v4379_v51 = vld [vmem:[#allocation3 + $0x95] sm:$0xff] }
 0x427   : > { %6301 = vmatprep.subr.bf16.mxu1 %v8039_v3  ;;  %v4378_v50 = vld [vmem:[#allocation3 + $0x8d] sm:$0xff] }
 0x42a   : > { %6302 = vmatpush3.bf16.msra.mxu1 %v7020_v19 }
 0x42b   : > { %6303 = vmatprep.subr.bf16.mxu1 %v8039_v3 }
 0x42d   : > { %6268 = vmatmul.mubr.bf16.gmra.mrb[12].mxu1 %v3743_v56  ;;  %v7025_v56 = vld [vmem:[%s8558_s3 + $0x208] sm:$0xff]  }
 0x42e   : > { %6271 = vmatprep.mubr.msk.bf16.mxu1 %vm7128_vm3, %v8039_v3  ;;  %6304 = vmatpush3.bf16.msra.mxu1 %v7021_v36  ;;  %v4165_v36 = vld [vmem:[#allocation3 + $0x9c] sm:$0xff] }
 0x42f   : > { %6305 = vmatprep.subr.bf16.mxu1 %v8039_v3 }
 0x432   : > { %6306 = vmatpush3.bf16.msra.mxu1 %v7022_v15 }
 0x433   : > { %6395 = vmatprep.subr.bf16.mxu1 %v8039_v3 }
 0x435   : > { %6272 = vmatmul.mubr.bf16.gmra.mrb[16].mxu1 %v3744_v16  ;;  %v4156_v16 = vld [vmem:[#allocation3 + $0x54] sm:$0xff] }
 0x436   : > { %6275 = vmatprep.mubr.msk.bf16.mxu1 %vm7128_vm3, %v8039_v3  ;;  %v4171_v17 = vpack.c.bf16 %v4156_v16, %v4155_v8 }
 0x43d   : > { %6276 = vmatmul.mubr.bf16.gmra.mrb[20].mxu1 %v3745_v18  ;;  %v7028_v18 = vld [vmem:[%s8558_s3 + $0x220] sm:$0xff]  }
 0x43e   : > { %6279 = vmatprep.mubr.msk.bf16.mxu1 %vm7128_vm3, %v8039_v3 }
 0x445   : > { %6280 = vmatmul.mubr.bf16.gmra.mrb[24].mxu1 %v3746_v26  ;;  %v7029_v26 = vld [vmem:[%s8558_s3 + $0x228] sm:$0xff]  }
 0x446   : > { %6283 = vmatprep.mubr.msk.bf16.mxu1 %vm7128_vm3, %v8039_v3 }
 0x44d   : > { %6284 = vmatmul.mubr.bf16.gmra.mrb[28].mxu1 %v3747_v53  ;;  %v4160_v53 = vld [vmem:[#allocation3 + $0x74] sm:$0xff] }
 0x44e   : > { %6287 = vmatprep.mubr.msk.bf16.mxu1 %vm7128_vm3, %v8039_v3  ;;  %v4173_v31 = vpack.c.bf16 %v4160_v53, %v4159_v43 }
 0x455   : > { %6288 = vmatmul.mubr.bf16.gmra.mrb[32].mxu1 %v3962_v40  ;;  %v4177_v40 = vpack.c.bf16 %v4168_v42, %v4167_v9 }
 0x456   : > { %6307 = vmatprep.mubr.msk.bf16.mxu1 %vm7128_vm3, %v8039_v3 }
 0x45d   : > { %6308 = vmatmul.mubr.bf16.vlgmr.msra.gmra.mrb[0].mxu1 %v4169_v54  ;;  %v4390_v54 = vpack.c.bf16 %v4379_v51, %v4378_v50 }
 0x45e   : > { %6403 = vmatpush3.bf16.msra.mxu1 %v7024_v55  ;;  %6311 = vmatprep.mubr.msk.bf16.mxu1 %vm7128_vm3, %v8039_v3  ;;  %v4381_v55 = vld [vmem:[#allocation3 + $0xa5] sm:$0xff] }
 0x45f   : > { %6396 = vmatprep.subr.bf16.mxu1 %v8039_v3  ;;  %v4391_v24 = vpack.c.bf16 %v4381_v55, %v4380_v59 }
 0x462   : > { %6404 = vmatpush3.bf16.msra.mxu1 %v7025_v56  ;;  %v4382_v56 = vld [vmem:[#allocation3 + $0xad] sm:$0xff] }
 0x463   : > { %6397 = vmatprep.subr.bf16.mxu1 %v8039_v3 }
 0x465   : > { %6312 = vmatmul.mubr.bf16.gmra.mrb[4].mxu1 %v4170_v4  ;;  %v4383_v4 = vld [vmem:[#allocation3 + $0xb5] sm:$0xff] }
 0x466   : > { %6315 = vmatprep.mubr.msk.bf16.mxu1 %vm7128_vm3, %v8039_v3  ;;  %6405 = vmatpush3.bf16.msra.mxu1 %v7026_v10  ;;  %v4392_v10 = vpack.c.bf16 %v4383_v4, %v4382_v56 }
 0x467   : > { %6398 = vmatprep.subr.bf16.mxu1 %v8039_v3 }
 0x46a   : > { %6406 = vmatpush3.bf16.msra.mxu1 %v7027_v5 }
 0x46b   : > { %6399 = vmatprep.subr.bf16.mxu1 %v8039_v3 }
 0x46d   : > { %6316 = vmatmul.mubr.bf16.gmra.mrb[8].mxu1 %v4171_v17  ;;  %v8396_v17 = vld [vmem:[%s8559_s4 + $0x2] ss:$0 sm:$0xff] }
 0x46e   : > { %6319 = vmatprep.mubr.msk.bf16.mxu1 %vm7128_vm3, %v8039_v3  ;;  %6407 = vmatpush3.bf16.msra.mxu1 %v7028_v18 }
 0x46f   : > { %6400 = vmatprep.subr.bf16.mxu1 %v8039_v3 }
 0x472   : > { %6408 = vmatpush3.bf16.msra.mxu1 %v7029_v26  ;;  %v8404_v26 = vld [vmem:[%s8559_s4 + $0x3] ss:$0 sm:$0xff] }
 0x473   : > { %6401 = vmatprep.subr.bf16.mxu1 %v8039_v3 }
 0x475   : > { %6320 = vmatmul.mubr.bf16.gmra.mrb[12].mxu1 %v4172_v27 }
 0x476   : > { %6323 = vmatprep.mubr.msk.bf16.mxu1 %vm7128_vm3, %v8039_v3  ;;  %6409 = vmatpush3.bf16.msra.mxu1 %v7944_v63  ;;  %v4164_v63 = vld [vmem:[#allocation3 + $0x94] sm:$0xff] }
 0x477   : > { %6402 = vmatprep.subr.bf16.mxu1 %v8039_v3  ;;  %v4175_v19 = vpack.c.bf16 %v4164_v63, %v4163_v29 }
 0x47a   : > { %6410 = vmatpush3.bf16.msra.mxu1 %v7963_v20  ;;  %v4166_v20 = vld [vmem:[#allocation3 + $0xa4] sm:$0xff] }
 0x47b   : > { %v4176_v15 = vpack.c.bf16 %v4166_v20, %v4165_v36 }
 0x47d   : > { %6324 = vmatmul.mubr.bf16.gmra.mrb[16].mxu1 %v4173_v31 }
 0x47e   : > { %6327 = vmatprep.mubr.msk.bf16.mxu1 %vm7128_vm3, %v8039_v3 }
 0x485   : > { %6328 = vmatmul.mubr.bf16.gmra.mrb[20].mxu1 %v4174_v61 }
 0x486   : > { %6331 = vmatprep.mubr.msk.bf16.mxu1 %vm7128_vm3, %v8039_v3 }
 0x48d   : > { %6332 = vmatmul.mubr.bf16.gmra.mrb[24].mxu1 %v4175_v19 }
 0x48e   : > { %6335 = vmatprep.mubr.msk.bf16.mxu1 %vm7128_vm3, %v8039_v3 }
 0x495   : > { %6336 = vmatmul.mubr.bf16.gmra.mrb[28].mxu1 %v4176_v15 }
 0x496   : > { %6339 = vmatprep.mubr.msk.bf16.mxu1 %vm7128_vm3, %v8039_v3 }
 0x49d   : > { %6340 = vmatmul.mubr.bf16.gmra.mrb[32].mxu1 %v4177_v40 }
 0x49e   : > { %6383 = vmatprep.mubr.msk.bf16.mxu1 %vm7128_vm3, %v8039_v3 }
 0x4a5   : > { %6384 = vmatmul.mubr.bf16.vlgmr.msra.gmra.mrb[24].mxu1 %v4390_v54 }
 0x4a6   : > { %6387 = vmatprep.mubr.msk.bf16.mxu1 %vm7128_vm3, %v8039_v3 }
 0x4ad   : > { %6388 = vmatmul.mubr.bf16.gmra.mrb[28].mxu1 %v4391_v24 }
 0x4ae   : > { %6391 = vmatprep.mubr.msk.bf16.mxu1 %vm7128_vm3, %v8039_v3 }
 0x4b5   : > { %6392 = vmatmul.mubr.bf16.gmra.mrb[32].mxu1 %v4392_v10 }
 0x530   : > { %v4277_v8 = vpop.f32.mrb[0].mxu1 }
 0x531   : > { %v6411_v16 = vadd.f32 %v4277_v8, %v8127_v39  ;;  %v6309_v5 = vpop.f32.mrb[1].mxu1 }
 0x532   : > { %v4280_v18 = vpop.f32.mrb[2].mxu1 }
 0x533   : > { %v6412_v7 = vadd.f32 %v6411_v16, %v8213_v57  ;;  %v6413_v3 = vadd.f32 %v4280_v18, %v8129_v44  ;;  %v6310_v23 = vpop.f32.mrb[3].mxu1 }
 0x535   : > { %v4586_v39 = vmul.f32 %v6412_v7, %v8396_v17  ;;  %v6414_v27 = vadd.f32 %v6413_v3, %v8215_v62 }
 0x537   : > { %v4609_v43 = vadd.f32 %v8404_v26, %v4586_v39  ;;  %v4587_v53 = vmul.f32 %v6414_v27, %v8396_v17 }
 0x538   : > { %v4285_v31 = vpop.f32.mrb[4].mxu1 }
 0x539   : > { %v4627_v57 = vmul.f32 0.01, %v4609_v43  ;;  %v4610_v44 = vadd.f32 %v8404_v26, %v4587_v53  ;;  %v6415_v34 = vadd.f32 %v4285_v31, %v8133_v49  ;;  %v6313_v47 = vpop.f32.mrb[5].mxu1 }
 0x53a   : > { %v4288_v61 = vpop.f32.mrb[6].mxu1 }
 0x53b   : > { %v4645_v29 = vmax.f32 %v4609_v43, %v4627_v57  ;;  %v4628_v63 = vmul.f32 0.01, %v4610_v44  ;;  %v6416_v19 = vadd.f32 %v6415_v34, %v8219_v1  ;;  %v6417_v62 = vadd.f32 %v4288_v61, %v8138_v52  ;;  %v6314_v20 = vpop.f32.mrb[7].mxu1 }
 0x53d   : > { %4663 = vst [vmem:[%s8416_s17] sm:$0xff] %v4645_v29  ;;  %v4646_v36 = vmax.f32 %v4610_v44, %v4628_v63  ;;  %v4588_v15 = vmul.f32 %v6416_v19, %v8396_v17  ;;  %v6418_v49 = vadd.f32 %v6417_v62, %v8224_v14 }
 0x53f   : > { %4664 = vst [vmem:[%s8416_s17 + $0x8] sm:$0xff] %v4646_v36  ;;  %v4611_v9 = vadd.f32 %v8404_v26, %v4588_v15  ;;  %v4589_v42 = vmul.f32 %v6418_v49, %v8396_v17 }
 0x540   : > { %v4293_v1 = vpop.f32.mrb[8].mxu1 }
 0x541   : > { %v4629_v52 = vmul.f32 0.01, %v4611_v9  ;;  %v4612_v40 = vadd.f32 %v8404_v26, %v4589_v42  ;;  %v6419_v50 = vadd.f32 %v4293_v1, %v8146_v60  ;;  %v6317_v51 = vpop.f32.mrb[9].mxu1 }
 0x542   : > { %v4296_v54 = vpop.f32.mrb[10].mxu1 }
 0x543   : > { %v4647_v55 = vmax.f32 %v4611_v9, %v4629_v52  ;;  %v4630_v59 = vmul.f32 0.01, %v4612_v40  ;;  %v6420_v24 = vadd.f32 %v6419_v50, %v8232_v11  ;;  %v6421_v14 = vadd.f32 %v4296_v54, %v8148_v13  ;;  %v6318_v56 = vpop.f32.mrb[11].mxu1 }
 0x545   : > { %4665 = vst [vmem:[%s8416_s17 + $0x10] sm:$0xff] %v4647_v55  ;;  %v4648_v4 = vmax.f32 %v4612_v40, %v4630_v59  ;;  %v4590_v10 = vmul.f32 %v6420_v24, %v8396_v17  ;;  %v6422_v8 = vadd.f32 %v6421_v14, %v8234_v25 }
 0x547   : > { %4666 = vst [vmem:[%s8416_s17 + $0x18] sm:$0xff] %v4648_v4  ;;  %v4613_v16 = vadd.f32 %v8404_v26, %v4590_v10  ;;  %v4591_v60 = vmul.f32 %v6422_v8, %v8396_v17 }
 0x548   : > { %v4301_v5 = vpop.f32.mrb[12].mxu1 }
 0x549   : > { %v4631_v18 = vmul.f32 0.01, %v4613_v16  ;;  %v4614_v11 = vadd.f32 %v8404_v26, %v4591_v60  ;;  %v6423_v13 = vadd.f32 %v4301_v5, %v8160_v32  ;;  %v6321_v7 = vpop.f32.mrb[13].mxu1 }
 0x54a   : > { %v4304_v3 = vpop.f32.mrb[14].mxu1 }
 0x54b   : > { %v4649_v23 = vmax.f32 %v4613_v16, %v4631_v18  ;;  %v4632_v39 = vmul.f32 0.01, %v4614_v11  ;;  %v6424_v27 = vadd.f32 %v6423_v13, %v8249_v30  ;;  %v6425_v25 = vadd.f32 %v4304_v3, %v8162_v12  ;;  %v6322_v43 = vpop.f32.mrb[15].mxu1 }
 0x54d   : > { %4667 = vst [vmem:[%s8416_s17 + $0x20] sm:$0xff] %v4649_v23  ;;  %v4650_v53 = vmax.f32 %v4614_v11, %v4632_v39  ;;  %v4592_v31 = vmul.f32 %v6424_v27, %v8396_v17  ;;  %v6426_v57 = vadd.f32 %v6425_v25, %v8251_v35 }
 0x54f   : > { %4668 = vst [vmem:[%s8416_s17 + $0x28] sm:$0xff] %v4650_v53  ;;  %v4615_v44 = vadd.f32 %v8404_v26, %v4592_v31  ;;  %v4593_v32 = vmul.f32 %v6426_v57, %v8396_v17 }
 0x550   : > { %v4309_v34 = vpop.f32.mrb[16].mxu1 }
 0x551   : > { %v4633_v47 = vmul.f32 0.01, %v4615_v44  ;;  %v4616_v30 = vadd.f32 %v8404_v26, %v4593_v32  ;;  %v6427_v12 = vadd.f32 %v4309_v34, %v8174_v22  ;;  %v6325_v61 = vpop.f32.mrb[17].mxu1 }
 0x552   : > { %v4312_v29 = vpop.f32.mrb[18].mxu1 }
 0x553   : > { %v4651_v63 = vmax.f32 %v4615_v44, %v4633_v47  ;;  %v4634_v19 = vmul.f32 0.01, %v4616_v30  ;;  %v6428_v62 = vadd.f32 %v6427_v12, %v8263_v41  ;;  %v6429_v35 = vadd.f32 %v4312_v29, %v8176_v2  ;;  %v6326_v20 = vpop.f32.mrb[19].mxu1 }
 0x555   : > { %4669 = vst [vmem:[%s8416_s17 + $0x30] sm:$0xff] %v4651_v63  ;;  %v4652_v36 = vmax.f32 %v4616_v30, %v4634_v19  ;;  %v4594_v15 = vmul.f32 %v6428_v62, %v8396_v17  ;;  %v6430_v49 = vadd.f32 %v6429_v35, %v8265_v46 }
 0x557   : > { %4670 = vst [vmem:[%s8416_s17 + $0x38] sm:$0xff] %v4652_v36  ;;  %v4617_v9 = vadd.f32 %v8404_v26, %v4594_v15  ;;  %v4595_v22 = vmul.f32 %v6430_v49, %v8396_v17 }
 0x558   : > { %v4317_v42 = vpop.f32.mrb[20].mxu1 }
 0x559   : > { %v4635_v1 = vmul.f32 0.01, %v4617_v9  ;;  %v4618_v41 = vadd.f32 %v8404_v26, %v4595_v22  ;;  %v6431_v2 = vadd.f32 %v4317_v42, %v8188_v28  ;;  %v6329_v52 = vpop.f32.mrb[21].mxu1 }
 0x55a   : > { %v4320_v40 = vpop.f32.mrb[22].mxu1 }
 0x55b   : > { %v4653_v50 = vmax.f32 %v4617_v9, %v4635_v1  ;;  %v4636_v51 = vmul.f32 0.01, %v4618_v41  ;;  %v6432_v54 = vadd.f32 %v6431_v2, %v8277_v58  ;;  %v6433_v46 = vadd.f32 %v4320_v40, %v8190_v6  ;;  %v6330_v55 = vpop.f32.mrb[23].mxu1 }
 0x55d   : > { %4671 = vst [vmem:[%s8416_s17 + $0x40] sm:$0xff] %v4653_v50  ;;  %v4654_v59 = vmax.f32 %v4618_v41, %v4636_v51  ;;  %v4596_v24 = vmul.f32 %v6432_v54, %v8396_v17  ;;  %v6434_v14 = vadd.f32 %v6433_v46, %v8279_v0 }
 0x55f   : > { %4672 = vst [vmem:[%s8416_s17 + $0x48] sm:$0xff] %v4654_v59  ;;  %v4619_v28 = vadd.f32 %v8404_v26, %v4596_v24  ;;  %v4597_v56 = vmul.f32 %v6434_v14, %v8396_v17 }
 0x561   : > { %v4637_v4 = vmul.f32 0.01, %v4619_v28  ;;  %v4620_v10 = vadd.f32 %v8404_v26, %v4597_v56 }
 0x563   : > { %v4655_v8 = vmax.f32 %v4619_v28, %v4637_v4  ;;  %v4638_v58 = vmul.f32 0.01, %v4620_v10 }
 0x565   : > { %4673 = vst [vmem:[%s8416_s17 + $0x50] sm:$0xff] %v4655_v8  ;;  %v4656_v16 = vmax.f32 %v4620_v10, %v4638_v58 }
 0x567   : > { %4674 = vst [vmem:[%s8416_s17 + $0x58] sm:$0xff] %v4656_v16 }
 0x578   : > { %v4540_v6 = vpop.f32.mrb[24].mxu1 }
 0x579   : > { %v6435_v60 = vadd.f32 %v4540_v6, %v8195_v37  ;;  %v6385_v5 = vpop.f32.mrb[25].mxu1 }
 0x57a   : > { %v4543_v18 = vpop.f32.mrb[26].mxu1 }
 0x57b   : > { %v4598_v0 = vmul.f32 %v6435_v60, %v8396_v17  ;;  %v6436_v11 = vadd.f32 %v4543_v18, %v8197_v45  ;;  %v6386_v13 = vpop.f32.mrb[27].mxu1 }
 0x57d   : > { %v4621_v7 = vadd.f32 %v8404_v26, %v4598_v0  ;;  %v4599_v3 = vmul.f32 %v6436_v11, %v8396_v17 }
 0x57f   : > { %v4639_v23 = vmul.f32 0.01, %v4621_v7  ;;  %v4622_v39 = vadd.f32 %v8404_v26, %v4599_v3 }
 0x580   : > { %v4548_v27 = vpop.f32.mrb[28].mxu1 }
 0x581   : > { %v4657_v25 = vmax.f32 %v4621_v7, %v4639_v23  ;;  %v4640_v37 = vmul.f32 0.01, %v4622_v39  ;;  %v6437_v43 = vadd.f32 %v4548_v27, %v8201_v33  ;;  %v6389_v53 = vpop.f32.mrb[29].mxu1 }
 0x582   : > { %v4551_v31 = vpop.f32.mrb[30].mxu1 }
 0x583   : > { %4675 = vst [vmem:[%s8416_s17 + $0x60] sm:$0xff] %v4657_v25  ;;  %v4658_v45 = vmax.f32 %v4622_v39, %v4640_v37  ;;  %v4600_v57 = vmul.f32 %v6437_v43, %v8396_v17  ;;  %v6438_v44 = vadd.f32 %v4551_v31, %v8203_v38  ;;  %v6390_v32 = vpop.f32.mrb[31].mxu1 }
 0x585   : > { %4676 = vst [vmem:[%s8416_s17 + $0x68] sm:$0xff] %v4658_v45  ;;  %v4623_v34 = vadd.f32 %v8404_v26, %v4600_v57  ;;  %v4601_v47 = vmul.f32 %v6438_v44, %v8396_v17 }
 0x587   : > { %v4641_v30 = vmul.f32 0.01, %v4623_v34  ;;  %v4624_v33 = vadd.f32 %v8404_v26, %v4601_v47 }
 0x588   : > { %v4556_v12 = vpop.f32.mrb[32].mxu1 }
 0x589   : > { %v4659_v61 = vmax.f32 %v4623_v34, %v4641_v30  ;;  %v4642_v29 = vmul.f32 0.01, %v4624_v33  ;;  %v6439_v63 = vadd.f32 %v4556_v12, %v8207_v48  ;;  %v6393_v19 = vpop.f32.mrb[33].mxu1 }
 0x58a   : > { %v4559_v38 = vpop.f32.mrb[34].mxu1 }
 0x58b   : > { %4677 = vst [vmem:[%s8416_s17 + $0x70] sm:$0xff] %v4659_v61  ;;  %v4660_v62 = vmax.f32 %v4624_v33, %v4642_v29  ;;  %v4602_v35 = vmul.f32 %v6439_v63, %v8396_v17  ;;  %v6440_v20 = vadd.f32 %v4559_v38, %v8209_v21  ;;  %v6394_v36 = vpop.f32.mrb[35].mxu1 }
 0x58d   : > { %4678 = vst [vmem:[%s8416_s17 + $0x78] sm:$0xff] %v4660_v62  ;;  %v4625_v15 = vadd.f32 %v8404_v26, %v4602_v35  ;;  %v4603_v49 = vmul.f32 %v6440_v20, %v8396_v17 }
 0x58f   : > { %v4643_v48 = vmul.f32 0.01, %v4625_v15  ;;  %v4626_v9 = vadd.f32 %v8404_v26, %v4603_v49 }
 0x591   : > { %v4661_v22 = vmax.f32 %v4625_v15, %v4643_v48  ;;  %v4644_v42 = vmul.f32 0.01, %v4626_v9 }
 0x593   : > { %4679 = vst [vmem:[%s8416_s17 + $0x80] sm:$0xff] %v4661_v22  ;;  %v4662_v21 = vmax.f32 %v4626_v9, %v4644_v42 }
 0x595   : > { %4680 = vst [vmem:[%s8416_s17 + $0x88] sm:$0xff] %v4662_v21 }
 0x596   : > { %7043 = shalt.err (!%p7040_p6)
}
 0x597   : > { %s7044_s13 = scalar_lea.hbm %s8498_s10, 2304  ;;  %s7048_s21 = scalar_lea.hbm %s8560_s5, 9216 }
 0x598   : > { %p7045_p7 = scmp.ne.s32.totalorder %s8498_s10, %s7044_s13  ;;  %p7049_p11 = scmp.lt.u32.totalorder %s8498_s10, %s8560_s5 }
 0x599   : > { %p7050_p12 = scmp.lt.u32.totalorder %s7048_s21, %s7044_s13  ;;  %p7052_p0 = scmp.lt.u32.totalorder %s7044_s13, %s8498_s10 }
 0x59a   : > { %p7046_p9 = pnand %p7045_p7, %p7213_p3 }
 0x59b   : > { %p7051_p13 = por %p7050_p12, %p7049_p11 }
 0x59c   : > { %p7047_p10 = pneg %p7046_p9 }
 0x59d   : > { %p7053_p1 = por %p7052_p0, %p7051_p13 }
 0x59f   : > { %p7054_p2 = pnand %p7053_p1, %p7047_p10 }
 0x5a1   : > { %7057 = shalt.err (!%p7054_p2)
}
 0x5a2   : > { %s7130_s30 = smov 128   ;;  %s7131_s14 = smov 8  }
 0x5a3   : > { %6873 = dma.vmem_to_hbm [thread:$0]  (%p7213_p3), %s8492_s22, 2304, %s8498_s10, %s8503_s12, %s7130_s30, %s7130_s30, %s7131_s14  }
 0x5a4 PF: > { %p6879_p4 = scmp.ge.s32.totalorder %s7124_s25, 2  ;;  %s4712_s15 = sand.u32 1, %s7096_s18  }
 0x5a5   : > { %s4713_s16 = scalar_lea.sflag [#allocation5], %s4712_s15 }
 0x5a6   : > { %p6876_p5 = pnand %p6879_p4, %p7222_p8 }
 0x5a8   : > { %7091 = dma.done.wait (!%p6876_p5), %s4713_s16, 2304  }
 0x5a9   : > { %7093 = vsyncadd (!%p6876_p5), %s4713_s16, 4294964992  ;;  %s18_s25 = sadd.s32 1, %s7124_s25   ;;  %s8563_s18 = smov %s7100_s19 }
 0x5aa   : > { %p15_p6 = scmp.ge.s32.totalorder %s18_s25, 6   ;;  %s8564_s19 = smov %s7104_s20 }
 0x5ab   : > { %s8565_s20 = smov %s7231_s11  ;;  %s8566_s21 = smov %s7116_s23 }
 0x5ac   : > { %s8567_s22 = smov %s7120_s24  ;;  %s8568_s23 = smov %s8571_s28 }
 0x5ad   : > { %s8569_s24 = smov %s8575_s29  ;;  %17 = sbr.rel (!%p15_p6) target bundleno = 5 (0x5), region = 101 }
 0x5b4   :  { %4718 = vsyncpa [#allocation5], 1 }
 0x5b5   :  { %4720 = vsyncpa [#allocation5 + $0x1], 1 }

</bundles_post_ra>
